<compile_context>
chip_gen: v6e
topology: v6e:2x2x1
jax: 0.10.0
libtpu: 0.0.40
codegen_flags: <defaults>
</compile_context>

<pallas_src>
import jax
import jax.numpy as jnp
from jax.experimental import pallas as pl
from jax.experimental.pallas import tpu as pltpu

DIM_CAPS = 16      # args.dimcaps
N_CLASS = 10

TM_TARGET = 512    # M-tile upper bound
TK_TARGET = 3584   # K-tile upper bound (28*128; divides the caps K=25088 -> nk=7)
VMEM_LIMIT = 32 * 1024 * 1024   # safe on v5e/v6e/v7x for the tile sizes used here


# ---------------------------------------------------------------------------
# Pallas kernels: fused GEMM + bias + tanh
# ---------------------------------------------------------------------------
def _mm_bias_tanh_single_k(x_ref, w_ref, b_ref, o_ref):
    """Whole K in one block: no accumulator scratch needed."""
    y = jnp.dot(x_ref[...], w_ref[...], preferred_element_type=jnp.float32)
    o_ref[...] = jnp.tanh(y + b_ref[...]).astype(o_ref.dtype)


def _mm_bias_tanh_multi_k(x_ref, w_ref, b_ref, o_ref, acc_ref):
    """K-reduction tiled on the (last) grid axis; f32 accumulator in VMEM."""
    @pl.when(pl.program_id(1) == 0)
    def _():
        acc_ref[...] = jnp.zeros_like(acc_ref)

    acc_ref[...] += jnp.dot(x_ref[...], w_ref[...],
                            preferred_element_type=jnp.float32)

    @pl.when(pl.program_id(1) == pl.num_programs(1) - 1)
    def _():
        o_ref[...] = jnp.tanh(acc_ref[...] + b_ref[...]).astype(o_ref.dtype)


def _choose_tile(dim, target, align):
    """Largest divisor of `dim` that is a multiple of `align` and <= target.
    Falls back to the full dim (always a legal block size)."""
    if dim <= target:
        return dim
    start = target - (target % align)
    for t in range(start, 0, -align):
        if dim % t == 0:
            return t
    return dim


def fused_matmul_bias_tanh(x, w, bias, out_dtype=jnp.float32):
    """y = tanh(x @ w + bias).  x:[M,K]  w:[K,C]  bias:[C].

    Matmul runs in bf16 (f32 accumulation); epilogue in f32; output cast to
    `out_dtype`.  C < 128 is padded to a lane-dense 128 and sliced afterwards.
    """
    M, K = x.shape
    K2, C = w.shape
    assert K == K2

    # Lane-dense output channel dim.
    Cp = 128 if C < 128 else C
    if Cp != C:
        w = jnp.pad(w, ((0, 0), (0, Cp - C)))
        bias = jnp.pad(bias, (0, Cp - C))

    TM = _choose_tile(M, TM_TARGET, 16)    # 16: bf16 sublane packing
    TK = _choose_tile(K, TK_TARGET, 128)   # 128: lane width
    nm = M // TM
    nk = K // TK

    xb = x.astype(jnp.bfloat16)
    wb = w.astype(jnp.bfloat16)
    bias2 = bias.reshape(1, Cp).astype(jnp.float32)

    out_itemsize = jnp.dtype(out_dtype).itemsize
    cost = pl.CostEstimate(
        flops=2 * M * K * Cp,
        transcendentals=M * Cp,
        bytes_accessed=(M * K + nm * K * Cp) * 2 + M * Cp * out_itemsize + Cp * 4,
    )

    if nk == 1:
        grid = (nm,)
        kernel = _mm_bias_tanh_single_k
        in_specs = [
            pl.BlockSpec((TM, K), lambda m: (m, 0)),
            pl.BlockSpec((K, Cp), lambda m: (0, 0)),
            pl.BlockSpec((1, Cp), lambda m: (0, 0)),
        ]
        out_specs = pl.BlockSpec((TM, Cp), lambda m: (m, 0))
        scratch_shapes = []
        semantics = ("parallel",)
    else:
        grid = (nm, nk)                      # reduction axis last
        kernel = _mm_bias_tanh_multi_k
        in_specs = [
            pl.BlockSpec((TM, TK), lambda m, k: (m, k)),
            pl.BlockSpec((TK, Cp), lambda m, k: (k, 0)),
            pl.BlockSpec((1, Cp), lambda m, k: (0, 0)),
        ]
        out_specs = pl.BlockSpec((TM, Cp), lambda m, k: (m, 0))
        scratch_shapes = [pltpu.VMEM((TM, Cp), jnp.float32)]
        semantics = ("parallel", "arbitrary")

    y = pl.pallas_call(
        kernel,
        out_shape=jax.ShapeDtypeStruct((M, Cp), out_dtype),
        grid_spec=pltpu.PrefetchScalarGridSpec(
            num_scalar_prefetch=0,
            grid=grid,
            in_specs=in_specs,
            out_specs=out_specs,
            scratch_shapes=scratch_shapes,
        ),
        compiler_params=pltpu.CompilerParams(
            dimension_semantics=semantics,
            vmem_limit_bytes=VMEM_LIMIT,
        ),
        cost_estimate=cost,
    )(xb, wb, bias2)

    if Cp != C:
        y = y[:, :C]
    return y


# ---------------------------------------------------------------------------
# JAX glue: NHWC im2col, layer wrappers
# ---------------------------------------------------------------------------
def im2col_3x3_nhwc(x, stride):
    """x: [N, H, W, C] -> patches [N*Ho*Wo, 9*C]  (pad=1, 'same'-style).

    K-axis order is (kh, kw, Cin), channel-contiguous (lane-friendly)."""
    N, H, W, C = x.shape
    xp = jnp.pad(x, ((0, 0), (1, 1), (1, 1), (0, 0)))
    Ho = (H + 2 - 3) // stride + 1
    Wo = (W + 2 - 3) // stride + 1
    slices = []
    for di in range(3):
        for dj in range(3):
            sl = xp[:, di:di + stride * (Ho - 1) + 1:stride,
                    dj:dj + stride * (Wo - 1) + 1:stride, :]
            slices.append(sl)                       # [N, Ho, Wo, C]
    pat = jnp.concatenate(slices, axis=-1)          # [N, Ho, Wo, 9*C]
    return pat.reshape(N * Ho * Wo, 9 * C), (N, Ho, Wo)


def conv3x3_bias_tanh(x, w, bias, stride=1, out_dtype=jnp.bfloat16):
    """3x3 conv (NHWC activations, PyTorch weight [Cout,Cin,3,3], BN scale
    already folded into w) + bias + tanh, via im2col GEMM."""
    Cout = w.shape[0]
    pat, (N, Ho, Wo) = im2col_3x3_nhwc(x, stride)          # [M, 9*Cin]
    w2 = jnp.transpose(w, (2, 3, 1, 0)).reshape(-1, Cout)  # [(kh,kw,Cin), Cout]
    y = fused_matmul_bias_tanh(pat, w2, bias, out_dtype=out_dtype)
    return y.reshape(N, Ho, Wo, Cout)


def net_forward(x_nchw, p):
    """Net.forward, layernum == 0 branch.  x_nchw: [N, 1, 28, 28]."""
    x = jnp.transpose(x_nchw, (0, 2, 3, 1)).astype(jnp.bfloat16)    # NHWC

    bn1 = conv3x3_bias_tanh(x, p["w1"], p["b1"], stride=1)          # [N,28,28,64]
    bn2 = conv3x3_bias_tanh(bn1, p["w2"], p["b2"], stride=1)        # [N,28,28,64]
    pc = conv3x3_bias_tanh(bn2, p["wp"], p["bp"], stride=2)         # [N,14,14,128]

    # PrimaryCap: 128 channels = 8 capsule types x 16 dims; flatten NHWC order.
    N = pc.shape[0]
    u = pc.reshape(N, -1)                                           # [N, 25088]

    # FullyConvCaps as a single capsule GEMM + tanh (no routing, see TODO).
    zero_bias = jnp.zeros((N_CLASS * DIM_CAPS,), jnp.float32)
    y = fused_matmul_bias_tanh(u, p["wfc"], zero_bias, out_dtype=jnp.float32)
    return y.reshape(N, N_CLASS, DIM_CAPS)


# ---------------------------------------------------------------------------
# Deterministic parameter construction (BN folded, scale folded into weights)
# ---------------------------------------------------------------------------
def make_params(key):
    ks = jax.random.split(key, 16)
    eps = 1e-5

    def rnd(k, shape, s):
        return s * jax.random.normal(k, shape, jnp.float32)

    def fold_bn(kg, kb, km, kv, c):
        gamma = 1.0 + rnd(kg, (c,), 0.05)
        beta = rnd(kb, (c,), 0.05)
        mean = rnd(km, (c,), 0.05)
        var = 1.0 + jnp.abs(rnd(kv, (c,), 0.05))
        scale = gamma / jnp.sqrt(var + eps)
        bias = beta - mean * scale
        return scale, bias

    w1 = rnd(ks[0], (64, 1, 3, 3), 0.1)
    s1, b1 = fold_bn(ks[1], ks[2], ks[3], ks[4], 64)
    w1 = w1 * s1[:, None, None, None]                 # fold BN scale into weight

    w2 = rnd(ks[5], (64, 64, 3, 3), 0.05)
    s2, b2 = fold_bn(ks[6], ks[7], ks[8], ks[9], 64)
    w2 = w2 * s2[:, None, None, None]

    wp = rnd(ks[10], (8 * DIM_CAPS, 64, 3, 3), 0.05)  # PrimaryCap conv (no BN)
    bp = rnd(ks[11], (8 * DIM_CAPS,), 0.05)

    wfc = rnd(ks[12], (8 * DIM_CAPS * 14 * 14, N_CLASS * DIM_CAPS), 0.005)
    return dict(w1=w1, b1=b1, w2=w2, b2=b2, wp=wp, bp=bp, wfc=wfc)


if __name__ == "__main__":
    key = jax.random.PRNGKey(0)
    k_x, k_p = jax.random.split(key)
    x = jax.random.normal(k_x, (2, 1, 28, 28), jnp.float32)   # MNIST-shaped NCHW
    params = make_params(k_p)

    fwd = jax.jit(net_forward)
    out = fwd(x, params)
    out = jax.block_until_ready(out)

    assert out.shape == (2, N_CLASS, DIM_CAPS), out.shape
    assert bool(jnp.all(jnp.isfinite(out)))
    print("KERNEL_OK")
</pallas_src>

<mosaic_0001>
module attributes {stable_mosaic.version = 11 : i64} {
  func.func @_mm_bias_tanh_single_k(%arg0: i32, %arg1: memref<224x9xbf16, #tpu.memory_space<vmem>>, %arg2: memref<9x128xbf16, #tpu.memory_space<vmem>>, %arg3: memref<1x128xf32, #tpu.memory_space<vmem>>, %arg4: memref<224x128xbf16, #tpu.memory_space<vmem>>) attributes {dimension_semantics = [#tpu.dimension_semantics<parallel>], iteration_bounds = array<i64: 7>, scalar_prefetch = 0 : i64, scratch_operands = 0 : i64, tpu.core_type = #tpu.core_type<tc>, window_params = [{transform_indices = @transform_0, window_bounds = array<i64: 224, 9>}, {pipeline_mode = #tpu.pipeline_mode<synchronous>, transform_indices = @transform_1, window_bounds = array<i64: 9, 128>}, {pipeline_mode = #tpu.pipeline_mode<synchronous>, transform_indices = @transform_2, window_bounds = array<i64: 1, 128>}, {transform_indices = @transform_3, window_bounds = array<i64: 224, 128>}]} {
    %c0 = arith.constant 0 : index
    %c0_0 = arith.constant 0 : index
    %0 = vector.load %arg1[%c0, %c0_0] : memref<224x9xbf16, #tpu.memory_space<vmem>>, vector<224x9xbf16>
    %c0_1 = arith.constant 0 : index
    %c0_2 = arith.constant 0 : index
    %1 = vector.load %arg2[%c0_1, %c0_2] : memref<9x128xbf16, #tpu.memory_space<vmem>>, vector<9x128xbf16>
    %cst = arith.constant dense<0.000000e+00> : vector<224x128xf32>
    %2 = tpu.matmul %0, %1, %cst {dimension_numbers = #tpu.dot_dimension_numbers<[1], [0], [0], [1], [0, 0, 1, 1], [], []>} : vector<224x9xbf16>, vector<9x128xbf16>, vector<224x128xf32> -> vector<224x128xf32>
    %c0_3 = arith.constant 0 : index
    %c0_4 = arith.constant 0 : index
    %3 = vector.load %arg3[%c0_3, %c0_4] : memref<1x128xf32, #tpu.memory_space<vmem>>, vector<1x128xf32>
    %4 = vector.broadcast %3 : vector<1x128xf32> to vector<224x128xf32>
    %5 = arith.addf %2, %4 : vector<224x128xf32>
    %6 = math.tanh %5 : vector<224x128xf32>
    %7 = arith.truncf %6 : vector<224x128xf32> to vector<224x128xbf16>
    %c0_5 = arith.constant 0 : index
    %c0_6 = arith.constant 0 : index
    %8 = vector.load %arg4[%c0_5, %c0_6] : memref<224x128xbf16, #tpu.memory_space<vmem>>, vector<224x128xbf16>
    tpu.vector_store %arg4[%c0_5, %c0_6], %7 {strides = array<i32>} : memref<224x128xbf16, #tpu.memory_space<vmem>>, vector<224x128xbf16>,
    return
  }
  func.func @transform_0(%arg0: i32) -> (i32, i32) {
    %c0_i32 = arith.constant 0 : i32
    %c0_i32_0 = arith.constant 0 : i32
    return %arg0, %c0_i32 : i32, i32
  }
  func.func @transform_1(%arg0: i32) -> (i32, i32) {
    %c0_i32 = arith.constant 0 : i32
    %c0_i32_0 = arith.constant 0 : i32
    %c0_i32_1 = arith.constant 0 : i32
    return %c0_i32, %c0_i32_0 : i32, i32
  }
  func.func @transform_2(%arg0: i32) -> (i32, i32) {
    %c0_i32 = arith.constant 0 : i32
    %c0_i32_0 = arith.constant 0 : i32
    %c0_i32_1 = arith.constant 0 : i32
    return %c0_i32, %c0_i32_0 : i32, i32
  }
  func.func @transform_3(%arg0: i32) -> (i32, i32) {
    %c0_i32 = arith.constant 0 : i32
    %c0_i32_0 = arith.constant 0 : i32
    return %arg0, %c0_i32 : i32, i32
  }
}

module attributes {stable_mosaic.version = 11 : i64} {
  func.func @_mm_bias_tanh_single_k(%arg0: i32, %arg1: memref<224x576xbf16, #tpu.memory_space<vmem>>, %arg2: memref<576x128xbf16, #tpu.memory_space<vmem>>, %arg3: memref<1x128xf32, #tpu.memory_space<vmem>>, %arg4: memref<224x128xbf16, #tpu.memory_space<vmem>>) attributes {dimension_semantics = [#tpu.dimension_semantics<parallel>], iteration_bounds = array<i64: 7>, scalar_prefetch = 0 : i64, scratch_operands = 0 : i64, tpu.core_type = #tpu.core_type<tc>, window_params = [{transform_indices = @transform_0, window_bounds = array<i64: 224, 576>}, {pipeline_mode = #tpu.pipeline_mode<synchronous>, transform_indices = @transform_1, window_bounds = array<i64: 576, 128>}, {pipeline_mode = #tpu.pipeline_mode<synchronous>, transform_indices = @transform_2, window_bounds = array<i64: 1, 128>}, {transform_indices = @transform_3, window_bounds = array<i64: 224, 128>}]} {
    %c0 = arith.constant 0 : index
    %c0_0 = arith.constant 0 : index
    %0 = vector.load %arg1[%c0, %c0_0] : memref<224x576xbf16, #tpu.memory_space<vmem>>, vector<224x576xbf16>
    %c0_1 = arith.constant 0 : index
    %c0_2 = arith.constant 0 : index
    %1 = vector.load %arg2[%c0_1, %c0_2] : memref<576x128xbf16, #tpu.memory_space<vmem>>, vector<576x128xbf16>
    %cst = arith.constant dense<0.000000e+00> : vector<224x128xf32>
    %2 = tpu.matmul %0, %1, %cst {dimension_numbers = #tpu.dot_dimension_numbers<[1], [0], [0], [1], [0, 0, 1, 1], [], []>} : vector<224x576xbf16>, vector<576x128xbf16>, vector<224x128xf32> -> vector<224x128xf32>
    %c0_3 = arith.constant 0 : index
    %c0_4 = arith.constant 0 : index
    %3 = vector.load %arg3[%c0_3, %c0_4] : memref<1x128xf32, #tpu.memory_space<vmem>>, vector<1x128xf32>
    %4 = vector.broadcast %3 : vector<1x128xf32> to vector<224x128xf32>
    %5 = arith.addf %2, %4 : vector<224x128xf32>
    %6 = math.tanh %5 : vector<224x128xf32>
    %7 = arith.truncf %6 : vector<224x128xf32> to vector<224x128xbf16>
    %c0_5 = arith.constant 0 : index
    %c0_6 = arith.constant 0 : index
    %8 = vector.load %arg4[%c0_5, %c0_6] : memref<224x128xbf16, #tpu.memory_space<vmem>>, vector<224x128xbf16>
    tpu.vector_store %arg4[%c0_5, %c0_6], %7 {strides = array<i32>} : memref<224x128xbf16, #tpu.memory_space<vmem>>, vector<224x128xbf16>,
    return
  }
  func.func @transform_0(%arg0: i32) -> (i32, i32) {
    %c0_i32 = arith.constant 0 : i32
    %c0_i32_0 = arith.constant 0 : i32
    return %arg0, %c0_i32 : i32, i32
  }
  func.func @transform_1(%arg0: i32) -> (i32, i32) {
    %c0_i32 = arith.constant 0 : i32
    %c0_i32_0 = arith.constant 0 : i32
    %c0_i32_1 = arith.constant 0 : i32
    return %c0_i32, %c0_i32_0 : i32, i32
  }
  func.func @transform_2(%arg0: i32) -> (i32, i32) {
    %c0_i32 = arith.constant 0 : i32
    %c0_i32_0 = arith.constant 0 : i32
    %c0_i32_1 = arith.constant 0 : i32
    return %c0_i32, %c0_i32_0 : i32, i32
  }
  func.func @transform_3(%arg0: i32) -> (i32, i32) {
    %c0_i32 = arith.constant 0 : i32
    %c0_i32_0 = arith.constant 0 : i32
    return %arg0, %c0_i32 : i32, i32
  }
}

module attributes {stable_mosaic.version = 11 : i64} {
  func.func @_mm_bias_tanh_single_k(%arg0: i32, %arg1: memref<392x576xbf16, #tpu.memory_space<vmem>>, %arg2: memref<576x128xbf16, #tpu.memory_space<vmem>>, %arg3: memref<1x128xf32, #tpu.memory_space<vmem>>, %arg4: memref<392x128xbf16, #tpu.memory_space<vmem>>) attributes {dimension_semantics = [#tpu.dimension_semantics<parallel>], iteration_bounds = array<i64: 1>, scalar_prefetch = 0 : i64, scratch_operands = 0 : i64, tpu.core_type = #tpu.core_type<tc>, window_params = [{transform_indices = @transform_0, window_bounds = array<i64: 392, 576>}, {pipeline_mode = #tpu.pipeline_mode<synchronous>, transform_indices = @transform_1, window_bounds = array<i64: 576, 128>}, {pipeline_mode = #tpu.pipeline_mode<synchronous>, transform_indices = @transform_2, window_bounds = array<i64: 1, 128>}, {transform_indices = @transform_3, window_bounds = array<i64: 392, 128>}]} {
    %c0 = arith.constant 0 : index
    %c0_0 = arith.constant 0 : index
    %0 = vector.load %arg1[%c0, %c0_0] : memref<392x576xbf16, #tpu.memory_space<vmem>>, vector<392x576xbf16>
    %c0_1 = arith.constant 0 : index
    %c0_2 = arith.constant 0 : index
    %1 = vector.load %arg2[%c0_1, %c0_2] : memref<576x128xbf16, #tpu.memory_space<vmem>>, vector<576x128xbf16>
    %cst = arith.constant dense<0.000000e+00> : vector<392x128xf32>
    %2 = tpu.matmul %0, %1, %cst {dimension_numbers = #tpu.dot_dimension_numbers<[1], [0], [0], [1], [0, 0, 1, 1], [], []>} : vector<392x576xbf16>, vector<576x128xbf16>, vector<392x128xf32> -> vector<392x128xf32>
    %c0_3 = arith.constant 0 : index
    %c0_4 = arith.constant 0 : index
    %3 = vector.load %arg3[%c0_3, %c0_4] : memref<1x128xf32, #tpu.memory_space<vmem>>, vector<1x128xf32>
    %4 = vector.broadcast %3 : vector<1x128xf32> to vector<392x128xf32>
    %5 = arith.addf %2, %4 : vector<392x128xf32>
    %6 = math.tanh %5 : vector<392x128xf32>
    %7 = arith.truncf %6 : vector<392x128xf32> to vector<392x128xbf16>
    %c0_5 = arith.constant 0 : index
    %c0_6 = arith.constant 0 : index
    %8 = vector.load %arg4[%c0_5, %c0_6] : memref<392x128xbf16, #tpu.memory_space<vmem>>, vector<392x128xbf16>
    tpu.vector_store %arg4[%c0_5, %c0_6], %7 {strides = array<i32>} : memref<392x128xbf16, #tpu.memory_space<vmem>>, vector<392x128xbf16>,
    return
  }
  func.func @transform_0(%arg0: i32) -> (i32, i32) {
    %c0_i32 = arith.constant 0 : i32
    %c0_i32_0 = arith.constant 0 : i32
    return %arg0, %c0_i32 : i32, i32
  }
  func.func @transform_1(%arg0: i32) -> (i32, i32) {
    %c0_i32 = arith.constant 0 : i32
    %c0_i32_0 = arith.constant 0 : i32
    %c0_i32_1 = arith.constant 0 : i32
    return %c0_i32, %c0_i32_0 : i32, i32
  }
  func.func @transform_2(%arg0: i32) -> (i32, i32) {
    %c0_i32 = arith.constant 0 : i32
    %c0_i32_0 = arith.constant 0 : i32
    %c0_i32_1 = arith.constant 0 : i32
    return %c0_i32, %c0_i32_0 : i32, i32
  }
  func.func @transform_3(%arg0: i32) -> (i32, i32) {
    %c0_i32 = arith.constant 0 : i32
    %c0_i32_0 = arith.constant 0 : i32
    return %arg0, %c0_i32 : i32, i32
  }
}

module attributes {stable_mosaic.version = 11 : i64} {
  func.func @_mm_bias_tanh_multi_k(%arg0: i32, %arg1: i32, %arg2: memref<2x3584xbf16, #tpu.memory_space<vmem>>, %arg3: memref<3584x160xbf16, #tpu.memory_space<vmem>>, %arg4: memref<1x160xf32, #tpu.memory_space<vmem>>, %arg5: memref<2x160xf32, #tpu.memory_space<vmem>>, %arg6: memref<2x160xf32, #tpu.memory_space<vmem>>) attributes {dimension_semantics = [#tpu.dimension_semantics<parallel>, #tpu.dimension_semantics<arbitrary>], iteration_bounds = array<i64: 1, 7>, scalar_prefetch = 0 : i64, scratch_operands = 1 : i64, tpu.core_type = #tpu.core_type<tc>, window_params = [{transform_indices = @transform_0, window_bounds = array<i64: 2, 3584>}, {transform_indices = @transform_1, window_bounds = array<i64: 3584, 160>}, {pipeline_mode = #tpu.pipeline_mode<synchronous>, transform_indices = @transform_2, window_bounds = array<i64: 1, 160>}, {transform_indices = @transform_3, window_bounds = array<i64: 2, 160>}]} {
    %c0_i32 = arith.constant 0 : i32
    %0 = arith.cmpi eq, %arg1, %c0_i32 : i32
    %1 = arith.extui %0 : i1 to i32
    %c0_i32_0 = arith.constant 0 : i32
    %2 = arith.cmpi ne, %1, %c0_i32_0 : i32
    scf.if %2 {
      %cst_9 = arith.constant 0.000000e+00 : f32
      %12 = vector.broadcast %cst_9 : f32 to vector<2x160xf32>
      %c0_10 = arith.constant 0 : index
      %c0_11 = arith.constant 0 : index
      %13 = vector.load %arg6[%c0_10, %c0_11] : memref<2x160xf32, #tpu.memory_space<vmem>>, vector<2x160xf32>
      tpu.vector_store %arg6[%c0_10, %c0_11], %12 {strides = array<i32>} : memref<2x160xf32, #tpu.memory_space<vmem>>, vector<2x160xf32>,
    } else {
    }
    %c0 = arith.constant 0 : index
    %c0_1 = arith.constant 0 : index
    %3 = vector.load %arg6[%c0, %c0_1] : memref<2x160xf32, #tpu.memory_space<vmem>>, vector<2x160xf32>
    %c0_2 = arith.constant 0 : index
    %c0_3 = arith.constant 0 : index
    %4 = vector.load %arg2[%c0_2, %c0_3] : memref<2x3584xbf16, #tpu.memory_space<vmem>>, vector<2x3584xbf16>
    %c0_4 = arith.constant 0 : index
    %c0_5 = arith.constant 0 : index
    %5 = vector.load %arg3[%c0_4, %c0_5] : memref<3584x160xbf16, #tpu.memory_space<vmem>>, vector<3584x160xbf16>
    %cst = arith.constant dense<0.000000e+00> : vector<2x160xf32>
    %6 = tpu.matmul %4, %5, %cst {dimension_numbers = #tpu.dot_dimension_numbers<[1], [0], [0], [1], [0, 0, 1, 1], [], []>} : vector<2x3584xbf16>, vector<3584x160xbf16>, vector<2x160xf32> -> vector<2x160xf32>
    %7 = arith.addf %3, %6 : vector<2x160xf32>
    %c0_6 = arith.constant 0 : index
    %c0_7 = arith.constant 0 : index
    %8 = vector.load %arg6[%c0_6, %c0_7] : memref<2x160xf32, #tpu.memory_space<vmem>>, vector<2x160xf32>
    tpu.vector_store %arg6[%c0_6, %c0_7], %7 {strides = array<i32>} : memref<2x160xf32, #tpu.memory_space<vmem>>, vector<2x160xf32>,
    %c6_i32 = arith.constant 6 : i32
    %9 = arith.cmpi eq, %arg1, %c6_i32 : i32
    %10 = arith.extui %9 : i1 to i32
    %c0_i32_8 = arith.constant 0 : i32
    %11 = arith.cmpi ne, %10, %c0_i32_8 : i32
    scf.if %11 {
      %c0_9 = arith.constant 0 : index
      %c0_10 = arith.constant 0 : index
      %12 = vector.load %arg6[%c0_9, %c0_10] : memref<2x160xf32, #tpu.memory_space<vmem>>, vector<2x160xf32>
      %c0_11 = arith.constant 0 : index
      %c0_12 = arith.constant 0 : index
      %13 = vector.load %arg4[%c0_11, %c0_12] : memref<1x160xf32, #tpu.memory_space<vmem>>, vector<1x160xf32>
      %14 = vector.broadcast %13 : vector<1x160xf32> to vector<2x160xf32>
      %15 = arith.addf %12, %14 : vector<2x160xf32>
      %16 = math.tanh %15 : vector<2x160xf32>
      %c0_13 = arith.constant 0 : index
      %c0_14 = arith.constant 0 : index
      %17 = vector.load %arg5[%c0_13, %c0_14] : memref<2x160xf32, #tpu.memory_space<vmem>>, vector<2x160xf32>
      tpu.vector_store %arg5[%c0_13, %c0_14], %16 {strides = array<i32>} : memref<2x160xf32, #tpu.memory_space<vmem>>, vector<2x160xf32>,
    } else {
    }
    return
  }
  func.func @transform_0(%arg0: i32, %arg1: i32) -> (i32, i32) {
    %c0_i32 = arith.constant 0 : i32
    return %arg0, %arg1 : i32, i32
  }
  func.func @transform_1(%arg0: i32, %arg1: i32) -> (i32, i32) {
    %c0_i32 = arith.constant 0 : i32
    %c0_i32_0 = arith.constant 0 : i32
    return %arg1, %c0_i32 : i32, i32
  }
  func.func @transform_2(%arg0: i32, %arg1: i32) -> (i32, i32) {
    %c0_i32 = arith.constant 0 : i32
    %c0_i32_0 = arith.constant 0 : i32
    %c0_i32_1 = arith.constant 0 : i32
    return %c0_i32, %c0_i32_0 : i32, i32
  }
  func.func @transform_3(%arg0: i32, %arg1: i32) -> (i32, i32) {
    %c0_i32 = arith.constant 0 : i32
    %c0_i32_0 = arith.constant 0 : i32
    return %arg0, %c0_i32 : i32, i32
  }
}

</mosaic_0001>

<bundles_post_ra>
// kernel: net_forward.4
= control target key start
LH: loop header
LB: loop body
LE: loop exit
PB: predicated region body
PF: predicated region fallthrough
CT: control target
= control target key end

     0   :  { %s1040_s12 = smov 0   ;;  %s1130_s0 = inlined_call_operand.vmem [shape: bf16[1568,9], index: 0, kind: input, shape index: {}]   ;;  %s1131_s1 = inlined_call_operand.vmem [shape: bf16[9,128], index: 1, kind: input, shape index: {}]   ;;  %s1132_s2 = inlined_call_operand.vmem [shape: f32[1,128], index: 2, kind: input, shape index: {}]   ;;  %s1133_s3 = inlined_call_operand.vmem [shape: bf16[1568,128], index: 3, kind: output, shape index: {}]  }
   0x1 LB: > { %s706_s13 = sadd.s32 4294967295, %s1017_s12   ;;  %p710_p0 = scmp.ge.s32.totalorder %s1017_s12, 1  ;;  %s1017_s12 = sphi %s1040_s12, %s13_s12  }
   0x2   : > { %p138_p1 = scmp.lt.s32.totalorder %s1017_s12, 8 }
   0x4   : > { %p139_p2 = pnand %p710_p0, %p138_p1 }
   0x5   : > { %s162_s16 = smul.u32 (!%p139_p2), 28, %s706_s13 }
   0x6   : > { %142 = sbr.rel (%p139_p2) target bundleno = 262 (0x106), region = 32 }
   0x7   : > { %p163_p3 = scmp.lt.s32.totalorder (!%p139_p2), %s162_s16, 195 }
   0xb   : > { %v940_v0 = vld [vmem:[%s1131_s1] sm:$0x1f]   ;;  %vm330_vm0 = vcmask 1043456   ;;  %vm331_vm1 = vcmask 1044480   ;;  %v1019_v1 = vmov 65535   ;;  %s1135_s16 = smov (!%p163_p3, %s162_s16), 195 }
   0xc   : > { %v332_v2 = vsel %vm330_vm0, 4294967295, %v1019_v1  ;;  %s711_s17 = sshll.u32 %s1135_s16, 2  ;;  %vm287_vm2 = vcmask 72704   ;;  %v1076_v19 = vld [vmem:[%s1132_s2] ss:$0 sm:$0xff] }
   0xd   : > { %v333_v3 = vsel %vm331_vm1, %v332_v2, 0  ;;  %s166_s20 = scalar_lea.vmem %s1130_s0, %s711_s17  ;;  %s1102_s25 = scalar_lea.vmem %s1133_s3, %s711_s17 }
   0xe   : > { %v335_v4 = vand.u32 %v940_v0, %v333_v3  ;;  %v941_v5 = vld [vmem:[%s166_s20] sm:$0xff]   ;;  %v942_v6 = vld [vmem:[%s166_s20 + $0x8] sm:$0xff]   ;;  %v945_v9 = vld [vmem:[%s166_s20 + $0x10] sm:$0xff]  }
   0xf   : > { %901 = vmatprep.mubr.msk.bf16.mxu0 %vm287_vm2, %v941_v5  ;;  %v943_v7 = vld [vmem:[%s166_s20 + $0x40] sm:$0xff]   ;;  %v944_v8 = vld [vmem:[%s166_s20 + $0x48] sm:$0xff]   ;;  %v947_v10 = vld [vmem:[%s166_s20 + $0x50] sm:$0xff]  }
  0x10   : > { %899 = vmatprep.subr.bf16.mxu0 %v335_v4  ;;  %929 = vmatprep.subr.bf16.mxu1 %v335_v4  ;;  %v946_v11 = vld [vmem:[%s166_s20 + $0x18] sm:$0xff]   ;;  %v949_v12 = vld [vmem:[%s166_s20 + $0x20] sm:$0xff]   ;;  %v950_v15 = vld [vmem:[%s166_s20 + $0x28] sm:$0xff]  }
  0x11   : > { %900 = vmatpush3.bf16.msra.mxu0 %v335_v4  ;;  %930 = vmatpush3.bf16.msra.mxu1 %v335_v4  ;;  %v948_v13 = vld [vmem:[%s166_s20 + $0x58] sm:$0xff]   ;;  %v951_v14 = vld [vmem:[%s166_s20 + $0x60] sm:$0xff]   ;;  %v953_v16 = vld [vmem:[%s166_s20 + $0x30] sm:$0xff]  }
  0x12   : > { %917 = vmatprep.mubr.msk.bf16.mxu1 %vm287_vm2, %v943_v7  ;;  %v952_v17 = vld [vmem:[%s166_s20 + $0x68] sm:$0xff]   ;;  %v954_v18 = vld [vmem:[%s166_s20 + $0x38] sm:$0xff]  }
  0x14   : > { %902 = vmatmul.mubr.msk.bf16.vlgmr.msra.gmra.mxu0 %vm287_vm2, %v942_v6  ;;  %918 = vmatmul.mubr.msk.bf16.vlgmr.msra.gmra.mxu1 %vm287_vm2, %v944_v8 }
  0x15   : > { %905 = vmatprep.mubr.msk.bf16.mxu0 %vm287_vm2, %v945_v9  ;;  %921 = vmatprep.mubr.msk.bf16.mxu1 %vm287_vm2, %v947_v10 }
  0x1c   : > { %906 = vmatmul.mubr.msk.bf16.gmra.mxu0 %vm287_vm2, %v946_v11  ;;  %922 = vmatmul.mubr.msk.bf16.gmra.mxu1 %vm287_vm2, %v948_v13 }
  0x1d   : > { %909 = vmatprep.mubr.msk.bf16.mxu0 %vm287_vm2, %v949_v12  ;;  %925 = vmatprep.mubr.msk.bf16.mxu1 %vm287_vm2, %v951_v14 }
  0x24   : > { %910 = vmatmul.mubr.msk.bf16.gmra.mxu0 %vm287_vm2, %v950_v15  ;;  %926 = vmatmul.mubr.msk.bf16.gmra.mxu1 %vm287_vm2, %v952_v17 }
  0x25   : > { %913 = vmatprep.mubr.msk.bf16.mxu0 %vm287_vm2, %v953_v16 }
  0x2c   : > { %914 = vmatmul.mubr.msk.bf16.gmra.mxu0 %vm287_vm2, %v954_v18 }
  0xd4   : > { %v903_v20 = vpop.f32.mrf.mxu0  ;;  %v919_v23 = vpop.f32.mrf.mxu1 }
  0xd5   : > { %v380_v21 = vadd.f32 %v903_v20, %v1076_v19  ;;  %v444_v25 = vadd.f32 %v919_v23, %v1076_v19 }
  0xd6   : > { %v371_v22 = vpop.f32.mrf.mxu0  ;;  %v435_v27 = vpop.f32.mrf.mxu1 }
  0xd7   : > { %v372_v24 = vadd.f32 %v1076_v19, %v371_v22  ;;  %955 = vtanh.f32 %v380_v21  ;;  %v436_v29 = vadd.f32 %v1076_v19, %v435_v27 }
  0xd8   : > { %v904_v26 = vpop.f32.mrf.mxu0  ;;  %v920_v31 = vpop.f32.mrf.mxu1 }
  0xd9   : > { %957 = vtanh.f32 %v372_v24  ;;  %v383_v28 = vadd.f32 %v904_v26, %v1076_v19  ;;  %v447_v33 = vadd.f32 %v920_v31, %v1076_v19 }
  0xda   : > { %959 = vtanh.f32 %v444_v25  ;;  %v374_v30 = vpop.f32.mrf.mxu0  ;;  %v438_v35 = vpop.f32.mrf.mxu1 }
  0xdb   : > { %961 = vtanh.f32 %v383_v28  ;;  %v375_v32 = vadd.f32 %v1076_v19, %v374_v30  ;;  %v439_v37 = vadd.f32 %v1076_v19, %v438_v35 }
  0xdc   : > { %963 = vtanh.f32 %v436_v29  ;;  %v907_v34 = vpop.f32.mrf.mxu0  ;;  %v923_v39 = vpop.f32.mrf.mxu1 }
  0xdd   : > { %965 = vtanh.f32 %v375_v32  ;;  %v396_v36 = vadd.f32 %v907_v34, %v1076_v19  ;;  %v460_v41 = vadd.f32 %v923_v39, %v1076_v19 }
  0xde   : > { %967 = vtanh.f32 %v447_v33  ;;  %v387_v38 = vpop.f32.mrf.mxu0  ;;  %v451_v43 = vpop.f32.mrf.mxu1 }
  0xdf   : > { %969 = vtanh.f32 %v396_v36  ;;  %v388_v40 = vadd.f32 %v1076_v19, %v387_v38  ;;  %v452_v45 = vadd.f32 %v1076_v19, %v451_v43 }
  0xe0   : > { %971 = vtanh.f32 %v439_v37  ;;  %v908_v42 = vpop.f32.mrf.mxu0  ;;  %v924_v47 = vpop.f32.mrf.mxu1 }
  0xe1   : > { %973 = vtanh.f32 %v388_v40  ;;  %v399_v44 = vadd.f32 %v908_v42, %v1076_v19  ;;  %v463_v49 = vadd.f32 %v924_v47, %v1076_v19 }
  0xe2   : > { %975 = vtanh.f32 %v460_v41  ;;  %v390_v46 = vpop.f32.mrf.mxu0  ;;  %v454_v51 = vpop.f32.mrf.mxu1 }
  0xe3   : > { %977 = vtanh.f32 %v399_v44  ;;  %v391_v48 = vadd.f32 %v1076_v19, %v390_v46  ;;  %v455_v54 = vadd.f32 %v1076_v19, %v454_v51 }
  0xe4   : > { %979 = vtanh.f32 %v452_v45  ;;  %v911_v50 = vpop.f32.mrf.mxu0  ;;  %v956_v52 = vpop.eup %955 }
  0xe5   : > { %981 = vtanh.f32 %v391_v48  ;;  %v412_v53 = vadd.f32 %v911_v50, %v1076_v19  ;;  %v927_v57 = vpop.f32.mrf.mxu1 }
  0xe6   : > { %v958_v55 = vpop.eup %957  ;;  %983 = vtanh.f32 %v463_v49  ;;  %v403_v56 = vpop.f32.mrf.mxu0  ;;  %v476_v60 = vadd.f32 %v927_v57, %v1076_v19 }
  0xe7   : > { %v960_v58 = vpop.eup %959  ;;  %985 = vtanh.f32 %v412_v53  ;;  %v404_v59 = vadd.f32 %v1076_v19, %v403_v56  ;;  %v467_v63 = vpop.f32.mrf.mxu1 }
  0xe8   : > { %v962_v61 = vpop.eup %961  ;;  %987 = vtanh.f32 %v455_v54  ;;  %v912_v62 = vpop.f32.mrf.mxu0  ;;  %v468_v3 = vadd.f32 %v1076_v19, %v467_v63 }
  0xe9   : > { %v964_v0 = vpop.eup %963  ;;  %v809_v1 = vpack.c.bf16 %v962_v61, %v956_v52  ;;  %989 = vtanh.f32 %v404_v59  ;;  %v415_v2 = vadd.f32 %v912_v62, %v1076_v19  ;;  %v928_v6 = vpop.f32.mrf.mxu1 }
  0xea   : > { %v966_v4 = vpop.eup %965  ;;  %991 = vtanh.f32 %v476_v60  ;;  %v406_v5 = vpop.f32.mrf.mxu0  ;;  %v479_v10 = vadd.f32 %v928_v6, %v1076_v19 }
  0xeb   : > { %v968_v7 = vpop.eup %967  ;;  %871 = vst [vmem:[%s1102_s25 + $0x8] sm:$0xff] %v809_v1   ;;  %v804_v8 = vpack.c.bf16 %v966_v4, %v958_v55  ;;  %993 = vtanh.f32 %v415_v2  ;;  %v407_v9 = vadd.f32 %v1076_v19, %v406_v5  ;;  %v470_v14 = vpop.f32.mrf.mxu1 }
  0xec   : > { %v970_v11 = vpop.eup %969  ;;  %v849_v12 = vpack.c.bf16 %v968_v7, %v960_v58  ;;  %995 = vtanh.f32 %v468_v3  ;;  %v915_v13 = vpop.f32.mrf.mxu0  ;;  %v471_v16 = vadd.f32 %v1076_v19, %v470_v14 }
  0xed   : > { %v972_v15 = vpop.eup %971  ;;  %805 = vst [vmem:[%s1102_s25] sm:$0xff] %v804_v8   ;;  %997 = vtanh.f32 %v407_v9  ;;  %v428_v20 = vadd.f32 %v915_v13, %v1076_v19 }
  0xee   : > { %v974_v17 = vpop.eup %973  ;;  %879 = vst [vmem:[%s1102_s25 + $0x48] sm:$0xff] %v849_v12   ;;  %v844_v18 = vpack.c.bf16 %v972_v15, %v964_v0  ;;  %999 = vtanh.f32 %v479_v10  ;;  %v419_v21 = vpop.f32.mrf.mxu0 }
  0xef   : > { %v976_v22 = vpop.eup %975  ;;  %1001 = vtanh.f32 %v471_v16  ;;  %v420_v24 = vadd.f32 %v1076_v19, %v419_v21 }
  0xf0   : > { %v978_v23 = vpop.eup %977  ;;  %878 = vst [vmem:[%s1102_s25 + $0x40] sm:$0xff] %v844_v18   ;;  %v916_v25 = vpop.f32.mrf.mxu0  ;;  %1003 = vtanh.f32 %v428_v20 }
  0xf1   : > { %v980_v26 = vpop.eup %979  ;;  %v819_v27 = vpack.c.bf16 %v978_v23, %v970_v11  ;;  %v431_v28 = vadd.f32 %v916_v25, %v1076_v19 }
  0xf2   : > { %v982_v29 = vpop.eup %981  ;;  %v422_v30 = vpop.f32.mrf.mxu0 }
  0xf3   : > { %v984_v31 = vpop.eup %983  ;;  %873 = vst [vmem:[%s1102_s25 + $0x18] sm:$0xff] %v819_v27   ;;  %v814_v32 = vpack.c.bf16 %v982_v29, %v974_v17  ;;  %1005 = vtanh.f32 %v431_v28  ;;  %v423_v33 = vadd.f32 %v1076_v19, %v422_v30 }
  0xf4   : > { %v986_v34 = vpop.eup %985  ;;  %v859_v35 = vpack.c.bf16 %v984_v31, %v976_v22  ;;  %1007 = vtanh.f32 %v420_v24 }
  0xf5   : > { %v988_v36 = vpop.eup %987  ;;  %872 = vst [vmem:[%s1102_s25 + $0x10] sm:$0xff] %v814_v32   ;;  %1009 = vtanh.f32 %v423_v33 }
  0xf6   : > { %v990_v37 = vpop.eup %989  ;;  %881 = vst [vmem:[%s1102_s25 + $0x58] sm:$0xff] %v859_v35   ;;  %v854_v38 = vpack.c.bf16 %v988_v36, %v980_v26 }
  0xf7   : > { %v992_v39 = vpop.eup %991 }
  0xf8   : > { %v994_v40 = vpop.eup %993  ;;  %880 = vst [vmem:[%s1102_s25 + $0x50] sm:$0xff] %v854_v38  }
  0xf9   : > { %v996_v41 = vpop.eup %995  ;;  %v829_v42 = vpack.c.bf16 %v994_v40, %v986_v34 }
  0xfa   : > { %v998_v19 = vpop.eup %997 }
  0xfb   : > { %v1000_v43 = vpop.eup %999  ;;  %875 = vst [vmem:[%s1102_s25 + $0x28] sm:$0xff] %v829_v42   ;;  %v824_v44 = vpack.c.bf16 %v998_v19, %v990_v37 }
  0xfc   : > { %v869_v45 = vpack.c.bf16 %v1000_v43, %v992_v39  ;;  %v1002_v46 = vpop.eup %1001 }
  0xfd   : > { %874 = vst [vmem:[%s1102_s25 + $0x20] sm:$0xff] %v824_v44   ;;  %v864_v47 = vpack.c.bf16 %v1002_v46, %v996_v41  ;;  %v1004_v48 = vpop.eup %1003 }
  0xfe   : > { %883 = vst [vmem:[%s1102_s25 + $0x68] sm:$0xff] %v869_v45  }
  0xff   : > { %882 = vst [vmem:[%s1102_s25 + $0x60] sm:$0xff] %v864_v47  }
 0x100   : > { %v1006_v49 = vpop.eup %1005 }
 0x101   : > { %v1008_v50 = vpop.eup %1007  ;;  %v839_v51 = vpack.c.bf16 %v1006_v49, %v1004_v48 }
 0x102   : > { %v1010_v52 = vpop.eup %1009 }
 0x103   : > { %877 = vst [vmem:[%s1102_s25 + $0x38] sm:$0xff] %v839_v51   ;;  %v834_v53 = vpack.c.bf16 %v1010_v52, %v1008_v50 }
 0x105   : > { %876 = vst [vmem:[%s1102_s25 + $0x30] sm:$0xff] %v834_v53  }
 0x106 PF: > { %s13_s12 = sadd.s32 1, %s1017_s12  }
 0x107   : > { %p10_p4 = scmp.ge.s32.totalorder %s13_s12, 9  }
 0x109   :  { %12 = sbr.rel (!%p10_p4) target bundleno = 1 (0x1), region = 62 }

// kernel: net_forward.5
= control target key start
LH: loop header
LB: loop body
LE: loop exit
PB: predicated region body
PF: predicated region fallthrough
CT: control target
= control target key end

     0   :  { %s2367_s12 = smov 0   ;;  %s2738_s0 = inlined_call_operand.vmem [shape: bf16[1568,576], index: 0, kind: input, shape index: {}]   ;;  %s2739_s1 = inlined_call_operand.vmem [shape: bf16[576,128], index: 1, kind: input, shape index: {}]   ;;  %s2740_s2 = inlined_call_operand.vmem [shape: f32[1,128], index: 2, kind: input, shape index: {}]   ;;  %s2741_s3 = inlined_call_operand.vmem [shape: bf16[1568,128], index: 3, kind: output, shape index: {}]  }
   0x1 LB: > { %s1609_s13 = sadd.s32 4294967295, %s2345_s12   ;;  %p1613_p0 = scmp.ge.s32.totalorder %s2345_s12, 1  ;;  %s2345_s12 = sphi %s2367_s12, %s13_s12  }
   0x2   : > { %p139_p1 = scmp.lt.s32.totalorder %s2345_s12, 8 }
   0x4   : > { %p140_p2 = pnand %p1613_p0, %p139_p1 }
   0x6   : > { %143 = sbr.rel (%p140_p2) target bundleno = 399 (0x18f), region = 32 }
   0xb   : > { %v2149_v0 = vld [vmem:[%s2739_s1 + $0x78] sm:$0xff]   ;;  %v2153_v4 = vld [vmem:[%s2739_s1 + $0x70] sm:$0xff]   ;;  %v2157_v8 = vld [vmem:[%s2739_s1 + $0x68] sm:$0xff]   ;;  %s164_s17 = smul.u32 28, %s1609_s13  ;;  %vm907_vm0 = vcmask 523264  }
   0xc   : > { %v2150_v1 = vld [vmem:[%s2739_s1 + $0xf8] sm:$0xff]   ;;  %1878 = vmatprep.subr.bf16.mxu0 %v2149_v0  ;;  %v2154_v5 = vld [vmem:[%s2739_s1 + $0xf0] sm:$0xff]   ;;  %v2158_v9 = vld [vmem:[%s2739_s1 + $0xe8] sm:$0xff]  }
   0xd   : > { %v2151_v2 = vld [vmem:[%s2739_s1 + $0x38] sm:$0xff]   ;;  %1978 = vmatprep.subr.bf16.mxu1 %v2150_v1  ;;  %v2155_v6 = vld [vmem:[%s2739_s1 + $0x30] sm:$0xff]   ;;  %v2159_v10 = vld [vmem:[%s2739_s1 + $0x28] sm:$0xff]   ;;  %p165_p3 = scmp.lt.s32.totalorder %s164_s17, 195 }
   0xe   : > { %v2152_v3 = vld [vmem:[%s2739_s1 + $0xb8] sm:$0xff]   ;;  %1879 = vmatpush3.bf16.msra.mxu0 %v2151_v2  ;;  %v2156_v7 = vld [vmem:[%s2739_s1 + $0xb0] sm:$0xff]   ;;  %v2160_v11 = vld [vmem:[%s2739_s1 + $0xa8] sm:$0xff]  }
   0xf   : > { %1979 = vmatpush3.bf16.msra.mxu1 %v2152_v3  ;;  %1880 = vmatprep.subr.bf16.mxu0 %v2153_v4  ;;  %v2161_v12 = vld [vmem:[%s2739_s1 + $0x60] sm:$0xff]   ;;  %v2165_v16 = vld [vmem:[%s2739_s1 + $0x58] sm:$0xff]   ;;  %v2169_v20 = vld [vmem:[%s2739_s1 + $0x50] sm:$0xff]   ;;  %s2765_s17 = smov (!%p165_p3, %s164_s17), 195 }
  0x10   : > { %1980 = vmatprep.subr.bf16.mxu1 %v2154_v5  ;;  %v2162_v13 = vld [vmem:[%s2739_s1 + $0xe0] sm:$0xff]   ;;  %v2166_v17 = vld [vmem:[%s2739_s1 + $0xd8] sm:$0xff]   ;;  %v2170_v21 = vld [vmem:[%s2739_s1 + $0xd0] sm:$0xff]   ;;  %s2140_s16 = smul.u32 20, %s2765_s17  ;;  %s1615_s18 = sshll.u32 %s2765_s17, 2 }
  0x11   : > { %v2163_v14 = vld [vmem:[%s2739_s1 + $0x20] sm:$0xff]   ;;  %v2167_v18 = vld [vmem:[%s2739_s1 + $0x18] sm:$0xff]   ;;  %v2171_v22 = vld [vmem:[%s2739_s1 + $0x10] sm:$0xff]   ;;  %s2713_s20 = scalar_lea.vmem %s2741_s3, %s1615_s18 }
  0x12   : > { %1881 = vmatpush3.bf16.msra.mxu0 %v2155_v6  ;;  %v2164_v15 = vld [vmem:[%s2739_s1 + $0xa0] sm:$0xff]   ;;  %v2168_v19 = vld [vmem:[%s2739_s1 + $0x98] sm:$0xff]   ;;  %v2172_v23 = vld [vmem:[%s2739_s1 + $0x90] sm:$0xff]   ;;  %s2473_s27 = scalar_lea.vmem %s2738_s0, %s2140_s16 }
  0x13   : > { %1981 = vmatpush3.bf16.msra.mxu1 %v2156_v7  ;;  %1882 = vmatprep.subr.bf16.mxu0 %v2157_v8  ;;  %v2173_v24 = vld [vmem:[%s2739_s1 + $0x48] sm:$0xff]   ;;  %v2177_v28 = vld [vmem:[%s2739_s1 + $0x40] sm:$0xff]   ;;  %v2187_v36 = vld [vmem:[%s2739_s1 + $0x118] sm:$0xff]  }
  0x14   : > { %1982 = vmatprep.subr.bf16.mxu1 %v2158_v9  ;;  %v2174_v25 = vld [vmem:[%s2739_s1 + $0xc8] sm:$0xff]   ;;  %v2178_v29 = vld [vmem:[%s2739_s1 + $0xc0] sm:$0xff]   ;;  %v2196_v42 = vld [vmem:[%s2473_s27 + $0x5c] ss:$20 sps:$4 sm:$0xff]  }
  0x15   : > { %v2175_v26 = vld [vmem:[%s2739_s1 + $0x8] sm:$0xff]   ;;  %v2179_v30 = vld [vmem:[%s2739_s1] sm:$0xff]   ;;  %v2206_v43 = vld [vmem:[%s2739_s1 + $0x110] sm:$0xff]  }
  0x16   : > { %1883 = vmatpush3.bf16.msra.mxu0 %v2159_v10  ;;  %v2176_v27 = vld [vmem:[%s2739_s1 + $0x88] sm:$0xff]   ;;  %v2180_v31 = vld [vmem:[%s2739_s1 + $0x80] sm:$0xff]   ;;  %v2200_v46 = vld [vmem:[%s2473_s27 + $0x7c] ss:$20 sps:$4 sm:$0xff]  }
  0x17   : > { %1983 = vmatpush3.bf16.msra.mxu1 %v2160_v11  ;;  %1884 = vmatprep.subr.bf16.mxu0 %v2161_v12  ;;  %v2181_v32 = vld [vmem:[%s2473_s27] ss:$20 sps:$4 sm:$0xff]   ;;  %v2183_v33 = vld [vmem:[%s2473_s27 + $0x4] ss:$20 sps:$4 sm:$0xff]   ;;  %v2184_v34 = vld [vmem:[%s2473_s27 + $0x8] ss:$20 sps:$4 sm:$0xff]  }
  0x18   : > { %1984 = vmatprep.subr.bf16.mxu1 %v2162_v13  ;;  %v2186_v35 = vld [vmem:[%s2473_s27 + $0xc] ss:$20 sps:$4 sm:$0xff]   ;;  %982 = vmatprep.mubr.bf16.mxu0 %v2183_v33  ;;  %v2190_v38 = vld [vmem:[%s2473_s27 + $0x34] ss:$20 sps:$4 sm:$0xff]   ;;  %v2193_v40 = vld [vmem:[%s2473_s27 + $0x30] ss:$20 sps:$4 sm:$0xff]  }
  0x19   : > { %1127 = vmatprep.mubr.bf16.mxu1 %v2186_v35  ;;  %v2188_v37 = vld [vmem:[%s2473_s27 + $0x2c] ss:$20 sps:$4 sm:$0xff]   ;;  %v2192_v39 = vld [vmem:[%s2473_s27 + $0x28] ss:$20 sps:$4 sm:$0xff]   ;;  %v2198_v44 = vld [vmem:[%s2473_s27 + $0x50] ss:$20 sps:$4 sm:$0xff]  }
  0x1a   : > { %1885 = vmatpush3.bf16.msra.mxu0 %v2163_v14  ;;  %v2194_v41 = vld [vmem:[%s2473_s27 + $0x54] ss:$20 sps:$4 sm:$0xff]   ;;  %v2199_v45 = vld [vmem:[%s2473_s27 + $0x58] ss:$20 sps:$4 sm:$0xff]   ;;  %v2250_v56 = vld [vmem:[%s2739_s1 + $0x100] sm:$0xff]  }
  0x1b   : > { %1985 = vmatpush3.bf16.msra.mxu1 %v2164_v15  ;;  %1886 = vmatprep.subr.bf16.mxu0 %v2165_v16  ;;  %v2202_v47 = vld [vmem:[%s2473_s27 + $0x84] ss:$20 sps:$4 sm:$0xff]   ;;  %v2205_v49 = vld [vmem:[%s2473_s27 + $0x80] ss:$20 sps:$4 sm:$0xff]   ;;  %v2231_v50 = vld [vmem:[%s2739_s1 + $0x108] sm:$0xff]  }
  0x1c   : > { %1986 = vmatprep.subr.bf16.mxu1 %v2166_v17  ;;  %v2204_v48 = vld [vmem:[%s2473_s27 + $0x78] ss:$20 sps:$4 sm:$0xff]   ;;  %v2211_v53 = vld [vmem:[%s2473_s27 + $0xa0] ss:$20 sps:$4 sm:$0xff]   ;;  %v2212_v54 = vld [vmem:[%s2473_s27 + $0xa8] ss:$20 sps:$4 sm:$0xff]  }
  0x1d   : > { %v2207_v51 = vld [vmem:[%s2473_s27 + $0xa4] ss:$20 sps:$4 sm:$0xff]   ;;  %v2209_v52 = vld [vmem:[%s2473_s27 + $0xac] ss:$20 sps:$4 sm:$0xff]   ;;  %v2215_v57 = vld [vmem:[%s2473_s27 + $0xd4] ss:$20 sps:$4 sm:$0xff]  }
  0x1e   : > { %1887 = vmatpush3.bf16.msra.mxu0 %v2167_v18  ;;  %v2213_v55 = vld [vmem:[%s2473_s27 + $0xcc] ss:$20 sps:$4 sm:$0xff]   ;;  %v2217_v58 = vld [vmem:[%s2473_s27 + $0xc8] ss:$20 sps:$4 sm:$0xff]   ;;  %v2218_v59 = vld [vmem:[%s2473_s27 + $0xd0] ss:$20 sps:$4 sm:$0xff]  }
  0x1f   : > { %1987 = vmatpush3.bf16.msra.mxu1 %v2168_v19  ;;  %1888 = vmatprep.subr.bf16.mxu0 %v2169_v20  ;;  %v2219_v60 = vld [vmem:[%s2473_s27 + $0xf4] ss:$20 sps:$4 sm:$0xff]   ;;  %v2221_v61 = vld [vmem:[%s2473_s27 + $0xfc] ss:$20 sps:$4 sm:$0xff]   ;;  %v2224_v63 = vld [vmem:[%s2473_s27 + $0xf8] ss:$20 sps:$4 sm:$0xff]  }
  0x20   : > { %1988 = vmatprep.subr.bf16.mxu1 %v2170_v21  ;;  %v2223_v62 = vld [vmem:[%s2473_s27 + $0xf0] ss:$20 sps:$4 sm:$0xff]   ;;  %v2229_v2 = vld [vmem:[%s2473_s27 + $0x118] ss:$20 sps:$4 sm:$0xff]   ;;  %v2230_v3 = vld [vmem:[%s2473_s27 + $0x120] ss:$20 sps:$4 sm:$0xff]  }
  0x21   : > { %v2225_v0 = vld [vmem:[%s2473_s27 + $0x11c] ss:$20 sps:$4 sm:$0xff]   ;;  %v2227_v1 = vld [vmem:[%s2473_s27 + $0x124] ss:$20 sps:$4 sm:$0xff]   ;;  %v2234_v5 = vld [vmem:[%s2473_s27 + $0x14c] ss:$20 sps:$4 sm:$0xff]  }
  0x22   : > { %1889 = vmatpush3.bf16.msra.mxu0 %v2171_v22  ;;  %v2232_v4 = vld [vmem:[%s2473_s27 + $0x144] ss:$20 sps:$4 sm:$0xff]   ;;  %v2236_v6 = vld [vmem:[%s2473_s27 + $0x140] ss:$20 sps:$4 sm:$0xff]   ;;  %v2237_v7 = vld [vmem:[%s2473_s27 + $0x148] ss:$20 sps:$4 sm:$0xff]  }
  0x23   : > { %1989 = vmatpush3.bf16.msra.mxu1 %v2172_v23  ;;  %1890 = vmatprep.subr.bf16.mxu0 %v2173_v24  ;;  %v2238_v8 = vld [vmem:[%s2473_s27 + $0x16c] ss:$20 sps:$4 sm:$0xff]   ;;  %v2240_v9 = vld [vmem:[%s2473_s27 + $0x174] ss:$20 sps:$4 sm:$0xff]   ;;  %v2243_v11 = vld [vmem:[%s2473_s27 + $0x170] ss:$20 sps:$4 sm:$0xff]  }
  0x24   : > { %1990 = vmatprep.subr.bf16.mxu1 %v2174_v25  ;;  %v2242_v10 = vld [vmem:[%s2473_s27 + $0x168] ss:$20 sps:$4 sm:$0xff]   ;;  %v2248_v14 = vld [vmem:[%s2473_s27 + $0x190] ss:$20 sps:$4 sm:$0xff]   ;;  %v2249_v15 = vld [vmem:[%s2473_s27 + $0x198] ss:$20 sps:$4 sm:$0xff]  }
  0x25   : > { %v2244_v12 = vld [vmem:[%s2473_s27 + $0x194] ss:$20 sps:$4 sm:$0xff]   ;;  %v2246_v13 = vld [vmem:[%s2473_s27 + $0x19c] ss:$20 sps:$4 sm:$0xff]   ;;  %v2253_v17 = vld [vmem:[%s2473_s27 + $0x1c4] ss:$20 sps:$4 sm:$0xff]  }
  0x26   : > { %1891 = vmatpush3.bf16.msra.mxu0 %v2175_v26  ;;  %v2251_v16 = vld [vmem:[%s2473_s27 + $0x1bc] ss:$20 sps:$4 sm:$0xff]   ;;  %v2255_v18 = vld [vmem:[%s2473_s27 + $0x1b8] ss:$20 sps:$4 sm:$0xff]   ;;  %v2256_v19 = vld [vmem:[%s2473_s27 + $0x1c0] ss:$20 sps:$4 sm:$0xff]  }
  0x27   : > { %1991 = vmatpush3.bf16.msra.mxu1 %v2176_v27  ;;  %1892 = vmatprep.subr.bf16.mxu0 %v2177_v28  ;;  %v2257_v20 = vld [vmem:[%s2473_s27 + $0x1e4] ss:$20 sps:$4 sm:$0xff]   ;;  %v2259_v21 = vld [vmem:[%s2473_s27 + $0x1ec] ss:$20 sps:$4 sm:$0xff]   ;;  %v2262_v23 = vld [vmem:[%s2473_s27 + $0x1e8] ss:$20 sps:$4 sm:$0xff]  }
  0x28   : > { %1992 = vmatprep.subr.bf16.mxu1 %v2178_v29  ;;  %v2261_v22 = vld [vmem:[%s2473_s27 + $0x1e0] ss:$20 sps:$4 sm:$0xff]   ;;  %v2267_v26 = vld [vmem:[%s2473_s27 + $0x208] ss:$20 sps:$4 sm:$0xff]   ;;  %v2268_v27 = vld [vmem:[%s2473_s27 + $0x210] ss:$20 sps:$4 sm:$0xff]  }
  0x29   : > { %v2263_v24 = vld [vmem:[%s2473_s27 + $0x20c] ss:$20 sps:$4 sm:$0xff]   ;;  %v2265_v25 = vld [vmem:[%s2473_s27 + $0x214] ss:$20 sps:$4 sm:$0xff]   ;;  %v2269_v28 = vld [vmem:[%s2473_s27 + $0x10] ss:$20 sps:$4 sm:$0xff]  }
  0x2a   : > { %1893 = vmatpush3.bf16.msra.mxu0 %v2179_v30  ;;  %v2270_v29 = vld [vmem:[%s2473_s27 + $0x150] ss:$20 sps:$4 sm:$0xff]   ;;  %v2271_v30 = vld [vmem:[%s2473_s27 + $0x38] ss:$20 sps:$4 sm:$0xff]   ;;  %v2274_v33 = vld [vmem:[%s2473_s27 + $0x1a0] ss:$20 sps:$4 sm:$0xff]  }
  0x2b   : > { %1993 = vmatpush3.bf16.msra.mxu1 %v2180_v31  ;;  %2096 = vmatprep.subr.bf16.mxu0 %v2187_v36  ;;  %v2272_v31 = vld [vmem:[%s2473_s27 + $0x178] ss:$20 sps:$4 sm:$0xff]   ;;  %v2276_v35 = vld [vmem:[%s2473_s27 + $0x1c8] ss:$20 sps:$4 sm:$0xff]  }
  0x2c   : > { %2132 = vmatprep.subr.bf16.mxu1 %v2187_v36 }
  0x2d   : > { %983 = vmatmul.mubr.bf16.vlgmr.msra.gmra.mxu0 %v2181_v32  ;;  %v2273_v32 = vld [vmem:[%s2473_s27 + $0x60] ss:$20 sps:$4 sm:$0xff]  }
  0x2e   : > { %1128 = vmatmul.mubr.bf16.vlgmr.msra.gmra.mxu1 %v2184_v34  ;;  %2097 = vmatpush3.bf16.msra.mxu0 %v2187_v36  ;;  %v2275_v34 = vld [vmem:[%s2473_s27 + $0x88] ss:$20 sps:$4 sm:$0xff]  }
  0x2f   : > { %990 = vmatprep.mubr.bf16.mxu0 %v2188_v37  ;;  %1135 = vmatprep.mubr.bf16.mxu1 %v2190_v38  ;;  %v2278_v37 = vld [vmem:[%s2473_s27 + $0x1f0] ss:$20 sps:$4 sm:$0xff]   ;;  %v2279_v38 = vld [vmem:[%s2473_s27 + $0xd8] ss:$20 sps:$4 sm:$0xff]  }
  0x30   : > { %2136 = vmatpush3.bf16.msra.mxu1 %v2187_v36  ;;  %2098 = vmatprep.subr.bf16.mxu0 %v2206_v43  ;;  %v2277_v36 = vld [vmem:[%s2473_s27 + $0xb0] ss:$20 sps:$4 sm:$0xff]  }
  0x31   : > { %2133 = vmatprep.subr.bf16.mxu1 %v2206_v43 }
  0x32   : > { %2099 = vmatpush3.bf16.msra.mxu0 %v2206_v43 }
  0x33   : > { %2100 = vmatprep.subr.bf16.mxu0 %v2231_v50 }
  0x34   : > { %2137 = vmatpush3.bf16.msra.mxu1 %v2206_v43 }
  0x35   : > { %991 = vmatmul.mubr.bf16.gmra.mxu0 %v2192_v39  ;;  %2134 = vmatprep.subr.bf16.mxu1 %v2231_v50  ;;  %v2280_v39 = vld [vmem:[%s2473_s27 + $0x218] ss:$20 sps:$4 sm:$0xff]  }
  0x36   : > { %1136 = vmatmul.mubr.bf16.gmra.mxu1 %v2193_v40  ;;  %998 = vmatprep.mubr.bf16.mxu0 %v2194_v41  ;;  %v2281_v40 = vld [vmem:[%s2473_s27 + $0x100] ss:$20 sps:$4 sm:$0xff]   ;;  %v2282_v41 = vld [vmem:[%s2473_s27 + $0x128] ss:$20 sps:$4 sm:$0xff]  }
  0x37   : > { %1143 = vmatprep.mubr.bf16.mxu1 %v2196_v42  ;;  %2101 = vmatpush3.bf16.msra.mxu0 %v2231_v50 }
  0x38   : > { %2138 = vmatpush3.bf16.msra.mxu1 %v2231_v50  ;;  %2102 = vmatprep.subr.bf16.mxu0 %v2250_v56 }
  0x39   : > { %2135 = vmatprep.subr.bf16.mxu1 %v2250_v56 }
  0x3b   : > { %2103 = vmatpush3.bf16.msra.mxu0 %v2250_v56 }
  0x3c   : > { %2139 = vmatpush3.bf16.msra.mxu1 %v2250_v56 }
  0x3d   : > { %999 = vmatmul.mubr.bf16.gmra.mxu0 %v2198_v44  ;;  %v2580_v44 = vld [vmem:[%s2740_s2] ss:$0 sm:$0xff] }
  0x3e   : > { %1144 = vmatmul.mubr.bf16.gmra.mxu1 %v2199_v45  ;;  %1006 = vmatprep.mubr.bf16.mxu0 %v2200_v46 }
  0x3f   : > { %1151 = vmatprep.mubr.bf16.mxu1 %v2202_v47 }
  0x45   : > { %1007 = vmatmul.mubr.bf16.gmra.mxu0 %v2204_v48 }
  0x46   : > { %1152 = vmatmul.mubr.bf16.gmra.mxu1 %v2205_v49  ;;  %1014 = vmatprep.mubr.bf16.mxu0 %v2207_v51 }
  0x47   : > { %1159 = vmatprep.mubr.bf16.mxu1 %v2209_v52 }
  0x4d   : > { %1015 = vmatmul.mubr.bf16.gmra.mxu0 %v2211_v53 }
  0x4e   : > { %1160 = vmatmul.mubr.bf16.gmra.mxu1 %v2212_v54  ;;  %1022 = vmatprep.mubr.bf16.mxu0 %v2213_v55 }
  0x4f   : > { %1167 = vmatprep.mubr.bf16.mxu1 %v2215_v57 }
  0x55   : > { %1023 = vmatmul.mubr.bf16.gmra.mxu0 %v2217_v58 }
  0x56   : > { %1168 = vmatmul.mubr.bf16.gmra.mxu1 %v2218_v59  ;;  %1030 = vmatprep.mubr.bf16.mxu0 %v2219_v60 }
  0x57   : > { %1175 = vmatprep.mubr.bf16.mxu1 %v2221_v61 }
  0x5d   : > { %1031 = vmatmul.mubr.bf16.gmra.mxu0 %v2223_v62 }
  0x5e   : > { %1176 = vmatmul.mubr.bf16.gmra.mxu1 %v2224_v63  ;;  %1038 = vmatprep.mubr.bf16.mxu0 %v2225_v0 }
  0x5f   : > { %1183 = vmatprep.mubr.bf16.mxu1 %v2227_v1 }
  0x65   : > { %1039 = vmatmul.mubr.bf16.gmra.mxu0 %v2229_v2 }
  0x66   : > { %1184 = vmatmul.mubr.bf16.gmra.mxu1 %v2230_v3  ;;  %1046 = vmatprep.mubr.bf16.mxu0 %v2232_v4 }
  0x67   : > { %1191 = vmatprep.mubr.bf16.mxu1 %v2234_v5 }
  0x6d   : > { %1047 = vmatmul.mubr.bf16.gmra.mxu0 %v2236_v6 }
  0x6e   : > { %1192 = vmatmul.mubr.bf16.gmra.mxu1 %v2237_v7  ;;  %1054 = vmatprep.mubr.bf16.mxu0 %v2238_v8 }
  0x6f   : > { %1199 = vmatprep.mubr.bf16.mxu1 %v2240_v9 }
  0x75   : > { %1055 = vmatmul.mubr.bf16.gmra.mxu0 %v2242_v10 }
  0x76   : > { %1200 = vmatmul.mubr.bf16.gmra.mxu1 %v2243_v11  ;;  %1062 = vmatprep.mubr.bf16.mxu0 %v2244_v12 }
  0x77   : > { %1207 = vmatprep.mubr.bf16.mxu1 %v2246_v13 }
  0x7d   : > { %1063 = vmatmul.mubr.bf16.gmra.mxu0 %v2248_v14 }
  0x7e   : > { %1208 = vmatmul.mubr.bf16.gmra.mxu1 %v2249_v15  ;;  %1070 = vmatprep.mubr.bf16.mxu0 %v2251_v16 }
  0x7f   : > { %1215 = vmatprep.mubr.bf16.mxu1 %v2253_v17 }
  0x85   : > { %1071 = vmatmul.mubr.bf16.gmra.mxu0 %v2255_v18 }
  0x86   : > { %1216 = vmatmul.mubr.bf16.gmra.mxu1 %v2256_v19  ;;  %1078 = vmatprep.mubr.bf16.mxu0 %v2257_v20 }
  0x87   : > { %1223 = vmatprep.mubr.bf16.mxu1 %v2259_v21 }
  0x8d   : > { %1079 = vmatmul.mubr.bf16.gmra.mxu0 %v2261_v22 }
  0x8e   : > { %1224 = vmatmul.mubr.bf16.gmra.mxu1 %v2262_v23  ;;  %1086 = vmatprep.mubr.bf16.mxu0 %v2263_v24 }
  0x8f   : > { %1231 = vmatprep.mubr.bf16.mxu1 %v2265_v25 }
  0x95   : > { %1087 = vmatmul.mubr.bf16.gmra.mxu0 %v2267_v26 }
  0x96   : > { %1232 = vmatmul.mubr.bf16.gmra.mxu1 %v2268_v27  ;;  %2104 = vmatprep.mubr.msk.bf16.mxu0 %vm907_vm0, %v2269_v28 }
  0x97   : > { %2120 = vmatprep.mubr.msk.bf16.mxu1 %vm907_vm0, %v2270_v29 }
  0x9d   : > { %2105 = vmatmul.mubr.msk.bf16.vlgmr.msra.gmra.mxu0 %vm907_vm0, %v2271_v30 }
  0x9e   : > { %2121 = vmatmul.mubr.msk.bf16.vlgmr.msra.gmra.mxu1 %vm907_vm0, %v2272_v31  ;;  %2108 = vmatprep.mubr.msk.bf16.mxu0 %vm907_vm0, %v2273_v32 }
  0x9f   : > { %2124 = vmatprep.mubr.msk.bf16.mxu1 %vm907_vm0, %v2274_v33 }
  0xa5   : > { %2109 = vmatmul.mubr.msk.bf16.gmra.mxu0 %vm907_vm0, %v2275_v34 }
  0xa6   : > { %2125 = vmatmul.mubr.msk.bf16.gmra.mxu1 %vm907_vm0, %v2276_v35  ;;  %2112 = vmatprep.mubr.msk.bf16.mxu0 %vm907_vm0, %v2277_v36 }
  0xa7   : > { %2128 = vmatprep.mubr.msk.bf16.mxu1 %vm907_vm0, %v2278_v37 }
  0xad   : > { %2113 = vmatmul.mubr.msk.bf16.gmra.mxu0 %vm907_vm0, %v2279_v38 }
  0xae   : > { %2129 = vmatmul.mubr.msk.bf16.gmra.mxu1 %vm907_vm0, %v2280_v39  ;;  %2116 = vmatprep.mubr.msk.bf16.mxu0 %vm907_vm0, %v2281_v40 }
  0xb5   : > { %2117 = vmatmul.mubr.msk.bf16.gmra.mxu0 %vm907_vm0, %v2282_v41 }
  0xed   : > { %v1894_v42 = vpop.f32.mrf.mxu0 }
  0xee   : > { %v1994_v43 = vpop.f32.mrf.mxu1 }
  0xef   : > { %v1895_v45 = vpop.f32.mrf.mxu0 }
  0xf0   : > { %v1896_v46 = vadd.f32 %v1895_v45, %v1894_v42  ;;  %v1995_v47 = vpop.f32.mrf.mxu1 }
  0xf1   : > { %v1996_v48 = vadd.f32 %v1995_v47, %v1994_v43  ;;  %v1897_v49 = vpop.f32.mrf.mxu0 }
  0xf2   : > { %v985_v50 = vadd.f32 %v1896_v46, %v2580_v44  ;;  %v1997_v51 = vpop.f32.mrf.mxu1 }
  0xf3   : > { %v1898_v52 = vpop.f32.mrf.mxu0 }
  0xf4   : > { %v1899_v53 = vadd.f32 %v1898_v52, %v1897_v49  ;;  %v1998_v54 = vpop.f32.mrf.mxu1  ;;  %v2583_v55 = vadd.f32 %v1996_v48, %v985_v50 }
  0xf5   : > { %v1999_v56 = vadd.f32 %v1998_v54, %v1997_v51  ;;  %v1900_v57 = vpop.f32.mrf.mxu0 }
  0xf6   : > { %v988_v58 = vadd.f32 %v1899_v53, %v2580_v44  ;;  %v2000_v59 = vpop.f32.mrf.mxu1 }
  0xf7   : > { %v1901_v60 = vpop.f32.mrf.mxu0 }
  0xf8   : > { %v1902_v61 = vadd.f32 %v1901_v60, %v1900_v57  ;;  %v2001_v62 = vpop.f32.mrf.mxu1  ;;  %v2586_v63 = vadd.f32 %v1999_v56, %v988_v58 }
  0xf9   : > { %v2002_v0 = vadd.f32 %v2001_v62, %v2000_v59  ;;  %v1903_v1 = vpop.f32.mrf.mxu0 }
  0xfa   : > { %v993_v2 = vadd.f32 %v1902_v61, %v2580_v44  ;;  %v2003_v3 = vpop.f32.mrf.mxu1 }
  0xfb   : > { %v1904_v4 = vpop.f32.mrf.mxu0 }
  0xfc   : > { %v1905_v5 = vadd.f32 %v1904_v4, %v1903_v1  ;;  %v2004_v6 = vpop.f32.mrf.mxu1  ;;  %v2589_v7 = vadd.f32 %v2002_v0, %v993_v2 }
  0xfd   : > { %v2005_v8 = vadd.f32 %v2004_v6, %v2003_v3  ;;  %v1906_v9 = vpop.f32.mrf.mxu0 }
  0xfe   : > { %v996_v10 = vadd.f32 %v1905_v5, %v2580_v44  ;;  %v2006_v11 = vpop.f32.mrf.mxu1 }
  0xff   : > { %v1907_v12 = vpop.f32.mrf.mxu0 }
 0x100   : > { %v1908_v13 = vadd.f32 %v1907_v12, %v1906_v9  ;;  %v2007_v14 = vpop.f32.mrf.mxu1  ;;  %v2592_v15 = vadd.f32 %v2005_v8, %v996_v10 }
 0x101   : > { %v2008_v16 = vadd.f32 %v2007_v14, %v2006_v11  ;;  %v1909_v17 = vpop.f32.mrf.mxu0 }
 0x102   : > { %v1001_v18 = vadd.f32 %v1908_v13, %v2580_v44  ;;  %v2009_v19 = vpop.f32.mrf.mxu1 }
 0x103   : > { %v1910_v20 = vpop.f32.mrf.mxu0 }
 0x104   : > { %v1911_v21 = vadd.f32 %v1910_v20, %v1909_v17  ;;  %v2010_v22 = vpop.f32.mrf.mxu1  ;;  %v2595_v23 = vadd.f32 %v2008_v16, %v1001_v18 }
 0x105   : > { %v2011_v24 = vadd.f32 %v2010_v22, %v2009_v19  ;;  %v1912_v25 = vpop.f32.mrf.mxu0 }
 0x106   : > { %v1004_v26 = vadd.f32 %v1911_v21, %v2580_v44  ;;  %v2012_v27 = vpop.f32.mrf.mxu1 }
 0x107   : > { %v1913_v28 = vpop.f32.mrf.mxu0 }
 0x108   : > { %v1914_v29 = vadd.f32 %v1913_v28, %v1912_v25  ;;  %v2013_v30 = vpop.f32.mrf.mxu1  ;;  %v2598_v31 = vadd.f32 %v2011_v24, %v1004_v26 }
 0x109   : > { %v2014_v32 = vadd.f32 %v2013_v30, %v2012_v27  ;;  %v1915_v33 = vpop.f32.mrf.mxu0 }
 0x10a   : > { %v1009_v34 = vadd.f32 %v1914_v29, %v2580_v44  ;;  %v2015_v35 = vpop.f32.mrf.mxu1 }
 0x10b   : > { %v1916_v36 = vpop.f32.mrf.mxu0 }
 0x10c   : > { %v1917_v37 = vadd.f32 %v1916_v36, %v1915_v33  ;;  %v2016_v38 = vpop.f32.mrf.mxu1  ;;  %v2601_v39 = vadd.f32 %v2014_v32, %v1009_v34 }
 0x10d   : > { %v2017_v40 = vadd.f32 %v2016_v38, %v2015_v35  ;;  %v1918_v41 = vpop.f32.mrf.mxu0 }
 0x10e   : > { %v1012_v42 = vadd.f32 %v1917_v37, %v2580_v44  ;;  %v2018_v43 = vpop.f32.mrf.mxu1 }
 0x10f   : > { %v1919_v45 = vpop.f32.mrf.mxu0 }
 0x110   : > { %v1920_v46 = vadd.f32 %v1919_v45, %v1918_v41  ;;  %v2019_v47 = vpop.f32.mrf.mxu1  ;;  %v2604_v48 = vadd.f32 %v2017_v40, %v1012_v42 }
 0x111   : > { %v2020_v49 = vadd.f32 %v2019_v47, %v2018_v43  ;;  %v1921_v50 = vpop.f32.mrf.mxu0 }
 0x112   : > { %v1017_v51 = vadd.f32 %v1920_v46, %v2580_v44  ;;  %v2021_v52 = vpop.f32.mrf.mxu1 }
 0x113   : > { %v1922_v53 = vpop.f32.mrf.mxu0 }
 0x114   : > { %v1923_v54 = vadd.f32 %v1922_v53, %v1921_v50  ;;  %v2022_v56 = vpop.f32.mrf.mxu1  ;;  %v2607_v57 = vadd.f32 %v2020_v49, %v1017_v51 }
 0x115   : > { %v2023_v58 = vadd.f32 %v2022_v56, %v2021_v52  ;;  %v1924_v59 = vpop.f32.mrf.mxu0 }
 0x116   : > { %2742 = vst [vmem:[#allocation2_spill] sm:$0xff] %v2607_v57  ;;  %v1020_v60 = vadd.f32 %v1923_v54, %v2580_v44  ;;  %v2024_v61 = vpop.f32.mrf.mxu1 }
 0x117   : > { %v1925_v62 = vpop.f32.mrf.mxu0 }
 0x118   : > { %v1926_v0 = vadd.f32 %v1925_v62, %v1924_v59  ;;  %v2025_v1 = vpop.f32.mrf.mxu1  ;;  %v2610_v2 = vadd.f32 %v2023_v58, %v1020_v60 }
 0x119   : > { %v2026_v3 = vadd.f32 %v2025_v1, %v2024_v61  ;;  %v1927_v4 = vpop.f32.mrf.mxu0 }
 0x11a   : > { %2743 = vst [vmem:[#allocation3_spill] sm:$0xff] %v2610_v2  ;;  %v1025_v5 = vadd.f32 %v1926_v0, %v2580_v44  ;;  %v2027_v6 = vpop.f32.mrf.mxu1 }
 0x11b   : > { %v1928_v8 = vpop.f32.mrf.mxu0 }
 0x11c   : > { %v1929_v9 = vadd.f32 %v1928_v8, %v1927_v4  ;;  %v2028_v10 = vpop.f32.mrf.mxu1  ;;  %v2613_v11 = vadd.f32 %v2026_v3, %v1025_v5 }
 0x11d   : > { %v2029_v12 = vadd.f32 %v2028_v10, %v2027_v6  ;;  %v1930_v13 = vpop.f32.mrf.mxu0 }
 0x11e   : > { %2744 = vst [vmem:[#allocation4_spill] sm:$0xff] %v2613_v11  ;;  %v1028_v14 = vadd.f32 %v1929_v9, %v2580_v44  ;;  %v2030_v16 = vpop.f32.mrf.mxu1 }
 0x11f   : > { %v1931_v17 = vpop.f32.mrf.mxu0 }
 0x120   : > { %v1932_v18 = vadd.f32 %v1931_v17, %v1930_v13  ;;  %v2031_v19 = vpop.f32.mrf.mxu1  ;;  %v2616_v20 = vadd.f32 %v2029_v12, %v1028_v14 }
 0x121   : > { %v2032_v21 = vadd.f32 %v2031_v19, %v2030_v16  ;;  %v1933_v22 = vpop.f32.mrf.mxu0 }
 0x122   : > { %2745 = vst [vmem:[#allocation5_spill] sm:$0xff] %v2616_v20  ;;  %v1033_v24 = vadd.f32 %v1932_v18, %v2580_v44  ;;  %v2033_v25 = vpop.f32.mrf.mxu1 }
 0x123   : > { %v1934_v26 = vpop.f32.mrf.mxu0 }
 0x124   : > { %v1935_v27 = vadd.f32 %v1934_v26, %v1933_v22  ;;  %v2034_v28 = vpop.f32.mrf.mxu1  ;;  %v2619_v29 = vadd.f32 %v2032_v21, %v1033_v24 }
 0x125   : > { %v2035_v30 = vadd.f32 %v2034_v28, %v2033_v25  ;;  %v1936_v32 = vpop.f32.mrf.mxu0 }
 0x126   : > { %2746 = vst [vmem:[#allocation6_spill] sm:$0xff] %v2619_v29  ;;  %v1036_v33 = vadd.f32 %v1935_v27, %v2580_v44  ;;  %v2036_v34 = vpop.f32.mrf.mxu1 }
 0x127   : > { %v1937_v35 = vpop.f32.mrf.mxu0 }
 0x128   : > { %v1938_v36 = vadd.f32 %v1937_v35, %v1936_v32  ;;  %v2037_v37 = vpop.f32.mrf.mxu1  ;;  %v2622_v38 = vadd.f32 %v2035_v30, %v1036_v33 }
 0x129   : > { %v2038_v40 = vadd.f32 %v2037_v37, %v2036_v34  ;;  %v1939_v41 = vpop.f32.mrf.mxu0 }
 0x12a   : > { %2747 = vst [vmem:[#allocation7_spill] sm:$0xff] %v2622_v38  ;;  %v1041_v42 = vadd.f32 %v1938_v36, %v2580_v44  ;;  %v2039_v43 = vpop.f32.mrf.mxu1 }
 0x12b   : > { %v1940_v45 = vpop.f32.mrf.mxu0 }
 0x12c   : > { %v1941_v46 = vadd.f32 %v1940_v45, %v1939_v41  ;;  %v2040_v47 = vpop.f32.mrf.mxu1  ;;  %v2625_v49 = vadd.f32 %v2038_v40, %v1041_v42 }
 0x12d   : > { %v2041_v50 = vadd.f32 %v2040_v47, %v2039_v43  ;;  %v1942_v51 = vpop.f32.mrf.mxu0 }
 0x12e   : > { %2748 = vst [vmem:[#allocation8_spill] sm:$0xff] %v2625_v49  ;;  %v1044_v52 = vadd.f32 %v1941_v46, %v2580_v44  ;;  %v2042_v53 = vpop.f32.mrf.mxu1 }
 0x12f   : > { %v1943_v54 = vpop.f32.mrf.mxu0 }
 0x130   : > { %v2043_v56 = vpop.f32.mrf.mxu1  ;;  %v2628_v58 = vadd.f32 %v2041_v50, %v1044_v52  ;;  %v1944_v46 = vadd.f32 %v1943_v54, %v1942_v51 }
 0x131   : > { %v1945_v59 = vpop.f32.mrf.mxu0  ;;  %v2044_v20 = vadd.f32 %v2043_v56, %v2042_v53 }
 0x132   : > { %2749 = vst [vmem:[#allocation9_spill] sm:$0xff] %v2628_v58  ;;  %v2045_v60 = vpop.f32.mrf.mxu1  ;;  %v1049_v2 = vadd.f32 %v1944_v46, %v2580_v44 }
 0x133   : > { %v1946_v61 = vpop.f32.mrf.mxu0 }
 0x134   : > { %v2046_v62 = vpop.f32.mrf.mxu1  ;;  %v1947_v57 = vadd.f32 %v1946_v61, %v1945_v59  ;;  %v1194_v53 = vadd.f32 %v2044_v20, %v1049_v2 }
 0x135   : > { %v1948_v0 = vpop.f32.mrf.mxu0 }
 0x136   : > { %v2048_v1 = vpop.f32.mrf.mxu1 }
 0x137   : > { %v1949_v3 = vpop.f32.mrf.mxu0 }
 0x138   : > { %v2049_v4 = vpop.f32.mrf.mxu1  ;;  %v1950_v42 = vadd.f32 %v1949_v3, %v1948_v0 }
 0x139   : > { %v1951_v5 = vpop.f32.mrf.mxu0  ;;  %v2050_v38 = vadd.f32 %v2049_v4, %v2048_v1 }
 0x13a   : > { %v2051_v6 = vpop.f32.mrf.mxu1  ;;  %v1057_v52 = vadd.f32 %v1950_v42, %v2580_v44 }
 0x13b   : > { %v1952_v8 = vpop.f32.mrf.mxu0 }
 0x13c   : > { %v2052_v9 = vpop.f32.mrf.mxu1  ;;  %v1953_v58 = vadd.f32 %v1952_v8, %v1951_v5  ;;  %v1202_v11 = vadd.f32 %v2050_v38, %v1057_v52  ;;  %v1052_v5 = vadd.f32 %v1947_v57, %v2580_v44  ;;  %v2047_v8 = vadd.f32 %v2046_v62, %v2045_v60 }
 0x13d   : > { %v1954_v10 = vpop.f32.mrf.mxu0  ;;  %v2053_v54 = vadd.f32 %v2052_v9, %v2051_v6 }
 0x13e   : > { %v2630_v12 = vpop.f32.mrf.mxu1  ;;  %v1060_v51 = vadd.f32 %v1953_v58, %v2580_v44 }
 0x13f   : > { %v1955_v13 = vpop.f32.mrf.mxu0 }
 0x140   : > { %v2055_v14 = vpop.f32.mrf.mxu1  ;;  %v1956_v42 = vadd.f32 %v1955_v13, %v1954_v10  ;;  %v1205_v10 = vadd.f32 %v2053_v54, %v1060_v51 }
 0x141   : > { %v2632_v16 = vpop.f32.mrf.mxu0  ;;  %v2056_v57 = vadd.f32 %v2055_v14, %v2630_v12 }
 0x142   : > { %v2634_v17 = vpop.f32.mrf.mxu1 }
 0x143   : > { %v1958_v18 = vpop.f32.mrf.mxu0 }
 0x144   : > { %v2636_v19 = vpop.f32.mrf.mxu1  ;;  %v1959_v20 = vadd.f32 %v1958_v18, %v2632_v16 }
 0x145   : > { %v1960_v21 = vpop.f32.mrf.mxu0 }
 0x146   : > { %v2060_v22 = vpop.f32.mrf.mxu1 }
 0x147   : > { %v1961_v24 = vpop.f32.mrf.mxu0 }
 0x148   : > { %v2061_v25 = vpop.f32.mrf.mxu1  ;;  %v1962_v3 = vadd.f32 %v1961_v24, %v1960_v21 }
 0x149   : > { %v1963_v26 = vpop.f32.mrf.mxu0  ;;  %v2062_v59 = vadd.f32 %v2061_v25, %v2060_v22 }
 0x14a   : > { %v2638_v27 = vpop.f32.mrf.mxu1  ;;  %v1073_v56 = vadd.f32 %v1962_v3, %v2580_v44 }
 0x14b   : > { %v1964_v28 = vpop.f32.mrf.mxu0 }
 0x14c   : > { %v2640_v30 = vpop.f32.mrf.mxu1  ;;  %v1965_v6 = vadd.f32 %v1964_v28, %v1963_v26  ;;  %v1218_v22 = vadd.f32 %v2062_v59, %v1073_v56  ;;  %v2059_v28 = vadd.f32 %v2636_v19, %v2634_v17 }
 0x14d   : > { %v2642_v32 = vpop.f32.mrf.mxu0  ;;  %v2065_v12 = vadd.f32 %v2640_v30, %v2638_v27 }
 0x14e   : > { %v2644_v33 = vpop.f32.mrf.mxu1  ;;  %v1076_v24 = vadd.f32 %v1965_v6, %v2580_v44 }
 0x14f   : > { %v2646_v34 = vpop.f32.mrf.mxu0 }
 0x150   : > { %v2648_v35 = vpop.f32.mrf.mxu1  ;;  %v1968_v16 = vadd.f32 %v2646_v34, %v2642_v32  ;;  %v1221_v3 = vadd.f32 %v2065_v12, %v1076_v24 }
 0x151   : > { %v2650_v36 = vpop.f32.mrf.mxu0  ;;  %v2068_v19 = vadd.f32 %v2648_v35, %v2644_v33 }
 0x152   : > { %v2652_v37 = vpop.f32.mrf.mxu1  ;;  %v1081_v17 = vadd.f32 %v1968_v16, %v2580_v44 }
 0x153   : > { %2750 = vst [vmem:[#allocation10_spill] sm:$0xff] %v2652_v37  ;;  %v2654_v40 = vpop.f32.mrf.mxu0 }
 0x154   : > { %v2656_v41 = vpop.f32.mrf.mxu1  ;;  %v1226_v56 = vadd.f32 %v2068_v19, %v1081_v17 }
 0x155   : > { %2751 = vst [vmem:[#allocation11_spill] sm:$0xff] %v2656_v41  ;;  %v1972_v43 = vpop.f32.mrf.mxu0 }
 0x156   : > { %v2658_v45 = vpop.f32.mrf.mxu1 }
 0x157   : > { %v1973_v47 = vpop.f32.mrf.mxu0 }
 0x158   : > { %v2660_v50 = vpop.f32.mrf.mxu1  ;;  %v1974_v13 = vadd.f32 %v1973_v47, %v1972_v43 }
 0x159   : > { %v2663_v29 = vpop.f32.mrf.mxu0  ;;  %v2074_v30 = vadd.f32 %v2660_v50, %v2658_v45  ;;  %v1971_v45 = vadd.f32 %v2654_v40, %v2650_v36  ;;  %v2754_v40 = vld [vmem:[#allocation4_spill] sm:$0xff] }
 0x15a   : > { %v2665_v49 = vpop.f32.mrf.mxu1  ;;  %v1089_v27 = vadd.f32 %v1974_v13, %v2580_v44 }
 0x15b   : > { %2752 = vst [vmem:[#allocation12_spill] sm:$0xff] %v2665_v49  ;;  %v1976_v0 = vpop.f32.mrf.mxu0 }
 0x15c   : > { %v2668_v41 = vpop.f32.mrf.mxu1 }
 0x15d   : > { %v2106_v37 = vpop.f32.mrf.mxu0 }
 0x15e   : > { %v1283_v1 = vadd.f32 %v2106_v37, %v2589_v7  ;;  %v2122_v4 = vpop.f32.mrf.mxu1  ;;  %v1065_v7 = vadd.f32 %v1956_v42, %v2580_v44 }
 0x15f   : > { %v1347_v49 = vadd.f32 %v2122_v4, %v1202_v11  ;;  %v1274_v46 = vpop.f32.mrf.mxu0 }
 0x160   : > { %2283 = vtanh.f32 %v1283_v1  ;;  %v1275_v61 = vadd.f32 %v1274_v46, %v2583_v55  ;;  %v1338_v58 = vpop.f32.mrf.mxu1  ;;  %v1197_v55 = vadd.f32 %v2047_v8, %v1052_v5  ;;  %v1210_v26 = vadd.f32 %v2056_v57, %v1065_v7 }
 0x161   : > { %2285 = vtanh.f32 %v1347_v49  ;;  %v1339_v38 = vadd.f32 %v1338_v58, %v1194_v53  ;;  %v2107_v9 = vpop.f32.mrf.mxu0  ;;  %v1234_v1 = vadd.f32 %v2074_v30, %v1089_v27  ;;  %v2756_v58 = vld [vmem:[#allocation11_spill] sm:$0xff] }
 0x162   : > { %2287 = vtanh.f32 %v1275_v61  ;;  %v1286_v11 = vadd.f32 %v2107_v9, %v2592_v15  ;;  %v2123_v2 = vpop.f32.mrf.mxu1  ;;  %v2753_v35 = vld [vmem:[#allocation12_spill] sm:$0xff]  ;;  %v2755_v61 = vld [vmem:[#allocation10_spill] sm:$0xff] }
 0x163   : > { %2289 = vtanh.f32 %v1339_v38  ;;  %v1350_v60 = vadd.f32 %v2123_v2, %v1205_v10  ;;  %v1277_v62 = vpop.f32.mrf.mxu0  ;;  %v2071_v6 = vadd.f32 %v2756_v58, %v2755_v61  ;;  %v2757_v10 = vld [vmem:[#allocation2_spill] sm:$0xff] }
 0x164   : > { %2291 = vtanh.f32 %v1286_v11  ;;  %v1278_v49 = vadd.f32 %v1277_v62, %v2586_v63  ;;  %v1341_v21 = vpop.f32.mrf.mxu1  ;;  %v1068_v63 = vadd.f32 %v1959_v20, %v2580_v44 }
 0x165   : > { %2293 = vtanh.f32 %v1350_v60  ;;  %v1342_v15 = vadd.f32 %v1341_v21, %v1197_v55  ;;  %v2110_v14 = vpop.f32.mrf.mxu0  ;;  %v2758_v55 = vld [vmem:[#allocation5_spill] sm:$0xff] }
 0x166   : > { %2295 = vtanh.f32 %v1278_v49  ;;  %v1299_v18 = vadd.f32 %v2110_v14, %v2601_v39  ;;  %v2126_v25 = vpop.f32.mrf.mxu1  ;;  %v1977_v39 = vadd.f32 %v1976_v0, %v2663_v29  ;;  %v1213_v50 = vadd.f32 %v2059_v28, %v1068_v63 }
 0x167   : > { %2297 = vtanh.f32 %v1342_v15  ;;  %v1363_v37 = vadd.f32 %v2126_v25, %v1218_v22  ;;  %v1290_v43 = vpop.f32.mrf.mxu0 }
 0x168   : > { %2299 = vtanh.f32 %v1299_v18  ;;  %v1291_v32 = vadd.f32 %v1290_v43, %v2595_v23  ;;  %v1354_v34 = vpop.f32.mrf.mxu1  ;;  %v1092_v33 = vadd.f32 %v1977_v39, %v2580_v44  ;;  %v2759_v18 = vld [vmem:[#allocation3_spill] sm:$0xff] }
 0x169   : > { %2301 = vtanh.f32 %v1363_v37  ;;  %v1355_v47 = vadd.f32 %v1354_v34, %v1210_v26  ;;  %v2111_v52 = vpop.f32.mrf.mxu0 }
 0x16a   : > { %2303 = vtanh.f32 %v1291_v32  ;;  %v1302_v51 = vadd.f32 %v2111_v52, %v2604_v48  ;;  %v2127_v54 = vpop.f32.mrf.mxu1  ;;  %v2077_v48 = vadd.f32 %v2668_v41, %v2753_v35  ;;  %v2760_v32 = vld [vmem:[#allocation8_spill] sm:$0xff] }
 0x16b   : > { %2305 = vtanh.f32 %v1355_v47  ;;  %v1366_v23 = vadd.f32 %v2127_v54, %v1221_v3  ;;  %v1293_v29 = vpop.f32.mrf.mxu0  ;;  %v2761_v3 = vld [vmem:[#allocation6_spill] sm:$0xff] }
 0x16c   : > { %2307 = vtanh.f32 %v1302_v51  ;;  %v1294_v0 = vadd.f32 %v1293_v29, %v2598_v31  ;;  %v1357_v42 = vpop.f32.mrf.mxu1  ;;  %v1084_v31 = vadd.f32 %v1971_v45, %v2580_v44  ;;  %v1237_v20 = vadd.f32 %v2077_v48, %v1092_v33  ;;  %v2762_v45 = vld [vmem:[#allocation9_spill] sm:$0xff] }
 0x16d   : > { %v2284_v4 = vpop.eup %2283  ;;  %2309 = vtanh.f32 %v1366_v23  ;;  %v1358_v5 = vadd.f32 %v1357_v42, %v1213_v50  ;;  %v2114_v8 = vpop.f32.mrf.mxu0 }
 0x16e   : > { %v2286_v36 = vpop.eup %2285  ;;  %2311 = vtanh.f32 %v1294_v0  ;;  %v1315_v46 = vadd.f32 %v2114_v8, %v2754_v40  ;;  %v2130_v53 = vpop.f32.mrf.mxu1  ;;  %v1229_v15 = vadd.f32 %v2071_v6, %v1084_v31 }
 0x16f   : > { %v2288_v59 = vpop.eup %2287  ;;  %2313 = vtanh.f32 %v1358_v5  ;;  %v1379_v38 = vadd.f32 %v2130_v53, %v1234_v1  ;;  %v1306_v9 = vpop.f32.mrf.mxu0 }
 0x170   : > { %v2290_v41 = vpop.eup %2289  ;;  %2315 = vtanh.f32 %v1315_v46  ;;  %v1307_v7 = vadd.f32 %v1306_v9, %v2757_v10  ;;  %v1370_v57 = vpop.f32.mrf.mxu1 }
 0x171   : > { %v2292_v11 = vpop.eup %2291  ;;  %2317 = vtanh.f32 %v1379_v38  ;;  %v1371_v44 = vadd.f32 %v1370_v57, %v1226_v56  ;;  %v2115_v2 = vpop.f32.mrf.mxu0 }
 0x172   : > { %v2294_v60 = vpop.eup %2293  ;;  %v1803_v62 = vpack.c.bf16 %v2292_v11, %v2284_v4  ;;  %2319 = vtanh.f32 %v1307_v7  ;;  %v1318_v13 = vadd.f32 %v2115_v2, %v2758_v55  ;;  %v2131_v49 = vpop.f32.mrf.mxu1  ;;  %v2763_v4 = vld [vmem:[#allocation7_spill] sm:$0xff] }
 0x173   : > { %v2296_v21 = vpop.eup %2295  ;;  %v1843_v22 = vpack.c.bf16 %v2294_v60, %v2286_v36  ;;  %2321 = vtanh.f32 %v1371_v44  ;;  %v1382_v24 = vadd.f32 %v2131_v49, %v1237_v20  ;;  %v1309_v12 = vpop.f32.mrf.mxu0 }
 0x174   : > { %v2298_v14 = vpop.eup %2297  ;;  %1865 = vst [vmem:[%s2713_s20 + $0x8] sm:$0xff] %v1803_v62   ;;  %v1798_v16 = vpack.c.bf16 %v2296_v21, %v2288_v59  ;;  %2323 = vtanh.f32 %v1318_v13  ;;  %v1310_v25 = vadd.f32 %v1309_v12, %v2759_v18  ;;  %v1373_v26 = vpop.f32.mrf.mxu1 }
 0x175   : > { %v2300_v63 = vpop.eup %2299  ;;  %1873 = vst [vmem:[%s2713_s20 + $0x48] sm:$0xff] %v1843_v22   ;;  %v1838_v28 = vpack.c.bf16 %v2298_v14, %v2290_v41  ;;  %2325 = vtanh.f32 %v1382_v24  ;;  %v1374_v37 = vadd.f32 %v1373_v26, %v1229_v15  ;;  %v2118_v43 = vpop.f32.mrf.mxu0 }
 0x176   : > { %v2302_v27 = vpop.eup %2301  ;;  %1799 = vst [vmem:[%s2713_s20] sm:$0xff] %v1798_v16   ;;  %2327 = vtanh.f32 %v1310_v25  ;;  %v1331_v34 = vadd.f32 %v2118_v43, %v2760_v32 }
 0x177   : > { %v2304_v30 = vpop.eup %2303  ;;  %1872 = vst [vmem:[%s2713_s20 + $0x40] sm:$0xff] %v1838_v28   ;;  %2329 = vtanh.f32 %v1374_v37  ;;  %v1322_v39 = vpop.f32.mrf.mxu0 }
 0x178   : > { %v2306_v47 = vpop.eup %2305  ;;  %v1323_v17 = vadd.f32 %v1322_v39, %v2761_v3  ;;  %2331 = vtanh.f32 %v1331_v34 }
 0x179   : > { %v2308_v52 = vpop.eup %2307  ;;  %v2119_v19 = vpop.f32.mrf.mxu0 }
 0x17a   : > { %v2310_v51 = vpop.eup %2309  ;;  %v1813_v54 = vpack.c.bf16 %v2308_v52, %v2300_v63  ;;  %v1334_v23 = vadd.f32 %v2119_v19, %v2762_v45 }
 0x17b   : > { %v2312_v29 = vpop.eup %2311  ;;  %v1853_v50 = vpack.c.bf16 %v2310_v51, %v2302_v27  ;;  %v1325_v0 = vpop.f32.mrf.mxu0 }
 0x17c   : > { %v2314_v42 = vpop.eup %2313  ;;  %1867 = vst [vmem:[%s2713_s20 + $0x18] sm:$0xff] %v1813_v54   ;;  %v1808_v1 = vpack.c.bf16 %v2312_v29, %v2304_v30  ;;  %2333 = vtanh.f32 %v1334_v23  ;;  %v1326_v33 = vadd.f32 %v1325_v0, %v2763_v4 }
 0x17d   : > { %v2316_v35 = vpop.eup %2315  ;;  %1875 = vst [vmem:[%s2713_s20 + $0x58] sm:$0xff] %v1853_v50   ;;  %v1848_v48 = vpack.c.bf16 %v2314_v42, %v2306_v47  ;;  %2335 = vtanh.f32 %v1323_v17 }
 0x17e   : > { %v2318_v5 = vpop.eup %2317  ;;  %1866 = vst [vmem:[%s2713_s20 + $0x10] sm:$0xff] %v1808_v1   ;;  %2337 = vtanh.f32 %v1326_v33 }
 0x17f   : > { %v2320_v8 = vpop.eup %2319  ;;  %1874 = vst [vmem:[%s2713_s20 + $0x50] sm:$0xff] %v1848_v48  }
 0x180   : > { %v2322_v36 = vpop.eup %2321 }
 0x181   : > { %v2324_v40 = vpop.eup %2323 }
 0x182   : > { %v2326_v46 = vpop.eup %2325  ;;  %v1823_v53 = vpack.c.bf16 %v2324_v40, %v2316_v35 }
 0x183   : > { %v2328_v56 = vpop.eup %2327  ;;  %v1863_v59 = vpack.c.bf16 %v2326_v46, %v2318_v5 }
 0x184   : > { %v2330_v31 = vpop.eup %2329  ;;  %1869 = vst [vmem:[%s2713_s20 + $0x28] sm:$0xff] %v1823_v53   ;;  %v1818_v61 = vpack.c.bf16 %v2328_v56, %v2320_v8 }
 0x185   : > { %1877 = vst [vmem:[%s2713_s20 + $0x68] sm:$0xff] %v1863_v59   ;;  %v1858_v58 = vpack.c.bf16 %v2330_v31, %v2322_v36  ;;  %v2332_v6 = vpop.eup %2331 }
 0x186   : > { %1868 = vst [vmem:[%s2713_s20 + $0x20] sm:$0xff] %v1818_v61  }
 0x187   : > { %1876 = vst [vmem:[%s2713_s20 + $0x60] sm:$0xff] %v1858_v58  }
 0x189   : > { %v2334_v38 = vpop.eup %2333 }
 0x18a   : > { %v2336_v9 = vpop.eup %2335  ;;  %v1833_v41 = vpack.c.bf16 %v2334_v38, %v2332_v6 }
 0x18b   : > { %v2338_v10 = vpop.eup %2337 }
 0x18c   : > { %1871 = vst [vmem:[%s2713_s20 + $0x38] sm:$0xff] %v1833_v41   ;;  %v1828_v7 = vpack.c.bf16 %v2338_v10, %v2336_v9 }
 0x18e   : > { %1870 = vst [vmem:[%s2713_s20 + $0x30] sm:$0xff] %v1828_v7  }
 0x18f PF: > { %s13_s12 = sadd.s32 1, %s2345_s12  }
 0x190   : > { %p10_p4 = scmp.ge.s32.totalorder %s13_s12, 9  }
 0x192   :  { %12 = sbr.rel (!%p10_p4) target bundleno = 1 (0x1), region = 62 }

// kernel: net_forward.6
= control target key start
LH: loop header
LB: loop body
LE: loop exit
PB: predicated region body
PF: predicated region fallthrough
CT: control target
= control target key end

     0   :  { %v3052_v0 = vmov 0   ;;  %v3053_v24 = vmov 0.0   ;;  %vm3054_vm0 = vmmov 0   ;;  %vm1074_vm1 = vcmask 523264   ;;  %s3955_s1 = inlined_call_operand.vmem [shape: bf16[576,128], index: 1, kind: input, shape index: {}]   ;;  %s3956_s0 = inlined_call_operand.vmem [shape: bf16[392,576], index: 0, kind: input, shape index: {}]   ;;  %s3957_s2 = inlined_call_operand.vmem [shape: f32[1,128], index: 2, kind: input, shape index: {}]   ;;  %s3958_s3 = inlined_call_operand.vmem [shape: bf16[392,128], index: 3, kind: output, shape index: {}]  }
   0x1   :  { %1150 = vmatprep.subr.bf16.mxu0 %v3052_v0  ;;  %2710 = vmatprep.subr.bf16.mxu1 %v3052_v0  ;;  %v2745_v1 = vld [vmem:[%s3955_s1 + $0x38] sm:$0xff]   ;;  %v2746_v2 = vld [vmem:[%s3955_s1 + $0x30] sm:$0xff]   ;;  %v2747_v3 = vld [vmem:[%s3955_s1 + $0x28] sm:$0xff]  }
   0x2   :  { %1151 = vmatpush1.bf16.msra.mxu0 %v2745_v1  ;;  %2726 = vmatpush1.bf16.msra.mxu1 %v2745_v1  ;;  %v2748_v4 = vld [vmem:[%s3955_s1 + $0x20] sm:$0xff]   ;;  %v2749_v5 = vld [vmem:[%s3955_s1 + $0x18] sm:$0xff]   ;;  %v2750_v7 = vld [vmem:[%s3955_s1 + $0x10] sm:$0xff]  }
   0x3   :  { %1152 = vmatprep.subr.bf16.mxu0 %v3052_v0  ;;  %2711 = vmatprep.subr.bf16.mxu1 %v3052_v0  ;;  %v2763_v6 = vld [vmem:[%s3956_s0 + $0x4] ss:$20 sps:$4 sm:$0xff]   ;;  %v2766_v8 = vld [vmem:[%s3956_s0 + $0x20c] ss:$20 sps:$4 sm:$0xff]   ;;  %v2754_v12 = vld [vmem:[%s3955_s1 + $0x70] sm:$0xff]  }
   0x4   :  { %1182 = vmatprep.mubr.bf16.mxu0 %v2763_v6  ;;  %1286 = vmatprep.mubr.bf16.mxu1 %v2766_v8  ;;  %v2751_v9 = vld [vmem:[%s3955_s1 + $0x8] sm:$0xff]   ;;  %v2752_v10 = vld [vmem:[%s3955_s1] sm:$0xff]   ;;  %v2753_v11 = vld [vmem:[%s3955_s1 + $0x78] sm:$0xff]  }
   0x5   :  { %v2755_v13 = vld [vmem:[%s3955_s1 + $0x68] sm:$0xff]   ;;  %v2756_v14 = vld [vmem:[%s3955_s1 + $0x60] sm:$0xff]   ;;  %v2757_v15 = vld [vmem:[%s3955_s1 + $0x58] sm:$0xff]  }
   0x6   :  { %1153 = vmatpush1.bf16.msra.mxu0 %v2746_v2  ;;  %2727 = vmatpush1.bf16.msra.mxu1 %v2746_v2  ;;  %v2758_v16 = vld [vmem:[%s3955_s1 + $0x50] sm:$0xff]   ;;  %v2759_v17 = vld [vmem:[%s3955_s1 + $0x48] sm:$0xff]   ;;  %v2760_v18 = vld [vmem:[%s3955_s1 + $0x40] sm:$0xff]  }
   0x7   :  { %1154 = vmatprep.subr.bf16.mxu0 %v3052_v0  ;;  %2712 = vmatprep.subr.bf16.mxu1 %v3052_v0  ;;  %v2761_v19 = vld [vmem:[%s3956_s0] ss:$20 sps:$4 sm:$0xff]   ;;  %v2764_v20 = vld [vmem:[%s3956_s0 + $0x208] ss:$20 sps:$4 sm:$0xff]   ;;  %v2774_v29 = vld [vmem:[%s3956_s0 + $0x230] ss:$20 sps:$4 sm:$0xff]  }
   0x8   :  { %v2767_v21 = vld [vmem:[%s3955_s1 + $0x118] sm:$0xff]   ;;  %v2768_v22 = vld [vmem:[%s3956_s0 + $0x2c] ss:$20 sps:$4 sm:$0xff]   ;;  %v2770_v23 = vld [vmem:[%s3956_s0 + $0x234] ss:$20 sps:$4 sm:$0xff]  }
   0x9   :  { %v2772_v25 = vld [vmem:[%s3955_s1 + $0xb8] sm:$0xff]   ;;  %v2790_v26 = vld [vmem:[%s3955_s1 + $0x110] sm:$0xff]   ;;  %v2782_v32 = vld [vmem:[%s3955_s1 + $0xa8] sm:$0xff]  }
   0xa   :  { %1155 = vmatpush1.bf16.msra.mxu0 %v2747_v3  ;;  %2728 = vmatpush1.bf16.msra.mxu1 %v2747_v3  ;;  %v2775_v27 = vld [vmem:[%s3955_s1 + $0xb0] sm:$0xff]   ;;  %v2773_v28 = vld [vmem:[%s3956_s0 + $0x28] ss:$20 sps:$4 sm:$0xff]   ;;  %v2789_v34 = vld [vmem:[%s3955_s1 + $0xa0] sm:$0xff]  }
   0xb   :  { %1156 = vmatprep.subr.bf16.mxu0 %v3052_v0  ;;  %2713 = vmatprep.subr.bf16.mxu1 %v3052_v0  ;;  %v2776_v30 = vld [vmem:[%s3956_s0 + $0x54] ss:$20 sps:$4 sm:$0xff]   ;;  %v2778_v31 = vld [vmem:[%s3956_s0 + $0x25c] ss:$20 sps:$4 sm:$0xff]   ;;  %v2841_v35 = vld [vmem:[%s3955_s1 + $0x100] sm:$0xff]  }
   0xc   :  { %v2813_v33 = vld [vmem:[%s3955_s1 + $0x108] sm:$0xff]   ;;  %v2780_v36 = vld [vmem:[%s3956_s0 + $0x50] ss:$20 sps:$4 sm:$0xff]   ;;  %v2795_v40 = vld [vmem:[%s3955_s1 + $0x98] sm:$0xff]  }
   0xd   :  { %v2781_v37 = vld [vmem:[%s3956_s0 + $0x258] ss:$20 sps:$4 sm:$0xff]   ;;  %v2783_v38 = vld [vmem:[%s3956_s0 + $0x7c] ss:$20 sps:$4 sm:$0xff]   ;;  %v2788_v42 = vld [vmem:[%s3956_s0 + $0x280] ss:$20 sps:$4 sm:$0xff]  }
   0xe   :  { %1157 = vmatpush1.bf16.msra.mxu0 %v2748_v4  ;;  %2729 = vmatpush1.bf16.msra.mxu1 %v2748_v4  ;;  %v2785_v39 = vld [vmem:[%s3956_s0 + $0x284] ss:$20 sps:$4 sm:$0xff]   ;;  %v2798_v43 = vld [vmem:[%s3955_s1 + $0x90] sm:$0xff]   ;;  %v2793_v45 = vld [vmem:[%s3956_s0 + $0x2ac] ss:$20 sps:$4 sm:$0xff]  }
   0xf   :  { %1158 = vmatprep.subr.bf16.mxu0 %v3052_v0  ;;  %2714 = vmatprep.subr.bf16.mxu1 %v3052_v0  ;;  %v2787_v41 = vld [vmem:[%s3956_s0 + $0x78] ss:$20 sps:$4 sm:$0xff]   ;;  %v2812_v47 = vld [vmem:[%s3955_s1 + $0x80] sm:$0xff]   ;;  %v2797_v49 = vld [vmem:[%s3956_s0 + $0x2a8] ss:$20 sps:$4 sm:$0xff]  }
  0x10   :  { %v2791_v44 = vld [vmem:[%s3956_s0 + $0xa4] ss:$20 sps:$4 sm:$0xff]   ;;  %v2805_v46 = vld [vmem:[%s3955_s1 + $0x88] sm:$0xff]   ;;  %v2796_v48 = vld [vmem:[%s3956_s0 + $0xa0] ss:$20 sps:$4 sm:$0xff]  }
  0x11   :  { %v2799_v50 = vld [vmem:[%s3956_s0 + $0xcc] ss:$20 sps:$4 sm:$0xff]   ;;  %v2801_v51 = vld [vmem:[%s3956_s0 + $0x2d4] ss:$20 sps:$4 sm:$0xff]   ;;  %v2818_v52 = vld [vmem:[%s3955_s1 + $0xf8] sm:$0xff]  }
  0x12   :  { %1159 = vmatpush1.bf16.msra.mxu0 %v2749_v5  ;;  %2730 = vmatpush1.bf16.msra.mxu1 %v2749_v5  ;;  %v2821_v53 = vld [vmem:[%s3955_s1 + $0xf0] sm:$0xff]   ;;  %v2803_v54 = vld [vmem:[%s3956_s0 + $0xc8] ss:$20 sps:$4 sm:$0xff]   ;;  %v2835_v59 = vld [vmem:[%s3955_s1 + $0xe0] sm:$0xff]  }
  0x13   :  { %1160 = vmatprep.subr.bf16.mxu0 %v3052_v0  ;;  %2715 = vmatprep.subr.bf16.mxu1 %v3052_v0  ;;  %v2804_v55 = vld [vmem:[%s3956_s0 + $0x2d0] ss:$20 sps:$4 sm:$0xff]   ;;  %v2806_v56 = vld [vmem:[%s3956_s0 + $0xf4] ss:$20 sps:$4 sm:$0xff]   ;;  %v2811_v61 = vld [vmem:[%s3956_s0 + $0x2f8] ss:$20 sps:$4 sm:$0xff]  }
  0x14   :  { %v2808_v57 = vld [vmem:[%s3956_s0 + $0x2fc] ss:$20 sps:$4 sm:$0xff]   ;;  %v2828_v58 = vld [vmem:[%s3955_s1 + $0xe8] sm:$0xff]   ;;  %v2816_v63 = vld [vmem:[%s3956_s0 + $0x324] ss:$20 sps:$4 sm:$0xff]  }
  0x15   :  { %v2810_v60 = vld [vmem:[%s3956_s0 + $0xf0] ss:$20 sps:$4 sm:$0xff]   ;;  %v2840_v1 = vld [vmem:[%s3955_s1 + $0xd8] sm:$0xff]   ;;  %v2820_v4 = vld [vmem:[%s3956_s0 + $0x320] ss:$20 sps:$4 sm:$0xff]  }
  0x16   :  { %1161 = vmatpush1.bf16.msra.mxu0 %v2750_v7  ;;  %2731 = vmatpush1.bf16.msra.mxu1 %v2750_v7  ;;  %v2814_v62 = vld [vmem:[%s3956_s0 + $0x11c] ss:$20 sps:$4 sm:$0xff]   ;;  %v2819_v3 = vld [vmem:[%s3956_s0 + $0x118] ss:$20 sps:$4 sm:$0xff]   ;;  %v2851_v8 = vld [vmem:[%s3955_s1 + $0xc0] sm:$0xff]  }
  0x17   :  { %1162 = vmatprep.subr.bf16.mxu0 %v3052_v0  ;;  %2716 = vmatprep.subr.bf16.mxu1 %v3052_v0  ;;  %v2844_v2 = vld [vmem:[%s3955_s1 + $0xd0] sm:$0xff]   ;;  %v2822_v5 = vld [vmem:[%s3956_s0 + $0x144] ss:$20 sps:$4 sm:$0xff]   ;;  %v2824_v6 = vld [vmem:[%s3956_s0 + $0x34c] ss:$20 sps:$4 sm:$0xff]  }
  0x18   :  { %v2850_v7 = vld [vmem:[%s3955_s1 + $0xc8] sm:$0xff]  }
  0x1a   :  { %1163 = vmatpush1.bf16.msra.mxu0 %v2751_v9  ;;  %2732 = vmatpush1.bf16.msra.mxu1 %v2751_v9  ;;  %v2826_v9 = vld [vmem:[%s3956_s0 + $0x140] ss:$20 sps:$4 sm:$0xff]  }
  0x1b   :  { %1164 = vmatprep.subr.bf16.mxu0 %v3052_v0  ;;  %2717 = vmatprep.subr.bf16.mxu1 %v3052_v0 }
  0x1e   :  { %1165 = vmatpush1.bf16.msra.mxu0 %v2752_v10  ;;  %2733 = vmatpush1.bf16.msra.mxu1 %v2752_v10  ;;  %v2827_v10 = vld [vmem:[%s3956_s0 + $0x348] ss:$20 sps:$4 sm:$0xff]  }
  0x1f   :  { %1166 = vmatprep.subr.bf16.mxu0 %v3052_v0  ;;  %2718 = vmatprep.subr.bf16.mxu1 %v3052_v0 }
  0x22   :  { %1167 = vmatpush2.bf16.msra.mxu0 %v2753_v11  ;;  %2734 = vmatpush2.bf16.msra.mxu1 %v2753_v11  ;;  %v2829_v11 = vld [vmem:[%s3956_s0 + $0x16c] ss:$20 sps:$4 sm:$0xff]  }
  0x23   :  { %1168 = vmatprep.subr.bf16.mxu0 %v3052_v0  ;;  %2719 = vmatprep.subr.bf16.mxu1 %v3052_v0 }
  0x26   :  { %1169 = vmatpush2.bf16.msra.mxu0 %v2754_v12  ;;  %2735 = vmatpush2.bf16.msra.mxu1 %v2754_v12  ;;  %v2831_v12 = vld [vmem:[%s3956_s0 + $0x374] ss:$20 sps:$4 sm:$0xff]  }
  0x27   :  { %1170 = vmatprep.subr.bf16.mxu0 %v3052_v0  ;;  %2720 = vmatprep.subr.bf16.mxu1 %v3052_v0 }
  0x2a   :  { %1171 = vmatpush2.bf16.msra.mxu0 %v2755_v13  ;;  %2736 = vmatpush2.bf16.msra.mxu1 %v2755_v13  ;;  %v2834_v13 = vld [vmem:[%s3956_s0 + $0x370] ss:$20 sps:$4 sm:$0xff]  }
  0x2b   :  { %1172 = vmatprep.subr.bf16.mxu0 %v3052_v0  ;;  %2721 = vmatprep.subr.bf16.mxu1 %v3052_v0 }
  0x2e   :  { %1173 = vmatpush2.bf16.msra.mxu0 %v2756_v14  ;;  %2737 = vmatpush2.bf16.msra.mxu1 %v2756_v14  ;;  %v2836_v14 = vld [vmem:[%s3956_s0 + $0x194] ss:$20 sps:$4 sm:$0xff]  }
  0x2f   :  { %1174 = vmatprep.subr.bf16.mxu0 %v3052_v0  ;;  %2722 = vmatprep.subr.bf16.mxu1 %v3052_v0 }
  0x32   :  { %1175 = vmatpush2.bf16.msra.mxu0 %v2757_v15  ;;  %2738 = vmatpush2.bf16.msra.mxu1 %v2757_v15  ;;  %v2838_v15 = vld [vmem:[%s3956_s0 + $0x39c] ss:$20 sps:$4 sm:$0xff]  }
  0x33   :  { %1176 = vmatprep.subr.bf16.mxu0 %v3052_v0  ;;  %2723 = vmatprep.subr.bf16.mxu1 %v3052_v0 }
  0x36   :  { %1177 = vmatpush2.bf16.msra.mxu0 %v2758_v16  ;;  %2739 = vmatpush2.bf16.msra.mxu1 %v2758_v16  ;;  %v159_v16 = vld [vmem:[%s3956_s0 + $0x3c0] sm:$0xff] }
  0x37   :  { %1178 = vmatprep.subr.bf16.mxu0 %v3052_v0  ;;  %2724 = vmatprep.subr.bf16.mxu1 %v3052_v0 }
  0x3a   :  { %1179 = vmatpush2.bf16.msra.mxu0 %v2759_v17  ;;  %2740 = vmatpush2.bf16.msra.mxu1 %v2759_v17  ;;  %v2842_v17 = vld [vmem:[%s3956_s0 + $0x190] ss:$20 sps:$4 sm:$0xff]  }
  0x3b   :  { %1180 = vmatprep.subr.bf16.mxu0 %v3052_v0  ;;  %2725 = vmatprep.subr.bf16.mxu1 %v3052_v0 }
  0x3e   :  { %1181 = vmatpush2.bf16.msra.mxu0 %v2760_v18  ;;  %2741 = vmatpush2.bf16.msra.mxu1 %v2760_v18  ;;  %v2843_v18 = vld [vmem:[%s3956_s0 + $0x398] ss:$20 sps:$4 sm:$0xff]  }
  0x3f   :  { %2602 = vmatprep.subr.bf16.mxu0 %v3053_v24  ;;  %1382 = vmatprep.subr.bf16.mxu1 %v3052_v0 }
  0x41   :  { %1183 = vmatmul.mubr.bf16.vlgmr.msra.gmra.mxu0 %v2761_v19  ;;  %1287 = vmatmul.mubr.bf16.vlgmr.msra.gmra.mxu1 %v2764_v20  ;;  %v2845_v19 = vld [vmem:[%s3956_s0 + $0x1bc] ss:$20 sps:$4 sm:$0xff]   ;;  %v2267_v20 = vcombine.high %v159_v16, %v159_v16 }
  0x42   :  { %2603 = vmatpush3.bf16.msra.mxu0 %v2767_v21  ;;  %1190 = vmatprep.mubr.bf16.mxu0 %v2768_v22  ;;  %v2848_v21 = vld [vmem:[%s3956_s0 + $0x1b8] ss:$20 sps:$4 sm:$0xff]   ;;  %v2266_v22 = vcombine.low %v159_v16, %v159_v16 }
  0x43   :  { %1294 = vmatprep.mubr.bf16.mxu1 %v2770_v23  ;;  %1383 = vmatpush1.bf16.msra.mxu1 %v2772_v25  ;;  %v2852_v23 = vld [vmem:[%s3956_s0 + $0x1e4] ss:$20 sps:$4 sm:$0xff]   ;;  %v2856_v25 = vld [vmem:[%s3956_s0 + $0xc] ss:$20 sps:$4 sm:$0xff]  }
  0x44   :  { %1384 = vmatprep.subr.bf16.mxu1 %v3052_v0  ;;  %2604 = vmatprep.subr.bf16.mxu0 %v3053_v24 }
  0x46   :  { %2605 = vmatpush3.bf16.msra.mxu0 %v2790_v26  ;;  %v2854_v26 = vld [vmem:[%s3956_s0 + $0x8] ss:$20 sps:$4 sm:$0xff]  }
  0x47   :  { %1385 = vmatpush1.bf16.msra.mxu1 %v2775_v27  ;;  %2606 = vmatprep.subr.bf16.mxu0 %v3053_v24  ;;  %v2857_v27 = vld [vmem:[%s3956_s0 + $0x1e0] ss:$20 sps:$4 sm:$0xff]  }
  0x48   :  { %1386 = vmatprep.subr.bf16.mxu1 %v3052_v0 }
  0x49   :  { %1191 = vmatmul.mubr.bf16.gmra.mxu0 %v2773_v28  ;;  %1295 = vmatmul.mubr.bf16.gmra.mxu1 %v2774_v29  ;;  %v2858_v28 = vld [vmem:[%s3956_s0 + $0x34] ss:$20 sps:$4 sm:$0xff]   ;;  %v2860_v29 = vld [vmem:[%s3956_s0 + $0x30] ss:$20 sps:$4 sm:$0xff]  }
  0x4a   :  { %1198 = vmatprep.mubr.bf16.mxu0 %v2776_v30  ;;  %1302 = vmatprep.mubr.bf16.mxu1 %v2778_v31  ;;  %v2861_v30 = vld [vmem:[%s3956_s0 + $0x10] ss:$20 sps:$4 sm:$0xff]  }
  0x4b   :  { %1387 = vmatpush1.bf16.msra.mxu1 %v2782_v32  ;;  %2607 = vmatpush3.bf16.msra.mxu0 %v2813_v33  ;;  %v2862_v31 = vld [vmem:[%s3956_s0 + $0x5c] ss:$20 sps:$4 sm:$0xff]   ;;  %v2864_v32 = vld [vmem:[%s3956_s0 + $0x58] ss:$20 sps:$4 sm:$0xff]  }
  0x4c   :  { %1388 = vmatprep.subr.bf16.mxu1 %v3052_v0  ;;  %2608 = vmatprep.subr.bf16.mxu0 %v3053_v24  ;;  %v2865_v33 = vld [vmem:[%s3956_s0 + $0x38] ss:$20 sps:$4 sm:$0xff]  }
  0x4f   :  { %1389 = vmatpush1.bf16.msra.mxu1 %v2789_v34  ;;  %2609 = vmatpush3.bf16.msra.mxu0 %v2841_v35  ;;  %v2866_v34 = vld [vmem:[%s3956_s0 + $0x84] ss:$20 sps:$4 sm:$0xff]   ;;  %v2868_v35 = vld [vmem:[%s3956_s0 + $0x80] ss:$20 sps:$4 sm:$0xff]  }
  0x50   :  { %1390 = vmatprep.subr.bf16.mxu1 %v3052_v0 }
  0x51   :  { %1199 = vmatmul.mubr.bf16.gmra.mxu0 %v2780_v36  ;;  %1303 = vmatmul.mubr.bf16.gmra.mxu1 %v2781_v37  ;;  %v2869_v36 = vld [vmem:[%s3956_s0 + $0x60] ss:$20 sps:$4 sm:$0xff]  }
  0x52   :  { %1206 = vmatprep.mubr.bf16.mxu0 %v2783_v38  ;;  %1310 = vmatprep.mubr.bf16.mxu1 %v2785_v39  ;;  %v2870_v37 = vld [vmem:[%s3956_s0 + $0xac] ss:$20 sps:$4 sm:$0xff]   ;;  %v2872_v38 = vld [vmem:[%s3956_s0 + $0xa8] ss:$20 sps:$4 sm:$0xff]  }
  0x53   :  { %1391 = vmatpush1.bf16.msra.mxu1 %v2795_v40  ;;  %v2873_v39 = vld [vmem:[%s3956_s0 + $0x88] ss:$20 sps:$4 sm:$0xff]  }
  0x54   :  { %1392 = vmatprep.subr.bf16.mxu1 %v3052_v0  ;;  %v2874_v40 = vld [vmem:[%s3956_s0 + $0xd4] ss:$20 sps:$4 sm:$0xff]  }
  0x57   :  { %1393 = vmatpush1.bf16.msra.mxu1 %v2798_v43  ;;  %v2878_v43 = vld [vmem:[%s3956_s0 + $0xfc] ss:$20 sps:$4 sm:$0xff]  }
  0x58   :  { %1394 = vmatprep.subr.bf16.mxu1 %v3052_v0 }
  0x59   :  { %1207 = vmatmul.mubr.bf16.gmra.mxu0 %v2787_v41  ;;  %1311 = vmatmul.mubr.bf16.gmra.mxu1 %v2788_v42  ;;  %v2876_v41 = vld [vmem:[%s3956_s0 + $0xd0] ss:$20 sps:$4 sm:$0xff]  }
  0x5a   :  { %1214 = vmatprep.mubr.bf16.mxu0 %v2791_v44  ;;  %1318 = vmatprep.mubr.bf16.mxu1 %v2793_v45  ;;  %v2877_v42 = vld [vmem:[%s3956_s0 + $0xb0] ss:$20 sps:$4 sm:$0xff]   ;;  %v2880_v44 = vld [vmem:[%s3956_s0 + $0xf8] ss:$20 sps:$4 sm:$0xff]  }
  0x5b   :  { %1395 = vmatpush1.bf16.msra.mxu1 %v2805_v46  ;;  %v2881_v45 = vld [vmem:[%s3956_s0 + $0xd8] ss:$20 sps:$4 sm:$0xff]  }
  0x5c   :  { %1396 = vmatprep.subr.bf16.mxu1 %v3052_v0  ;;  %v2882_v46 = vld [vmem:[%s3956_s0 + $0x124] ss:$20 sps:$4 sm:$0xff]  }
  0x5f   :  { %1397 = vmatpush1.bf16.msra.mxu1 %v2812_v47  ;;  %v2884_v47 = vld [vmem:[%s3956_s0 + $0x120] ss:$20 sps:$4 sm:$0xff]  }
  0x60   :  { %1398 = vmatprep.subr.bf16.mxu1 %v3052_v0 }
  0x61   :  { %1215 = vmatmul.mubr.bf16.gmra.mxu0 %v2796_v48  ;;  %1319 = vmatmul.mubr.bf16.gmra.mxu1 %v2797_v49  ;;  %v2885_v48 = vld [vmem:[%s3956_s0 + $0x100] ss:$20 sps:$4 sm:$0xff]  }
  0x62   :  { %1222 = vmatprep.mubr.bf16.mxu0 %v2799_v50  ;;  %1326 = vmatprep.mubr.bf16.mxu1 %v2801_v51  ;;  %v2886_v49 = vld [vmem:[%s3956_s0 + $0x14c] ss:$20 sps:$4 sm:$0xff]   ;;  %v2888_v50 = vld [vmem:[%s3956_s0 + $0x148] ss:$20 sps:$4 sm:$0xff]  }
  0x63   :  { %1399 = vmatpush2.bf16.msra.mxu1 %v2818_v52  ;;  %v2889_v51 = vld [vmem:[%s3956_s0 + $0x128] ss:$20 sps:$4 sm:$0xff]  }
  0x64   :  { %1400 = vmatprep.subr.bf16.mxu1 %v3052_v0  ;;  %v2890_v52 = vld [vmem:[%s3956_s0 + $0x174] ss:$20 sps:$4 sm:$0xff]  }
  0x67   :  { %1401 = vmatpush2.bf16.msra.mxu1 %v2821_v53  ;;  %v2892_v53 = vld [vmem:[%s3956_s0 + $0x170] ss:$20 sps:$4 sm:$0xff]  }
  0x68   :  { %1402 = vmatprep.subr.bf16.mxu1 %v3052_v0 }
  0x69   :  { %1223 = vmatmul.mubr.bf16.gmra.mxu0 %v2803_v54  ;;  %1327 = vmatmul.mubr.bf16.gmra.mxu1 %v2804_v55  ;;  %v2893_v54 = vld [vmem:[%s3956_s0 + $0x150] ss:$20 sps:$4 sm:$0xff]  }
  0x6a   :  { %1230 = vmatprep.mubr.bf16.mxu0 %v2806_v56  ;;  %1334 = vmatprep.mubr.bf16.mxu1 %v2808_v57  ;;  %v2894_v55 = vld [vmem:[%s3956_s0 + $0x19c] ss:$20 sps:$4 sm:$0xff]   ;;  %v2896_v56 = vld [vmem:[%s3956_s0 + $0x198] ss:$20 sps:$4 sm:$0xff]  }
  0x6b   :  { %1403 = vmatpush2.bf16.msra.mxu1 %v2828_v58  ;;  %v2897_v57 = vld [vmem:[%s3956_s0 + $0x178] ss:$20 sps:$4 sm:$0xff]  }
  0x6c   :  { %1404 = vmatprep.subr.bf16.mxu1 %v3052_v0  ;;  %v2898_v58 = vld [vmem:[%s3956_s0 + $0x1c4] ss:$20 sps:$4 sm:$0xff]  }
  0x6f   :  { %1405 = vmatpush2.bf16.msra.mxu1 %v2835_v59  ;;  %v2900_v59 = vld [vmem:[%s3956_s0 + $0x1c0] ss:$20 sps:$4 sm:$0xff]  }
  0x70   :  { %1406 = vmatprep.subr.bf16.mxu1 %v3052_v0 }
  0x71   :  { %1231 = vmatmul.mubr.bf16.gmra.mxu0 %v2810_v60  ;;  %1335 = vmatmul.mubr.bf16.gmra.mxu1 %v2811_v61  ;;  %v2901_v60 = vld [vmem:[%s3956_s0 + $0x1a0] ss:$20 sps:$4 sm:$0xff]  }
  0x72   :  { %1238 = vmatprep.mubr.bf16.mxu0 %v2814_v62  ;;  %1342 = vmatprep.mubr.bf16.mxu1 %v2816_v63  ;;  %v2902_v61 = vld [vmem:[%s3956_s0 + $0x1ec] ss:$20 sps:$4 sm:$0xff]   ;;  %v2904_v62 = vld [vmem:[%s3956_s0 + $0x1e8] ss:$20 sps:$4 sm:$0xff]  }
  0x73   :  { %1407 = vmatpush2.bf16.msra.mxu1 %v2840_v1  ;;  %v2905_v63 = vld [vmem:[%s3956_s0 + $0x1c8] ss:$20 sps:$4 sm:$0xff]  }
  0x74   :  { %1408 = vmatprep.subr.bf16.mxu1 %v3052_v0  ;;  %v2906_v1 = vld [vmem:[%s3956_s0 + $0x214] ss:$20 sps:$4 sm:$0xff]  }
  0x77   :  { %1409 = vmatpush2.bf16.msra.mxu1 %v2844_v2 }
  0x78   :  { %1410 = vmatprep.subr.bf16.mxu1 %v3052_v0 }
  0x79   :  { %1239 = vmatmul.mubr.bf16.gmra.mxu0 %v2819_v3  ;;  %1343 = vmatmul.mubr.bf16.gmra.mxu1 %v2820_v4 }
  0x7a   :  { %1246 = vmatprep.mubr.bf16.mxu0 %v2822_v5  ;;  %1350 = vmatprep.mubr.bf16.mxu1 %v2824_v6 }
  0x7b   :  { %1411 = vmatpush2.bf16.msra.mxu1 %v2850_v7 }
  0x7c   :  { %1412 = vmatprep.subr.bf16.mxu1 %v3052_v0  ;;  %v2833_v0 = vld [vmem:[%s3956_s0 + $0x168] ss:$20 sps:$4 sm:$0xff]  }
  0x7f   :  { %1413 = vmatpush2.bf16.msra.mxu1 %v2851_v8  ;;  %v2908_v8 = vld [vmem:[%s3956_s0 + $0x210] ss:$20 sps:$4 sm:$0xff]  }
  0x81   :  { %1247 = vmatmul.mubr.bf16.gmra.mxu0 %v2826_v9  ;;  %1351 = vmatmul.mubr.bf16.gmra.mxu1 %v2827_v10  ;;  %v2909_v9 = vld [vmem:[%s3956_s0 + $0x1f0] ss:$20 sps:$4 sm:$0xff]  }
  0x82   :  { %1254 = vmatprep.mubr.bf16.mxu0 %v2829_v11  ;;  %1358 = vmatprep.mubr.bf16.mxu1 %v2831_v12  ;;  %v2910_v10 = vld [vmem:[%s3956_s0 + $0x23c] ss:$20 sps:$4 sm:$0xff]  }
  0x89   :  { %1255 = vmatmul.mubr.bf16.gmra.mxu0 %v2833_v0  ;;  %1359 = vmatmul.mubr.bf16.gmra.mxu1 %v2834_v13 }
  0x8a   :  { %1262 = vmatprep.mubr.bf16.mxu0 %v2836_v14  ;;  %1366 = vmatprep.mubr.bf16.mxu1 %v2838_v15 }
  0x91   :  { %1263 = vmatmul.mubr.bf16.gmra.mxu0 %v2842_v17  ;;  %1367 = vmatmul.mubr.bf16.gmra.mxu1 %v2843_v18  ;;  %v2912_v18 = vld [vmem:[%s3956_s0 + $0x238] ss:$20 sps:$4 sm:$0xff]  }
  0x92   :  { %1270 = vmatprep.mubr.bf16.mxu0 %v2845_v19  ;;  %1374 = vmatprep.mubr.bf16.mxu1 %v2267_v20  ;;  %v2913_v19 = vld [vmem:[%s3956_s0 + $0x218] ss:$20 sps:$4 sm:$0xff]  }
  0x93   :  { %v2914_v20 = vld [vmem:[%s3956_s0 + $0x264] ss:$20 sps:$4 sm:$0xff]  }
  0x99   :  { %1271 = vmatmul.mubr.bf16.gmra.mxu0 %v2848_v21  ;;  %1375 = vmatmul.mubr.bf16.gmra.mxu1 %v2266_v22 }
  0x9a   :  { %1278 = vmatprep.mubr.bf16.mxu0 %v2852_v23  ;;  %1414 = vmatprep.mubr.bf16.mxu1 %v2856_v25 }
  0xa1   :  { %1279 = vmatmul.mubr.bf16.gmra.mxu0 %v2857_v27  ;;  %1415 = vmatmul.mubr.bf16.vlgmr.msra.gmra.mxu1 %v2854_v26 }
  0xa2   :  { %1422 = vmatprep.mubr.bf16.mxu1 %v2858_v28  ;;  %2610 = vmatprep.mubr.msk.bf16.mxu0 %vm3054_vm0, %v3053_v24 }
  0xa9   :  { %1423 = vmatmul.mubr.bf16.gmra.mxu1 %v2860_v29  ;;  %2611 = vmatmul.mubr.msk.bf16.vlgmr.msra.gmra.mxu0 %vm1074_vm1, %v2861_v30  ;;  %v2916_v30 = vld [vmem:[%s3956_s0 + $0x260] ss:$20 sps:$4 sm:$0xff]  }
  0xaa   :  { %1430 = vmatprep.mubr.bf16.mxu1 %v2862_v31  ;;  %2614 = vmatprep.mubr.msk.bf16.mxu0 %vm3054_vm0, %v3053_v24  ;;  %v2917_v31 = vld [vmem:[%s3956_s0 + $0x240] ss:$20 sps:$4 sm:$0xff]  }
  0xb1   :  { %1431 = vmatmul.mubr.bf16.gmra.mxu1 %v2864_v32  ;;  %2615 = vmatmul.mubr.msk.bf16.gmra.mxu0 %vm1074_vm1, %v2865_v33  ;;  %v2920_v32 = vld [vmem:[%s3956_s0 + $0x28c] ss:$20 sps:$4 sm:$0xff]  }
  0xb2   :  { %1438 = vmatprep.mubr.bf16.mxu1 %v2866_v34  ;;  %2618 = vmatprep.mubr.msk.bf16.mxu0 %vm3054_vm0, %v3053_v24 }
  0xb9   :  { %1439 = vmatmul.mubr.bf16.gmra.mxu1 %v2868_v35  ;;  %2619 = vmatmul.mubr.msk.bf16.gmra.mxu0 %vm1074_vm1, %v2869_v36 }
  0xba   :  { %1446 = vmatprep.mubr.bf16.mxu1 %v2870_v37  ;;  %2622 = vmatprep.mubr.msk.bf16.mxu0 %vm3054_vm0, %v3053_v24 }
  0xc1   :  { %1447 = vmatmul.mubr.bf16.gmra.mxu1 %v2872_v38  ;;  %2623 = vmatmul.mubr.msk.bf16.gmra.mxu0 %vm1074_vm1, %v2873_v39 }
  0xc2   :  { %1454 = vmatprep.mubr.bf16.mxu1 %v2874_v40  ;;  %2626 = vmatprep.mubr.msk.bf16.mxu0 %vm3054_vm0, %v3053_v24 }
  0xc9   :  { %1455 = vmatmul.mubr.bf16.gmra.mxu1 %v2876_v41  ;;  %2627 = vmatmul.mubr.msk.bf16.gmra.mxu0 %vm1074_vm1, %v2877_v42  ;;  %v2918_v41 = vld [vmem:[%s3956_s0 + $0x288] ss:$20 sps:$4 sm:$0xff]  }
  0xca   :  { %1462 = vmatprep.mubr.bf16.mxu1 %v2878_v43  ;;  %2630 = vmatprep.mubr.msk.bf16.mxu0 %vm3054_vm0, %v3053_v24  ;;  %v2921_v42 = vld [vmem:[%s3956_s0 + $0x268] ss:$20 sps:$4 sm:$0xff]  }
  0xcb   :  { %v2924_v43 = vld [vmem:[%s3956_s0 + $0x2b4] ss:$20 sps:$4 sm:$0xff]  }
  0xd1   :  { %1463 = vmatmul.mubr.bf16.gmra.mxu1 %v2880_v44  ;;  %2631 = vmatmul.mubr.msk.bf16.gmra.mxu0 %vm1074_vm1, %v2881_v45 }
  0xd2   :  { %1470 = vmatprep.mubr.bf16.mxu1 %v2882_v46  ;;  %2634 = vmatprep.mubr.msk.bf16.mxu0 %vm3054_vm0, %v3053_v24 }
  0xd9   :  { %1471 = vmatmul.mubr.bf16.gmra.mxu1 %v2884_v47  ;;  %2635 = vmatmul.mubr.msk.bf16.gmra.mxu0 %vm1074_vm1, %v2885_v48 }
  0xda   :  { %1478 = vmatprep.mubr.bf16.mxu1 %v2886_v49  ;;  %2638 = vmatprep.mubr.msk.bf16.mxu0 %vm3054_vm0, %v3053_v24 }
  0xe1   :  { %1479 = vmatmul.mubr.bf16.gmra.mxu1 %v2888_v50  ;;  %2639 = vmatmul.mubr.msk.bf16.gmra.mxu0 %vm1074_vm1, %v2889_v51 }
  0xe2   :  { %1486 = vmatprep.mubr.bf16.mxu1 %v2890_v52  ;;  %2642 = vmatprep.mubr.msk.bf16.mxu0 %vm3054_vm0, %v3053_v24  ;;  %v2922_v52 = vld [vmem:[%s3956_s0 + $0x2b0] ss:$20 sps:$4 sm:$0xff]  }
  0xe9   :  { %1487 = vmatmul.mubr.bf16.gmra.mxu1 %v2892_v53  ;;  %2643 = vmatmul.mubr.msk.bf16.gmra.mxu0 %vm1074_vm1, %v2893_v54  ;;  %v2925_v53 = vld [vmem:[%s3956_s0 + $0x290] ss:$20 sps:$4 sm:$0xff]  }
  0xea   :  { %1494 = vmatprep.mubr.bf16.mxu1 %v2894_v55  ;;  %2646 = vmatprep.mubr.msk.bf16.mxu0 %vm3054_vm0, %v3053_v24  ;;  %v2928_v54 = vld [vmem:[%s3956_s0 + $0x2dc] ss:$20 sps:$4 sm:$0xff]  }
  0xf1   :  { %1495 = vmatmul.mubr.bf16.gmra.mxu1 %v2896_v56  ;;  %2647 = vmatmul.mubr.msk.bf16.gmra.mxu0 %vm1074_vm1, %v2897_v57 }
  0xf2   :  { %1502 = vmatprep.mubr.bf16.mxu1 %v2898_v58  ;;  %2650 = vmatprep.mubr.msk.bf16.mxu0 %vm3054_vm0, %v3053_v24 }
  0xf9   :  { %1503 = vmatmul.mubr.bf16.gmra.mxu1 %v2900_v59  ;;  %2651 = vmatmul.mubr.msk.bf16.gmra.mxu0 %vm1074_vm1, %v2901_v60 }
  0xfa   :  { %1510 = vmatprep.mubr.bf16.mxu1 %v2902_v61  ;;  %2654 = vmatprep.mubr.msk.bf16.mxu0 %vm3054_vm0, %v3053_v24 }
 0x101   :  { %v3534_v2 = vpop.f32.mrf.mxu0  ;;  %v3536_v3 = vpop.f32.mrf.mxu1  ;;  %1511 = vmatmul.mubr.bf16.gmra.mxu1 %v2904_v62  ;;  %2655 = vmatmul.mubr.msk.bf16.gmra.mxu0 %vm1074_vm1, %v2905_v63  ;;  %v2926_v63 = vld [vmem:[%s3956_s0 + $0x2d8] ss:$20 sps:$4 sm:$0xff]  }
 0x102   :  { %1518 = vmatprep.mubr.bf16.mxu1 %v2906_v1  ;;  %2658 = vmatprep.mubr.msk.bf16.mxu0 %vm3054_vm0, %v3053_v24  ;;  %v2929_v1 = vld [vmem:[%s3956_s0 + $0x2b8] ss:$20 sps:$4 sm:$0xff]  }
 0x103   :  { %v1186_v4 = vpop.f32.mrf.mxu0  ;;  %v1290_v5 = vpop.f32.mrf.mxu1 }
 0x104   :  { %v2932_v4 = vld [vmem:[%s3956_s0 + $0x304] ss:$20 sps:$4 sm:$0xff]  }
 0x105   :  { %v3541_v6 = vpop.f32.mrf.mxu0  ;;  %v3543_v7 = vpop.f32.mrf.mxu1 }
 0x107   :  { %v1189_v11 = vpop.f32.mrf.mxu0  ;;  %v1293_v12 = vpop.f32.mrf.mxu1 }
 0x109   :  { %v3554_v0 = vpop.f32.mrf.mxu0  ;;  %v3556_v13 = vpop.f32.mrf.mxu1  ;;  %1519 = vmatmul.mubr.bf16.gmra.mxu1 %v2908_v8  ;;  %2659 = vmatmul.mubr.msk.bf16.gmra.mxu0 %vm1074_vm1, %v2909_v9 }
 0x10a   :  { %1526 = vmatprep.mubr.bf16.mxu1 %v2910_v10  ;;  %2662 = vmatprep.mubr.msk.bf16.mxu0 %vm3054_vm0, %v3053_v24 }
 0x10b   :  { %v1194_v14 = vpop.f32.mrf.mxu0  ;;  %v1298_v15 = vpop.f32.mrf.mxu1 }
 0x10d   :  { %v3561_v16 = vpop.f32.mrf.mxu0  ;;  %v3563_v17 = vpop.f32.mrf.mxu1 }
 0x10f   :  { %v1197_v21 = vpop.f32.mrf.mxu0  ;;  %v1301_v22 = vpop.f32.mrf.mxu1 }
 0x111   :  { %v3574_v23 = vpop.f32.mrf.mxu0  ;;  %v3576_v25 = vpop.f32.mrf.mxu1  ;;  %1527 = vmatmul.mubr.bf16.gmra.mxu1 %v2912_v18  ;;  %2663 = vmatmul.mubr.msk.bf16.gmra.mxu0 %vm1074_vm1, %v2913_v19  ;;  %v2930_v18 = vld [vmem:[%s3956_s0 + $0x300] ss:$20 sps:$4 sm:$0xff]  }
 0x112   :  { %1534 = vmatprep.mubr.bf16.mxu1 %v2914_v20  ;;  %2666 = vmatprep.mubr.msk.bf16.mxu0 %vm3054_vm0, %v3053_v24  ;;  %v2933_v19 = vld [vmem:[%s3956_s0 + $0x2e0] ss:$20 sps:$4 sm:$0xff]  }
 0x113   :  { %v1202_v26 = vpop.f32.mrf.mxu0  ;;  %v1306_v27 = vpop.f32.mrf.mxu1  ;;  %v2936_v20 = vld [vmem:[%s3956_s0 + $0x32c] ss:$20 sps:$4 sm:$0xff]  }
 0x115   :  { %v3581_v28 = vpop.f32.mrf.mxu0  ;;  %v3583_v29 = vpop.f32.mrf.mxu1 }
 0x117   :  { %v1205_v33 = vpop.f32.mrf.mxu0  ;;  %v1309_v34 = vpop.f32.mrf.mxu1 }
 0x118   :  { %v2934_v34 = vld [vmem:[%s3956_s0 + $0x328] ss:$20 sps:$4 sm:$0xff]  }
 0x119   :  { %v3594_v35 = vpop.f32.mrf.mxu0  ;;  %v3596_v36 = vpop.f32.mrf.mxu1  ;;  %1535 = vmatmul.mubr.bf16.gmra.mxu1 %v2916_v30  ;;  %2667 = vmatmul.mubr.msk.bf16.gmra.mxu0 %vm1074_vm1, %v2917_v31 }
 0x11a   :  { %1542 = vmatprep.mubr.bf16.mxu1 %v2920_v32  ;;  %2670 = vmatprep.mubr.msk.bf16.mxu0 %vm3054_vm0, %v3053_v24 }
 0x11b   :  { %v1210_v37 = vpop.f32.mrf.mxu0  ;;  %v1314_v38 = vpop.f32.mrf.mxu1 }
 0x11c   :  { %v2937_v37 = vld [vmem:[%s3956_s0 + $0x308] ss:$20 sps:$4 sm:$0xff]  }
 0x11d   :  { %v3601_v39 = vpop.f32.mrf.mxu0  ;;  %v3603_v40 = vpop.f32.mrf.mxu1  ;;  %v2940_v38 = vld [vmem:[%s3956_s0 + $0x354] ss:$20 sps:$4 sm:$0xff]  }
 0x11f   :  { %v1213_v44 = vpop.f32.mrf.mxu0  ;;  %v1317_v45 = vpop.f32.mrf.mxu1 }
 0x121   :  { %v3614_v46 = vpop.f32.mrf.mxu0  ;;  %v3616_v47 = vpop.f32.mrf.mxu1  ;;  %1543 = vmatmul.mubr.bf16.gmra.mxu1 %v2918_v41  ;;  %2671 = vmatmul.mubr.msk.bf16.gmra.mxu0 %vm1074_vm1, %v2921_v42 }
 0x122   :  { %1550 = vmatprep.mubr.bf16.mxu1 %v2924_v43  ;;  %2674 = vmatprep.mubr.msk.bf16.mxu0 %vm3054_vm0, %v3053_v24 }
 0x123   :  { %v1218_v48 = vpop.f32.mrf.mxu0  ;;  %v1322_v49 = vpop.f32.mrf.mxu1 }
 0x125   :  { %v3621_v50 = vpop.f32.mrf.mxu0  ;;  %v3623_v51 = vpop.f32.mrf.mxu1 }
 0x127   :  { %v1221_v55 = vpop.f32.mrf.mxu0  ;;  %v1325_v56 = vpop.f32.mrf.mxu1 }
 0x128   :  { %v2944_v55 = vld [vmem:[%s3956_s0 + $0x37c] ss:$20 sps:$4 sm:$0xff]  }
 0x129   :  { %v3634_v57 = vpop.f32.mrf.mxu0  ;;  %v3636_v58 = vpop.f32.mrf.mxu1  ;;  %1551 = vmatmul.mubr.bf16.gmra.mxu1 %v2922_v52  ;;  %2675 = vmatmul.mubr.msk.bf16.gmra.mxu0 %vm1074_vm1, %v2925_v53  ;;  %v2938_v53 = vld [vmem:[%s3956_s0 + $0x350] ss:$20 sps:$4 sm:$0xff]  }
 0x12a   :  { %1558 = vmatprep.mubr.bf16.mxu1 %v2928_v54  ;;  %2678 = vmatprep.mubr.msk.bf16.mxu0 %vm3054_vm0, %v3053_v24  ;;  %v2941_v54 = vld [vmem:[%s3956_s0 + $0x330] ss:$20 sps:$4 sm:$0xff]  }
 0x12b   :  { %v1226_v59 = vpop.f32.mrf.mxu0  ;;  %v1330_v60 = vpop.f32.mrf.mxu1 }
 0x12d   :  { %v3641_v61 = vpop.f32.mrf.mxu0  ;;  %v3643_v62 = vpop.f32.mrf.mxu1 }
 0x12f   :  { %v1229_v5 = vpop.f32.mrf.mxu0  ;;  %v1333_v8 = vpop.f32.mrf.mxu1 }
 0x131   :  { %v3654_v9 = vpop.f32.mrf.mxu0  ;;  %v3656_v10 = vpop.f32.mrf.mxu1  ;;  %1559 = vmatmul.mubr.bf16.gmra.mxu1 %v2926_v63  ;;  %2679 = vmatmul.mubr.msk.bf16.gmra.mxu0 %vm1074_vm1, %v2929_v1 }
 0x132   :  { %1566 = vmatprep.mubr.bf16.mxu1 %v2932_v4  ;;  %2682 = vmatprep.mubr.msk.bf16.mxu0 %vm3054_vm0, %v3053_v24 }
 0x133   :  { %v1234_v11 = vpop.f32.mrf.mxu0  ;;  %v1338_v12 = vpop.f32.mrf.mxu1 }
 0x134   :  { %v2942_v11 = vld [vmem:[%s3956_s0 + $0x378] ss:$20 sps:$4 sm:$0xff]  }
 0x135   :  { %v3661_v14 = vpop.f32.mrf.mxu0  ;;  %v3663_v15 = vpop.f32.mrf.mxu1  ;;  %v2945_v12 = vld [vmem:[%s3956_s0 + $0x358] ss:$20 sps:$4 sm:$0xff]  }
 0x137   :  { %v1237_v21 = vpop.f32.mrf.mxu0  ;;  %v1341_v22 = vpop.f32.mrf.mxu1 }
 0x139   :  { %v3674_v26 = vpop.f32.mrf.mxu0  ;;  %v3676_v27 = vpop.f32.mrf.mxu1  ;;  %1567 = vmatmul.mubr.bf16.gmra.mxu1 %v2930_v18  ;;  %2683 = vmatmul.mubr.msk.bf16.gmra.mxu0 %vm1074_vm1, %v2933_v19  ;;  %v2948_v18 = vld [vmem:[%s3956_s0 + $0x3a4] ss:$20 sps:$4 sm:$0xff]  }
 0x13a   :  { %1574 = vmatprep.mubr.bf16.mxu1 %v2936_v20  ;;  %2686 = vmatprep.mubr.msk.bf16.mxu0 %vm3054_vm0, %v3053_v24 }
 0x13b   :  { %v1242_v30 = vpop.f32.mrf.mxu0  ;;  %v1346_v31 = vpop.f32.mrf.mxu1 }
 0x13d   :  { %v3681_v32 = vpop.f32.mrf.mxu0  ;;  %v3683_v33 = vpop.f32.mrf.mxu1 }
 0x13f   :  { %v1245_v41 = vpop.f32.mrf.mxu0  ;;  %v1349_v42 = vpop.f32.mrf.mxu1 }
 0x140   :  { %v2946_v41 = vld [vmem:[%s3956_s0 + $0x3a0] ss:$20 sps:$4 sm:$0xff]  }
 0x141   :  { %v3694_v43 = vpop.f32.mrf.mxu0  ;;  %v3696_v44 = vpop.f32.mrf.mxu1  ;;  %1575 = vmatmul.mubr.bf16.gmra.mxu1 %v2934_v34  ;;  %2687 = vmatmul.mubr.msk.bf16.gmra.mxu0 %vm1074_vm1, %v2937_v37  ;;  %v160_v34 = vld [vmem:[%s3956_s0 + $0x3c8] sm:$0xff]  ;;  %v2949_v42 = vld [vmem:[%s3956_s0 + $0x380] ss:$20 sps:$4 sm:$0xff]  }
 0x142   :  { %1582 = vmatprep.mubr.bf16.mxu1 %v2940_v38  ;;  %2690 = vmatprep.mubr.msk.bf16.mxu0 %vm3054_vm0, %v3053_v24 }
 0x143   :  { %v1250_v45 = vpop.f32.mrf.mxu0  ;;  %v1354_v48 = vpop.f32.mrf.mxu1 }
 0x144   :  { %v2269_v45 = vcombine.high %v160_v34, %v160_v34 }
 0x145   :  { %v3701_v49 = vpop.f32.mrf.mxu0  ;;  %v3703_v52 = vpop.f32.mrf.mxu1 }
 0x147   :  { %v1253_v56 = vpop.f32.mrf.mxu0  ;;  %v1357_v59 = vpop.f32.mrf.mxu1 }
 0x149   :  { %v3714_v60 = vpop.f32.mrf.mxu0  ;;  %v3716_v63 = vpop.f32.mrf.mxu1  ;;  %1583 = vmatmul.mubr.bf16.gmra.mxu1 %v2938_v53  ;;  %2691 = vmatmul.mubr.msk.bf16.gmra.mxu0 %vm1074_vm1, %v2941_v54 }
 0x14a   :  { %1590 = vmatprep.mubr.bf16.mxu1 %v2944_v55  ;;  %2694 = vmatprep.mubr.msk.bf16.mxu0 %vm3054_vm0, %v3053_v24 }
 0x14b   :  { %v1258_v1 = vpop.f32.mrf.mxu0  ;;  %v1362_v4 = vpop.f32.mrf.mxu1 }
 0x14d   :  { %v3721_v5 = vpop.f32.mrf.mxu0  ;;  %v3723_v8 = vpop.f32.mrf.mxu1 }
 0x14f   :  { %v1261_v19 = vpop.f32.mrf.mxu0  ;;  %v1365_v20 = vpop.f32.mrf.mxu1 }
 0x151   :  { %v3734_v21 = vpop.f32.mrf.mxu0  ;;  %v3736_v22 = vpop.f32.mrf.mxu1  ;;  %1591 = vmatmul.mubr.bf16.gmra.mxu1 %v2942_v11  ;;  %2695 = vmatmul.mubr.msk.bf16.gmra.mxu0 %vm1074_vm1, %v2945_v12  ;;  %v2268_v11 = vcombine.low %v160_v34, %v160_v34  ;;  %v2952_v12 = vld [vmem:[%s3956_s0 + $0x3a8] ss:$20 sps:$4 sm:$0xff]   ;;  %v3774_v34 = vld [vmem:[%s3957_s2] ss:$0 sm:$0xff] }
 0x152   :  { %3959 = vst [vmem:[#allocation2_spill] sm:$0xff] %v3736_v22  ;;  %1598 = vmatprep.mubr.bf16.mxu1 %v2948_v18  ;;  %2698 = vmatprep.mubr.msk.bf16.mxu0 %vm3054_vm0, %v3053_v24 }
 0x153   :  { %v1266_v30 = vpop.f32.mrf.mxu0  ;;  %v1370_v31 = vpop.f32.mrf.mxu1 }
 0x155   :  { %v3744_v37 = vpop.f32.mrf.mxu0  ;;  %v3746_v38 = vpop.f32.mrf.mxu1 }
 0x156   :  { %3960 = vst [vmem:[#allocation3_spill] sm:$0xff] %v3746_v38 }
 0x157   :  { %v1269_v48 = vpop.f32.mrf.mxu0  ;;  %v1373_v53 = vpop.f32.mrf.mxu1 }
 0x158   :  { %v2953_v48 = vld [vmem:[%s3956_s0 + $0x3d0] ss:$0 sps:$4 sm:$0xff]   ;;  %v1185_v53 = vadd.f32 %v3774_v34, %v3534_v2  ;;  %v1193_v2 = vadd.f32 %v3774_v34, %v3554_v0  ;;  %v1201_v0 = vadd.f32 %v3774_v34, %v3574_v23 }
 0x159   :  { %v3754_v54 = vpop.f32.mrf.mxu0  ;;  %v3756_v55 = vpop.f32.mrf.mxu1  ;;  %1599 = vmatmul.mubr.bf16.gmra.mxu1 %v2946_v41  ;;  %2699 = vmatmul.mubr.msk.bf16.gmra.mxu0 %vm1074_vm1, %v2949_v42 }
 0x15a   :  { %3961 = vst [vmem:[#allocation4_spill] sm:$0xff] %v3756_v55  ;;  %1606 = vmatprep.mubr.bf16.mxu1 %v2269_v45  ;;  %2702 = vmatprep.mubr.msk.bf16.mxu0 %vm3054_vm0, %v3053_v24 }
 0x15b   :  { %v1274_v56 = vpop.f32.mrf.mxu0  ;;  %v1378_v59 = vpop.f32.mrf.mxu1 }
 0x15d   :  { %v3761_v1 = vpop.f32.mrf.mxu0  ;;  %v1379_v4 = vpop.f32.mrf.mxu1 }
 0x15f   :  { %v1277_v18 = vpop.f32.mrf.mxu0  ;;  %v1380_v19 = vpop.f32.mrf.mxu1 }
 0x161   :  { %v3766_v20 = vpop.f32.mrf.mxu0  ;;  %v1416_v30 = vpop.f32.mrf.mxu1  ;;  %1607 = vmatmul.mubr.bf16.gmra.mxu1 %v2268_v11  ;;  %2703 = vmatmul.mubr.msk.bf16.gmra.mxu0 %vm1074_vm1, %v2952_v12  ;;  %v1188_v12 = vadd.f32 %v3774_v34, %v3541_v6  ;;  %v1196_v6 = vadd.f32 %v3774_v34, %v3561_v16  ;;  %v1204_v16 = vadd.f32 %v3774_v34, %v3581_v28 }
 0x162   :  { %2706 = vmatprep.mubr.msk.bf16.mxu0 %vm3054_vm0, %v3053_v24  ;;  %v1417_v24 = vadd.f32 %v1416_v30, %v1185_v53 }
 0x163   :  { %v1282_v31 = vpop.f32.mrf.mxu0  ;;  %v1418_v41 = vpop.f32.mrf.mxu1 }
 0x165   :  { %v3776_v42 = vpop.f32.mrf.mxu0  ;;  %v1419_v45 = vpop.f32.mrf.mxu1 }
 0x166   :  { %v1420_v41 = vadd.f32 %v1419_v45, %v1188_v12 }
 0x167   :  { %v1285_v56 = vpop.f32.mrf.mxu0  ;;  %v1421_v59 = vpop.f32.mrf.mxu1 }
 0x169   :  { %v1424_v4 = vpop.f32.mrf.mxu1  ;;  %v1648_v11 = vpop.f32.mrf.mxu0  ;;  %2707 = vmatmul.mubr.msk.bf16.gmra.mxu0 %vm1074_vm1, %v2953_v48 }
 0x16a   :  { %v1649_v18 = vadd.f32 %v1648_v11, %v1417_v24  ;;  %v1425_v53 = vadd.f32 %v1424_v4, %v1193_v2 }
 0x16b   :  { %v1426_v19 = vpop.f32.mrf.mxu1  ;;  %v2612_v31 = vpop.f32.mrf.mxu0 }
 0x16c   :  { %2954 = vtanh.f32 %v1649_v18 }
 0x16d   :  { %v1427_v55 = vpop.f32.mrf.mxu1  ;;  %v1651_v38 = vpop.f32.mrf.mxu0 }
 0x16e   :  { %v1652_v22 = vadd.f32 %v1651_v38, %v1420_v41  ;;  %v1428_v45 = vadd.f32 %v1427_v55, %v1196_v6 }
 0x16f   :  { %v1429_v56 = vpop.f32.mrf.mxu1  ;;  %v2613_v30 = vpop.f32.mrf.mxu0 }
 0x170   :  { %2956 = vtanh.f32 %v1652_v22 }
 0x171   :  { %v1432_v59 = vpop.f32.mrf.mxu1  ;;  %v1656_v48 = vpop.f32.mrf.mxu0 }
 0x172   :  { %v1657_v24 = vadd.f32 %v1656_v48, %v1425_v53  ;;  %v1433_v22 = vadd.f32 %v1432_v59, %v1201_v0 }
 0x173   :  { %v1434_v11 = vpop.f32.mrf.mxu1  ;;  %v2616_v19 = vpop.f32.mrf.mxu0 }
 0x174   :  { %2958 = vtanh.f32 %v1657_v24  ;;  %v1209_v24 = vadd.f32 %v3774_v34, %v3594_v35 }
 0x175   :  { %v1435_v12 = vpop.f32.mrf.mxu1  ;;  %v1659_v31 = vpop.f32.mrf.mxu0 }
 0x176   :  { %v1660_v38 = vadd.f32 %v1659_v31, %v1428_v45  ;;  %v1436_v48 = vadd.f32 %v1435_v12, %v1204_v16  ;;  %v1212_v12 = vadd.f32 %v3774_v34, %v3601_v39 }
 0x177   :  { %v1437_v18 = vpop.f32.mrf.mxu1  ;;  %v2617_v41 = vpop.f32.mrf.mxu0 }
 0x178   :  { %2960 = vtanh.f32 %v1660_v38 }
 0x179   :  { %v1440_v4 = vpop.f32.mrf.mxu1  ;;  %v1664_v2 = vpop.f32.mrf.mxu0 }
 0x17a   :  { %v1665_v56 = vadd.f32 %v1664_v2, %v1433_v22  ;;  %v2955_v55 = vpop.eup %2954  ;;  %v1441_v28 = vadd.f32 %v1440_v4, %v1209_v24 }
 0x17b   :  { %v1442_v30 = vpop.f32.mrf.mxu1  ;;  %v2620_v53 = vpop.f32.mrf.mxu0 }
 0x17c   :  { %2962 = vtanh.f32 %v1665_v56 }
 0x17d   :  { %v2957_v6 = vpop.eup %2956  ;;  %v1443_v11 = vpop.f32.mrf.mxu1 }
 0x17e   :  { %v1667_v19 = vpop.f32.mrf.mxu0  ;;  %v2433_v45 = vpack.c.bf16 %v2957_v6, %v2955_v55  ;;  %v1444_v16 = vadd.f32 %v1443_v11, %v1212_v12  ;;  %v1220_v11 = vadd.f32 %v3774_v34, %v3621_v50 }
 0x17f   :  { %v1668_v23 = vadd.f32 %v1667_v19, %v1436_v48  ;;  %v1445_v59 = vpop.f32.mrf.mxu1  ;;  %v1217_v48 = vadd.f32 %v3774_v34, %v3614_v46 }
 0x180   :  { %v2621_v31 = vpop.f32.mrf.mxu0  ;;  %2434 = vst [vmem:[%s3958_s3] sm:$0xff] %v2433_v45  }
 0x181   :  { %2964 = vtanh.f32 %v1668_v23  ;;  %v1448_v38 = vpop.f32.mrf.mxu1  ;;  %v2959_v2 = vpop.eup %2958 }
 0x182   :  { %v1672_v0 = vpop.f32.mrf.mxu0  ;;  %v1449_v39 = vadd.f32 %v1448_v38, %v1217_v48 }
 0x183   :  { %v1673_v18 = vadd.f32 %v1672_v0, %v1441_v28  ;;  %v1450_v41 = vpop.f32.mrf.mxu1 }
 0x184   :  { %v2624_v22 = vpop.f32.mrf.mxu0 }
 0x185   :  { %v2961_v35 = vpop.eup %2960  ;;  %v1451_v56 = vpop.f32.mrf.mxu1  ;;  %2966 = vtanh.f32 %v1673_v18  ;;  %v1225_v22 = vadd.f32 %v3774_v34, %v3634_v57 }
 0x186   :  { %v1675_v30 = vpop.f32.mrf.mxu0  ;;  %v2438_v53 = vpack.c.bf16 %v2961_v35, %v2959_v2  ;;  %v1452_v28 = vadd.f32 %v1451_v56, %v1220_v11  ;;  %v1228_v56 = vadd.f32 %v3774_v34, %v3641_v61 }
 0x187   :  { %v1676_v55 = vadd.f32 %v1675_v30, %v1444_v16  ;;  %v1453_v4 = vpop.f32.mrf.mxu1 }
 0x188   :  { %v2625_v6 = vpop.f32.mrf.mxu0  ;;  %2550 = vst [vmem:[%s3958_s3 + $0x8] sm:$0xff] %v2438_v53  }
 0x189   :  { %2968 = vtanh.f32 %v1676_v55  ;;  %v1456_v19 = vpop.f32.mrf.mxu1  ;;  %v2963_v31 = vpop.eup %2962 }
 0x18a   :  { %v1680_v45 = vpop.f32.mrf.mxu0  ;;  %v1457_v50 = vadd.f32 %v1456_v19, %v1225_v22 }
 0x18b   :  { %v1681_v23 = vadd.f32 %v1680_v45, %v1449_v39  ;;  %v1458_v24 = vpop.f32.mrf.mxu1 }
 0x18c   :  { %v2628_v59 = vpop.f32.mrf.mxu0 }
 0x18d   :  { %v1459_v0 = vpop.f32.mrf.mxu1  ;;  %2970 = vtanh.f32 %v1681_v23  ;;  %v1233_v23 = vadd.f32 %v3774_v34, %v3654_v9 }
 0x18e   :  { %v2965_v46 = vpop.eup %2964  ;;  %v1683_v12 = vpop.f32.mrf.mxu0  ;;  %v1460_v4 = vadd.f32 %v1459_v0, %v1228_v56 }
 0x18f   :  { %v2443_v18 = vpack.c.bf16 %v2965_v46, %v2963_v31  ;;  %v1684_v41 = vadd.f32 %v1683_v12, %v1452_v28  ;;  %v1461_v38 = vpop.f32.mrf.mxu1  ;;  %v1236_v28 = vadd.f32 %v3774_v34, %v3661_v14 }
 0x190   :  { %v2629_v2 = vpop.f32.mrf.mxu0 }
 0x191   :  { %2551 = vst [vmem:[%s3958_s3 + $0x10] sm:$0xff] %v2443_v18   ;;  %2972 = vtanh.f32 %v1684_v41  ;;  %v1464_v16 = vpop.f32.mrf.mxu1 }
 0x192   :  { %v1688_v35 = vpop.f32.mrf.mxu0  ;;  %v2967_v48 = vpop.eup %2966  ;;  %v1465_v61 = vadd.f32 %v1464_v16, %v1233_v23 }
 0x193   :  { %v1689_v30 = vadd.f32 %v1688_v35, %v1457_v50  ;;  %v1466_v53 = vpop.f32.mrf.mxu1  ;;  %v1241_v35 = vadd.f32 %v3774_v34, %v3674_v26 }
 0x194   :  { %v2632_v55 = vpop.f32.mrf.mxu0 }
 0x195   :  { %v1467_v6 = vpop.f32.mrf.mxu1  ;;  %2974 = vtanh.f32 %v1689_v30  ;;  %v1244_v55 = vadd.f32 %v3774_v34, %v3681_v32 }
 0x196   :  { %v2969_v57 = vpop.eup %2968  ;;  %v1691_v39 = vpop.f32.mrf.mxu0  ;;  %v1468_v41 = vadd.f32 %v1467_v6, %v1236_v28 }
 0x197   :  { %v2448_v45 = vpack.c.bf16 %v2969_v57, %v2967_v48  ;;  %v1692_v11 = vadd.f32 %v1691_v39, %v1460_v4  ;;  %v1469_v19 = vpop.f32.mrf.mxu1 }
 0x198   :  { %v2633_v24 = vpop.f32.mrf.mxu0 }
 0x199   :  { %2552 = vst [vmem:[%s3958_s3 + $0x18] sm:$0xff] %v2448_v45   ;;  %2976 = vtanh.f32 %v1692_v11  ;;  %v1472_v59 = vpop.f32.mrf.mxu1  ;;  %v1249_v24 = vadd.f32 %v3774_v34, %v3694_v43 }
 0x19a   :  { %v1696_v31 = vpop.f32.mrf.mxu0  ;;  %v2971_v18 = vpop.eup %2970  ;;  %v1473_v14 = vadd.f32 %v1472_v59, %v1241_v35  ;;  %v1257_v35 = vadd.f32 %v3774_v34, %v3714_v60 }
 0x19b   :  { %v1697_v46 = vadd.f32 %v1696_v31, %v1465_v61  ;;  %v1474_v0 = vpop.f32.mrf.mxu1 }
 0x19c   :  { %v2636_v12 = vpop.f32.mrf.mxu0 }
 0x19d   :  { %v1475_v22 = vpop.f32.mrf.mxu1  ;;  %2978 = vtanh.f32 %v1697_v46  ;;  %v1252_v46 = vadd.f32 %v3774_v34, %v3701_v49 }
 0x19e   :  { %v2973_v9 = vpop.eup %2972  ;;  %v1699_v38 = vpop.f32.mrf.mxu0  ;;  %v1476_v39 = vadd.f32 %v1475_v22, %v1244_v55 }
 0x19f   :  { %v2453_v2 = vpack.c.bf16 %v2973_v9, %v2971_v18  ;;  %v1700_v50 = vadd.f32 %v1699_v38, %v1468_v41  ;;  %v1477_v16 = vpop.f32.mrf.mxu1 }
 0x1a0   :  { %v2637_v56 = vpop.f32.mrf.mxu0 }
 0x1a1   :  { %2553 = vst [vmem:[%s3958_s3 + $0x20] sm:$0xff] %v2453_v2   ;;  %2980 = vtanh.f32 %v1700_v50  ;;  %v1480_v30 = vpop.f32.mrf.mxu1 }
 0x1a2   :  { %v1704_v53 = vpop.f32.mrf.mxu0  ;;  %v2975_v6 = vpop.eup %2974  ;;  %v1481_v32 = vadd.f32 %v1480_v30, %v1249_v24 }
 0x1a3   :  { %v1705_v48 = vadd.f32 %v1704_v53, %v1473_v14  ;;  %v1482_v4 = vpop.f32.mrf.mxu1  ;;  %v1260_v53 = vadd.f32 %v3774_v34, %v3721_v5 }
 0x1a4   :  { %v2640_v57 = vpop.f32.mrf.mxu0 }
 0x1a5   :  { %v1483_v45 = vpop.f32.mrf.mxu1  ;;  %2982 = vtanh.f32 %v1705_v48 }
 0x1a6   :  { %v2977_v26 = vpop.eup %2976  ;;  %v1707_v11 = vpop.f32.mrf.mxu0  ;;  %v1484_v9 = vadd.f32 %v1483_v45, %v1252_v46 }
 0x1a7   :  { %v2458_v23 = vpack.c.bf16 %v2977_v26, %v2975_v6  ;;  %v1708_v19 = vadd.f32 %v1707_v11, %v1476_v39  ;;  %v1485_v61 = vpop.f32.mrf.mxu1 }
 0x1a8   :  { %v2641_v59 = vpop.f32.mrf.mxu0 }
 0x1a9   :  { %2554 = vst [vmem:[%s3958_s3 + $0x28] sm:$0xff] %v2458_v23   ;;  %2984 = vtanh.f32 %v1708_v19  ;;  %v1488_v31 = vpop.f32.mrf.mxu1  ;;  %v1265_v23 = vadd.f32 %v3774_v34, %v3734_v21 }
 0x1aa   :  { %v1712_v28 = vpop.f32.mrf.mxu0  ;;  %v2979_v41 = vpop.eup %2978  ;;  %v1489_v49 = vadd.f32 %v1488_v31, %v1257_v35 }
 0x1ab   :  { %v1713_v0 = vadd.f32 %v1712_v28, %v1481_v32  ;;  %v1490_v12 = vpop.f32.mrf.mxu1  ;;  %v1268_v32 = vadd.f32 %v3774_v34, %v3744_v37 }
 0x1ac   :  { %v2644_v18 = vpop.f32.mrf.mxu0 }
 0x1ad   :  { %v1491_v22 = vpop.f32.mrf.mxu1  ;;  %2986 = vtanh.f32 %v1713_v0 }
 0x1ae   :  { %v2981_v43 = vpop.eup %2980  ;;  %v1715_v38 = vpop.f32.mrf.mxu0  ;;  %v1492_v6 = vadd.f32 %v1491_v22, %v1260_v53  ;;  %v1273_v22 = vadd.f32 %v3774_v34, %v3754_v54 }
 0x1af   :  { %v2463_v2 = vpack.c.bf16 %v2981_v43, %v2979_v41  ;;  %v1716_v50 = vadd.f32 %v1715_v38, %v1484_v9  ;;  %v1493_v16 = vpop.f32.mrf.mxu1 }
 0x1b0   :  { %v2645_v56 = vpop.f32.mrf.mxu0  ;;  %v1276_v16 = vadd.f32 %v3774_v34, %v3761_v1 }
 0x1b1   :  { %2555 = vst [vmem:[%s3958_s3 + $0x30] sm:$0xff] %v2463_v2   ;;  %2988 = vtanh.f32 %v1716_v50  ;;  %v1496_v14 = vpop.f32.mrf.mxu1 }
 0x1b2   :  { %v1720_v30 = vpop.f32.mrf.mxu0  ;;  %v2983_v57 = vpop.eup %2982  ;;  %v1497_v5 = vadd.f32 %v1496_v14, %v1265_v23 }
 0x1b3   :  { %v1721_v55 = vadd.f32 %v1720_v30, %v1489_v49  ;;  %v1498_v48 = vpop.f32.mrf.mxu1 }
 0x1b4   :  { %v2648_v4 = vpop.f32.mrf.mxu0 }
 0x1b5   :  { %v1499_v39 = vpop.f32.mrf.mxu1  ;;  %2990 = vtanh.f32 %v1721_v55 }
 0x1b6   :  { %v2985_v60 = vpop.eup %2984  ;;  %v1723_v26 = vpop.f32.mrf.mxu0  ;;  %v1500_v12 = vadd.f32 %v1499_v39, %v1268_v32 }
 0x1b7   :  { %v2468_v45 = vpack.c.bf16 %v2985_v60, %v2983_v57  ;;  %v1724_v11 = vadd.f32 %v1723_v26, %v1492_v6  ;;  %v1501_v19 = vpop.f32.mrf.mxu1  ;;  %v1281_v6 = vadd.f32 %v3774_v34, %v3766_v20 }
 0x1b8   :  { %v2649_v24 = vpop.f32.mrf.mxu0 }
 0x1b9   :  { %2556 = vst [vmem:[%s3958_s3 + $0x38] sm:$0xff] %v2468_v45   ;;  %2992 = vtanh.f32 %v1724_v11  ;;  %v1504_v61 = vpop.f32.mrf.mxu1  ;;  %v1284_v11 = vadd.f32 %v3774_v34, %v3776_v42 }
 0x1ba   :  { %v1728_v59 = vpop.f32.mrf.mxu0  ;;  %v2987_v0 = vpop.eup %2986  ;;  %v1505_v37 = vadd.f32 %v1504_v61, %v1273_v22 }
 0x1bb   :  { %v1729_v31 = vadd.f32 %v1728_v59, %v1497_v5  ;;  %v1506_v28 = vpop.f32.mrf.mxu1 }
 0x1bc   :  { %v2652_v46 = vpop.f32.mrf.mxu0 }
 0x1bd   :  { %v1507_v18 = vpop.f32.mrf.mxu1  ;;  %2994 = vtanh.f32 %v1729_v31  ;;  %v1289_v46 = vadd.f32 %v3774_v34, %v3536_v3 }
 0x1be   :  { %v2989_v21 = vpop.eup %2988  ;;  %v1731_v41 = vpop.f32.mrf.mxu0  ;;  %v1508_v53 = vadd.f32 %v1507_v18, %v1276_v16 }
 0x1bf   :  { %v2473_v9 = vpack.c.bf16 %v2989_v21, %v2987_v0  ;;  %v1732_v43 = vadd.f32 %v1731_v41, %v1500_v12  ;;  %v1509_v38 = vpop.f32.mrf.mxu1  ;;  %v1292_v41 = vadd.f32 %v3774_v34, %v3543_v7 }
 0x1c0   :  { %v2653_v2 = vpop.f32.mrf.mxu0 }
 0x1c1   :  { %2557 = vst [vmem:[%s3958_s3 + $0x40] sm:$0xff] %v2473_v9   ;;  %2996 = vtanh.f32 %v1732_v43  ;;  %v1512_v50 = vpop.f32.mrf.mxu1 }
 0x1c2   :  { %v1736_v35 = vpop.f32.mrf.mxu0  ;;  %v2991_v30 = vpop.eup %2990  ;;  %v1513_v1 = vadd.f32 %v1512_v50, %v1281_v6 }
 0x1c3   :  { %v1737_v56 = vadd.f32 %v1736_v35, %v1505_v37  ;;  %v1514_v49 = vpop.f32.mrf.mxu1 }
 0x1c4   :  { %v2656_v14 = vpop.f32.mrf.mxu0 }
 0x1c5   :  { %v1515_v55 = vpop.f32.mrf.mxu1  ;;  %2998 = vtanh.f32 %v1737_v56  ;;  %v1297_v56 = vadd.f32 %v3774_v34, %v3556_v13 }
 0x1c6   :  { %v2993_v54 = vpop.eup %2992  ;;  %v1739_v48 = vpop.f32.mrf.mxu0  ;;  %v1516_v61 = vadd.f32 %v1515_v55, %v1284_v11 }
 0x1c7   :  { %v2478_v4 = vpack.c.bf16 %v2993_v54, %v2991_v30  ;;  %v1740_v57 = vadd.f32 %v1739_v48, %v1508_v53  ;;  %v1517_v60 = vpop.f32.mrf.mxu1  ;;  %v1300_v54 = vadd.f32 %v3774_v34, %v3563_v17 }
 0x1c8   :  { %v2657_v39 = vpop.f32.mrf.mxu0 }
 0x1c9   :  { %2558 = vst [vmem:[%s3958_s3 + $0x48] sm:$0xff] %v2478_v4   ;;  %3000 = vtanh.f32 %v1740_v57  ;;  %v1520_v26 = vpop.f32.mrf.mxu1 }
 0x1ca   :  { %v1744_v45 = vpop.f32.mrf.mxu0  ;;  %v2995_v5 = vpop.eup %2994  ;;  %v1521_v42 = vadd.f32 %v1520_v26, %v1289_v46 }
 0x1cb   :  { %v1745_v23 = vadd.f32 %v1744_v45, %v1513_v1  ;;  %v1522_v19 = vpop.f32.mrf.mxu1  ;;  %v1305_v45 = vadd.f32 %v3774_v34, %v3576_v25 }
 0x1cc   :  { %v2660_v24 = vpop.f32.mrf.mxu0 }
 0x1cd   :  { %v1523_v59 = vpop.f32.mrf.mxu1  ;;  %3002 = vtanh.f32 %v1745_v23 }
 0x1ce   :  { %v2997_v20 = vpop.eup %2996  ;;  %v1747_v32 = vpop.f32.mrf.mxu0  ;;  %v1524_v2 = vadd.f32 %v1523_v59, %v1292_v41 }
 0x1cf   :  { %v2483_v31 = vpack.c.bf16 %v2997_v20, %v2995_v5  ;;  %v1748_v28 = vadd.f32 %v1747_v32, %v1516_v61  ;;  %v1525_v0 = vpop.f32.mrf.mxu1  ;;  %v1308_v5 = vadd.f32 %v3774_v34, %v3583_v29 }
 0x1d0   :  { %v2661_v12 = vpop.f32.mrf.mxu0 }
 0x1d1   :  { %2559 = vst [vmem:[%s3958_s3 + $0x50] sm:$0xff] %v2483_v31   ;;  %3004 = vtanh.f32 %v1748_v28  ;;  %v1528_v21 = vpop.f32.mrf.mxu1 }
 0x1d2   :  { %v1752_v18 = vpop.f32.mrf.mxu0  ;;  %v2999_v38 = vpop.eup %2998  ;;  %v1529_v7 = vadd.f32 %v1528_v21, %v1297_v56 }
 0x1d3   :  { %v1753_v9 = vadd.f32 %v1752_v18, %v1521_v42  ;;  %v1530_v43 = vpop.f32.mrf.mxu1  ;;  %v1313_v42 = vadd.f32 %v3774_v34, %v3596_v36 }
 0x1d4   :  { %v2664_v22 = vpop.f32.mrf.mxu0  ;;  %v1316_v43 = vadd.f32 %v3774_v34, %v3603_v40 }
 0x1d5   :  { %v1531_v37 = vpop.f32.mrf.mxu1  ;;  %3006 = vtanh.f32 %v1753_v9 }
 0x1d6   :  { %v3001_v3 = vpop.eup %3000  ;;  %v1755_v50 = vpop.f32.mrf.mxu0  ;;  %v1532_v6 = vadd.f32 %v1531_v37, %v1300_v54  ;;  %v1324_v54 = vadd.f32 %v3774_v34, %v3623_v51 }
 0x1d7   :  { %v2488_v35 = vpack.c.bf16 %v3001_v3, %v2999_v38  ;;  %v1756_v16 = vadd.f32 %v1755_v50, %v1524_v2  ;;  %v1533_v49 = vpop.f32.mrf.mxu1 }
 0x1d8   :  { %v2665_v14 = vpop.f32.mrf.mxu0  ;;  %v1321_v49 = vadd.f32 %v3774_v34, %v3616_v47 }
 0x1d9   :  { %2560 = vst [vmem:[%s3958_s3 + $0x58] sm:$0xff] %v2488_v35   ;;  %3008 = vtanh.f32 %v1756_v16  ;;  %v1536_v30 = vpop.f32.mrf.mxu1 }
 0x1da   :  { %v1760_v53 = vpop.f32.mrf.mxu0  ;;  %v3003_v57 = vpop.eup %3002  ;;  %v1537_v17 = vadd.f32 %v1536_v30, %v1305_v45 }
 0x1db   :  { %v1761_v55 = vadd.f32 %v1760_v53, %v1529_v7  ;;  %v1538_v48 = vpop.f32.mrf.mxu1 }
 0x1dc   :  { %v2668_v4 = vpop.f32.mrf.mxu0 }
 0x1dd   :  { %v1539_v60 = vpop.f32.mrf.mxu1  ;;  %3010 = vtanh.f32 %v1761_v55 }
 0x1de   :  { %v3005_v13 = vpop.eup %3004  ;;  %v1763_v39 = vpop.f32.mrf.mxu0  ;;  %v1540_v31 = vadd.f32 %v1539_v60, %v1308_v5 }
 0x1df   :  { %v2493_v1 = vpack.c.bf16 %v3005_v13, %v3003_v57  ;;  %v1764_v26 = vadd.f32 %v1763_v39, %v1532_v6  ;;  %v1541_v11 = vpop.f32.mrf.mxu1 }
 0x1e0   :  { %v2669_v23 = vpop.f32.mrf.mxu0 }
 0x1e1   :  { %2561 = vst [vmem:[%s3958_s3 + $0x60] sm:$0xff] %v2493_v1   ;;  %3012 = vtanh.f32 %v1764_v26  ;;  %v1544_v19 = vpop.f32.mrf.mxu1  ;;  %v1329_v26 = vadd.f32 %v3774_v34, %v3636_v58 }
 0x1e2   :  { %v1768_v24 = vpop.f32.mrf.mxu0  ;;  %v3007_v32 = vpop.eup %3006  ;;  %v1545_v29 = vadd.f32 %v1544_v19, %v1313_v42  ;;  %v1332_v19 = vadd.f32 %v3774_v34, %v3643_v62 }
 0x1e3   :  { %v1769_v61 = vadd.f32 %v1768_v24, %v1537_v17  ;;  %v1546_v20 = vpop.f32.mrf.mxu1 }
 0x1e4   :  { %v2672_v59 = vpop.f32.mrf.mxu0 }
 0x1e5   :  { %v1547_v28 = vpop.f32.mrf.mxu1  ;;  %3014 = vtanh.f32 %v1769_v61 }
 0x1e6   :  { %v3009_v25 = vpop.eup %3008  ;;  %v1771_v46 = vpop.f32.mrf.mxu0  ;;  %v1548_v37 = vadd.f32 %v1547_v28, %v1316_v43 }
 0x1e7   :  { %v2498_v0 = vpack.c.bf16 %v3009_v25, %v3007_v32  ;;  %v1772_v12 = vadd.f32 %v1771_v46, %v1540_v31  ;;  %v1549_v21 = vpop.f32.mrf.mxu1  ;;  %v1337_v46 = vadd.f32 %v3774_v34, %v3656_v10 }
 0x1e8   :  { %v2673_v18 = vpop.f32.mrf.mxu0 }
 0x1e9   :  { %2562 = vst [vmem:[%s3958_s3 + $0x68] sm:$0xff] %v2498_v0   ;;  %3016 = vtanh.f32 %v1772_v12  ;;  %v1552_v41 = vpop.f32.mrf.mxu1  ;;  %v1340_v18 = vadd.f32 %v3774_v34, %v3663_v15 }
 0x1ea   :  { %v1776_v9 = vpop.f32.mrf.mxu0  ;;  %v3011_v3 = vpop.eup %3010  ;;  %v1553_v40 = vadd.f32 %v1552_v41, %v1321_v49  ;;  %v1348_v49 = vadd.f32 %v3774_v34, %v3683_v33 }
 0x1eb   :  { %v1777_v22 = vadd.f32 %v1776_v9, %v1545_v29  ;;  %v1554_v38 = vpop.f32.mrf.mxu1 }
 0x1ec   :  { %v2676_v2 = vpop.f32.mrf.mxu0 }
 0x1ed   :  { %v1555_v50 = vpop.f32.mrf.mxu1  ;;  %3018 = vtanh.f32 %v1777_v22 }
 0x1ee   :  { %v3013_v36 = vpop.eup %3012  ;;  %v1779_v35 = vpop.f32.mrf.mxu0  ;;  %v1556_v6 = vadd.f32 %v1555_v50, %v1324_v54 }
 0x1ef   :  { %v2503_v16 = vpack.c.bf16 %v3013_v36, %v3011_v3  ;;  %v1780_v56 = vadd.f32 %v1779_v35, %v1548_v37  ;;  %v1557_v14 = vpop.f32.mrf.mxu1  ;;  %v1345_v36 = vadd.f32 %v3774_v34, %v3676_v27 }
 0x1f0   :  { %v2677_v7 = vpop.f32.mrf.mxu0 }
 0x1f1   :  { %2563 = vst [vmem:[%s3958_s3 + $0x70] sm:$0xff] %v2503_v16   ;;  %3020 = vtanh.f32 %v1780_v56  ;;  %v1560_v30 = vpop.f32.mrf.mxu1 }
 0x1f2   :  { %v1784_v53 = vpop.f32.mrf.mxu0  ;;  %v3015_v57 = vpop.eup %3014  ;;  %v1561_v51 = vadd.f32 %v1560_v30, %v1329_v26 }
 0x1f3   :  { %v1785_v55 = vadd.f32 %v1784_v53, %v1553_v40  ;;  %v1562_v48 = vpop.f32.mrf.mxu1 }
 0x1f4   :  { %v2680_v4 = vpop.f32.mrf.mxu0 }
 0x1f5   :  { %v1563_v13 = vpop.f32.mrf.mxu1  ;;  %3022 = vtanh.f32 %v1785_v55 }
 0x1f6   :  { %v3017_v47 = vpop.eup %3016  ;;  %v1787_v60 = vpop.f32.mrf.mxu0  ;;  %v1564_v59 = vadd.f32 %v1563_v13, %v1332_v19 }
 0x1f7   :  { %v2508_v39 = vpack.c.bf16 %v3017_v47, %v3015_v57  ;;  %v1788_v1 = vadd.f32 %v1787_v60, %v1556_v6  ;;  %v1565_v45 = vpop.f32.mrf.mxu1  ;;  %v1353_v57 = vadd.f32 %v3774_v34, %v3696_v44 }
 0x1f8   :  { %v2681_v11 = vpop.f32.mrf.mxu0 }
 0x1f9   :  { %2564 = vst [vmem:[%s3958_s3 + $0x78] sm:$0xff] %v2508_v39   ;;  %3024 = vtanh.f32 %v1788_v1  ;;  %v1568_v23 = vpop.f32.mrf.mxu1  ;;  %v1356_v39 = vadd.f32 %v3774_v34, %v3703_v52 }
 0x1fa   :  { %v1792_v17 = vpop.f32.mrf.mxu0  ;;  %v3019_v20 = vpop.eup %3018  ;;  %v1569_v62 = vadd.f32 %v1568_v23, %v1337_v46 }
 0x1fb   :  { %v1793_v24 = vadd.f32 %v1792_v17, %v1561_v51  ;;  %v1570_v5 = vpop.f32.mrf.mxu1 }
 0x1fc   :  { %v2684_v61 = vpop.f32.mrf.mxu0  ;;  %v1361_v5 = vadd.f32 %v3774_v34, %v3716_v63 }
 0x1fd   :  { %v1571_v32 = vpop.f32.mrf.mxu1  ;;  %3026 = vtanh.f32 %v1793_v24 }
 0x1fe   :  { %v3021_v58 = vpop.eup %3020  ;;  %v1795_v31 = vpop.f32.mrf.mxu0  ;;  %v1572_v22 = vadd.f32 %v1571_v32, %v1340_v18  ;;  %v1364_v32 = vadd.f32 %v3774_v34, %v3723_v8  ;;  %v3962_v18 = vld [vmem:[#allocation2_spill] sm:$0xff] }
 0x1ff   :  { %v2513_v25 = vpack.c.bf16 %v3021_v58, %v3019_v20  ;;  %v1796_v28 = vadd.f32 %v1795_v31, %v1564_v59  ;;  %v1573_v0 = vpop.f32.mrf.mxu1 }
 0x200   :  { %v2685_v12 = vpop.f32.mrf.mxu0 }
 0x201   :  { %2565 = vst [vmem:[%s3958_s3 + $0x80] sm:$0xff] %v2513_v25   ;;  %3028 = vtanh.f32 %v1796_v28  ;;  %v1576_v42 = vpop.f32.mrf.mxu1 }
 0x202   :  { %v1800_v21 = vpop.f32.mrf.mxu0  ;;  %v3023_v43 = vpop.eup %3022  ;;  %v1577_v15 = vadd.f32 %v1576_v42, %v1345_v36 }
 0x203   :  { %v1801_v29 = vadd.f32 %v1800_v21, %v1569_v62  ;;  %v1578_v41 = vpop.f32.mrf.mxu1 }
 0x204   :  { %v2688_v9 = vpop.f32.mrf.mxu0 }
 0x205   :  { %v1579_v38 = vpop.f32.mrf.mxu1  ;;  %3030 = vtanh.f32 %v1801_v29  ;;  %v1369_v29 = vadd.f32 %v3774_v34, %v3962_v18 }
 0x206   :  { %v3025_v10 = vpop.eup %3024  ;;  %v1803_v2 = vpop.f32.mrf.mxu0  ;;  %v1580_v53 = vadd.f32 %v1579_v38, %v1348_v49 }
 0x207   :  { %v2518_v3 = vpack.c.bf16 %v3025_v10, %v3023_v43  ;;  %v1804_v37 = vadd.f32 %v1803_v2, %v1572_v22  ;;  %v1581_v50 = vpop.f32.mrf.mxu1  ;;  %v3963_v10 = vld [vmem:[#allocation3_spill] sm:$0xff] }
 0x208   :  { %v2689_v35 = vpop.f32.mrf.mxu0  ;;  %v1372_v38 = vadd.f32 %v3774_v34, %v3963_v10 }
 0x209   :  { %2566 = vst [vmem:[%s3958_s3 + $0x88] sm:$0xff] %v2518_v3   ;;  %3032 = vtanh.f32 %v1804_v37  ;;  %v1584_v16 = vpop.f32.mrf.mxu1 }
 0x20a   :  { %v1808_v56 = vpop.f32.mrf.mxu0  ;;  %v3027_v30 = vpop.eup %3026  ;;  %v1585_v33 = vadd.f32 %v1584_v16, %v1353_v57 }
 0x20b   :  { %v1809_v14 = vadd.f32 %v1808_v56, %v1577_v15  ;;  %v1586_v7 = vpop.f32.mrf.mxu1  ;;  %v3964_v56 = vld [vmem:[#allocation4_spill] sm:$0xff] }
 0x20c   :  { %v2692_v40 = vpop.f32.mrf.mxu0  ;;  %v1377_v49 = vadd.f32 %v3774_v34, %v3964_v56 }
 0x20d   :  { %v1587_v54 = vpop.f32.mrf.mxu1  ;;  %3034 = vtanh.f32 %v1809_v14 }
 0x20e   :  { %v3029_v27 = vpop.eup %3028  ;;  %v1811_v55 = vpop.f32.mrf.mxu0  ;;  %v1588_v51 = vadd.f32 %v1587_v54, %v1356_v39 }
 0x20f   :  { %v2523_v48 = vpack.c.bf16 %v3029_v27, %v3027_v30  ;;  %v1812_v4 = vadd.f32 %v1811_v55, %v1580_v53  ;;  %v1589_v6 = vpop.f32.mrf.mxu1 }
 0x210   :  { %v2693_v47 = vpop.f32.mrf.mxu0 }
 0x211   :  { %2567 = vst [vmem:[%s3958_s3 + $0x90] sm:$0xff] %v2523_v48   ;;  %3036 = vtanh.f32 %v1812_v4  ;;  %v1592_v13 = vpop.f32.mrf.mxu1 }
 0x212   :  { %v1816_v60 = vpop.f32.mrf.mxu0  ;;  %v3031_v11 = vpop.eup %3030  ;;  %v1593_v52 = vadd.f32 %v1592_v13, %v1361_v5 }
 0x213   :  { %v1817_v1 = vadd.f32 %v1816_v60, %v1585_v33  ;;  %v1594_v26 = vpop.f32.mrf.mxu1 }
 0x214   :  { %v2696_v45 = vpop.f32.mrf.mxu0 }
 0x215   :  { %v1595_v23 = vpop.f32.mrf.mxu1  ;;  %3038 = vtanh.f32 %v1817_v1 }
 0x216   :  { %v3033_v44 = vpop.eup %3032  ;;  %v1819_v17 = vpop.f32.mrf.mxu0  ;;  %v1596_v0 = vadd.f32 %v1595_v23, %v1364_v32 }
 0x217   :  { %v2528_v19 = vpack.c.bf16 %v3033_v44, %v3031_v11  ;;  %v1820_v24 = vadd.f32 %v1819_v17, %v1588_v51  ;;  %v1597_v61 = vpop.f32.mrf.mxu1 }
 0x218   :  { %v2697_v20 = vpop.f32.mrf.mxu0 }
 0x219   :  { %2568 = vst [vmem:[%s3958_s3 + $0x98] sm:$0xff] %v2528_v19   ;;  %3040 = vtanh.f32 %v1820_v24  ;;  %v1600_v59 = vpop.f32.mrf.mxu1 }
 0x21a   :  { %v1824_v58 = vpop.f32.mrf.mxu0  ;;  %v3035_v46 = vpop.eup %3034  ;;  %v1601_v8 = vadd.f32 %v1600_v59, %v1369_v29 }
 0x21b   :  { %v1825_v31 = vadd.f32 %v1824_v58, %v1593_v52  ;;  %v1602_v25 = vpop.f32.mrf.mxu1 }
 0x21c   :  { %v2700_v28 = vpop.f32.mrf.mxu0 }
 0x21d   :  { %v1603_v12 = vpop.f32.mrf.mxu1  ;;  %3042 = vtanh.f32 %v1825_v31 }
 0x21e   :  { %v3037_v63 = vpop.eup %3036  ;;  %v1827_v62 = vpop.f32.mrf.mxu0  ;;  %v1604_v50 = vadd.f32 %v1603_v12, %v1372_v38 }
 0x21f   :  { %v2533_v42 = vpack.c.bf16 %v3037_v63, %v3035_v46  ;;  %v1828_v21 = vadd.f32 %v1827_v62, %v1596_v0  ;;  %v1605_v41 = vpop.f32.mrf.mxu1 }
 0x220   :  { %v2701_v9 = vpop.f32.mrf.mxu0 }
 0x221   :  { %2569 = vst [vmem:[%s3958_s3 + $0xa0] sm:$0xff] %v2533_v42   ;;  %3044 = vtanh.f32 %v1828_v21  ;;  %v1608_v43 = vpop.f32.mrf.mxu1 }
 0x222   :  { %v1832_v22 = vpop.f32.mrf.mxu0  ;;  %v3039_v36 = vpop.eup %3038  ;;  %v1609_v53 = vadd.f32 %v1608_v43, %v1377_v49 }
 0x223   :  { %v1833_v2 = vadd.f32 %v1832_v22, %v1601_v8  ;;  %v1610_v37 = vpop.f32.mrf.mxu1 }
 0x224   :  { %v2704_v3 = vpop.f32.mrf.mxu0 }
 0x225   :  { %v1611_v16 = vpop.f32.mrf.mxu1  ;;  %3046 = vtanh.f32 %v1833_v2 }
 0x226   :  { %v3041_v35 = vpop.eup %3040  ;;  %v1835_v15 = vpop.f32.mrf.mxu0 }
 0x227   :  { %v2538_v14 = vpack.c.bf16 %v3041_v35, %v3039_v36  ;;  %v1836_v7 = vadd.f32 %v1835_v15, %v1604_v50  ;;  %v1612_v30 = vpop.f32.mrf.mxu1 }
 0x228   :  { %v2705_v40 = vpop.f32.mrf.mxu0 }
 0x229   :  { %2570 = vst [vmem:[%s3958_s3 + $0xa8] sm:$0xff] %v2538_v14   ;;  %3048 = vtanh.f32 %v1836_v7 }
 0x22a   :  { %v1840_v27 = vpop.f32.mrf.mxu0  ;;  %v3043_v48 = vpop.eup %3042 }
 0x22b   :  { %v1841_v54 = vadd.f32 %v1840_v27, %v1609_v53 }
 0x22c   :  { %v2708_v55 = vpop.f32.mrf.mxu0 }
 0x22d   :  { %3050 = vtanh.f32 %v1841_v54 }
 0x22e   :  { %v3045_v4 = vpop.eup %3044  ;;  %v1843_v57 = vpop.f32.mrf.mxu0 }
 0x22f   :  { %v2543_v6 = vpack.c.bf16 %v3045_v4, %v3043_v48 }
 0x230   :  { %v2709_v34 = vpop.f32.mrf.mxu0 }
 0x231   :  { %2571 = vst [vmem:[%s3958_s3 + $0xb0] sm:$0xff] %v2543_v6  }
 0x232   :  { %v3047_v47 = vpop.eup %3046 }
 0x236   :  { %v3049_v33 = vpop.eup %3048 }
 0x237   :  { %v2548_v13 = vpack.c.bf16 %v3049_v33, %v3047_v47 }
 0x239   :  { %2572 = vst [vmem:[%s3958_s3 + $0xb8] sm:$0xff] %v2548_v13  }
 0x23a   :  { %v3051_v60 = vpop.eup %3050 }
 0x23b   :  { %v2429_v39 = vpack.c.bf16 %v3051_v60, %v3051_v60 }
 0x23d   :  { %2140 = vst [vmem:[%s3958_s3 + $0xc0] sm:$0xf] %v2429_v39 }

// kernel: net_forward.7
= control target key start
LH: loop header
LB: loop body
LE: loop exit
PB: predicated region body
PF: predicated region fallthrough
CT: control target
= control target key end

     0   :  { %s5030_s12 = smov 0   ;;  %s5032_s13 = smov 0   ;;  %s5625_s0 = inlined_call_operand.vmem [shape: bf16[2,25088], index: 0, kind: input, shape index: {}]   ;;  %s5626_s1 = inlined_call_operand.vmem [shape: bf16[25088,160], index: 1, kind: input, shape index: {}]   ;;  %s5627_s2 = inlined_call_operand.vmem [shape: f32[1,160], index: 2, kind: input, shape index: {}]   ;;  %s5628_s3 = inlined_call_operand.vmem [shape: f32[2,160], index: 3, kind: output, shape index: {}]  }
   0x1   :  { %s5034_s14 = smov 0  }
   0x2 LB: > { %s22_s15 = sadd.s32 1, %s5001_s13  ;;  %p3821_p0 = scmp.ge.s32.totalorder %s5005_s14, 1  ;;  %s5005_s14 = sphi %s5034_s14, %s13_s14   ;;  %s5001_s13 = sphi %s5032_s13, %s5632_s13   ;;  %s4997_s12 = sphi %s5030_s12, %s5631_s12  }
   0x3   : > { %p23_p1 = scmp.ge.s32.totalorder %s22_s15, 7  ;;  %p167_p2 = scmp.lt.s32.totalorder %s5005_s14, 8 }
   0x5   : > { %s5634_s15 = smov (%p23_p1, %s22_s15), 0  ;;  %p168_p3 = pnand %p3821_p0, %p167_p2 }
   0x6   : > { %s200_s16 = smul.u32 (!%p168_p3), 28, %s4997_s12  ;;  %p3824_p6 = scmp.ne.s32.totalorder (!%p168_p3), %s4997_s12, 0 }
   0x7   : > { %171 = sbr.rel (%p168_p3) target bundleno = 702 (0x2be), region = 32 }
   0x8   : > { %s209_s17 = smul.u32 (!%p168_p3), 448, %s4997_s12  ;;  %p203_p4 = scmp.lt.s32.totalorder (!%p168_p3), %s200_s16, 195 }
   0xa   : > { %p210_p5 = scmp.lt.s32.totalorder (!%p168_p3), %s209_s17, 3135 }
   0xc   : > { %s5636_s16 = smov (!%p203_p4, %s200_s16), 195  ;;  %s5638_s17 = smov (!%p210_p5, %s209_s17), 3135 }
   0xd   : > { %s5055_s20 = scalar_lea.vmem %s5625_s0, %s5636_s16  ;;  %s4278_s21 = sshll.u32 %s5638_s17, 3 }
   0xe   : > { %s5060_s24 = scalar_lea.vmem %s5626_s1, %s4278_s21  ;;  %224 = sbr.rel (%p3824_p6) target bundleno = 22 (0x16), region = 36 }
  0x13   : > { %vm225_vm0 = vcmask 1041408   ;;  %vm226_vm1 = vcmask 257026   ;;  %v5007_v0 = vmov 0.0  }
  0x14   : > { %vm227_vm2 = vmor %vm226_vm1, %vm225_vm0 }
  0x15   : > { %228 = vst.msk [vmem:[#allocation2] sm:$0xf] %vm227_vm2, %v5007_v0 }
  0x16 PF: > { %v4306_v1 = vld [vmem:[%s5060_s24 + $0x74] ss:$8 sps:$4 sm:$0xff]   ;;  %v4310_v3 = vld [vmem:[%s5060_s24 + $0x70] ss:$8 sps:$4 sm:$0xff]   ;;  %v4312_v5 = vld [vmem:[%s5060_s24 + $0x64] ss:$8 sps:$4 sm:$0xff]   ;;  %v690_v39 = vlaneseq }
  0x17   : > { %v4308_v2 = vld [vmem:[%s5060_s24 + $0x174] ss:$8 sps:$4 sm:$0xff]   ;;  %3125 = vmatprep.subr.bf16.mxu0 %v4306_v1  ;;  %v4311_v4 = vld [vmem:[%s5060_s24 + $0x170] ss:$8 sps:$4 sm:$0xff]   ;;  %v4314_v6 = vld [vmem:[%s5060_s24 + $0x164] ss:$8 sps:$4 sm:$0xff]  }
  0x18   : > { %3166 = vmatprep.subr.bf16.mxu1 %v4308_v2  ;;  %3126 = vmatpush1.bf16.msra.mxu0 %v4310_v3  ;;  %v4316_v7 = vld [vmem:[%s5060_s24 + $0x60] ss:$8 sps:$4 sm:$0xff]   ;;  %v4318_v9 = vld [vmem:[%s5060_s24 + $0x54] ss:$8 sps:$4 sm:$0xff]   ;;  %v4322_v11 = vld [vmem:[%s5060_s24 + $0x50] ss:$8 sps:$4 sm:$0xff]  }
  0x19   : > { %3167 = vmatpush1.bf16.msra.mxu1 %v4311_v4  ;;  %3127 = vmatprep.subr.bf16.mxu0 %v4312_v5  ;;  %v4317_v8 = vld [vmem:[%s5060_s24 + $0x160] ss:$8 sps:$4 sm:$0xff]   ;;  %v4320_v10 = vld [vmem:[%s5060_s24 + $0x154] ss:$8 sps:$4 sm:$0xff]   ;;  %v4323_v12 = vld [vmem:[%s5060_s24 + $0x150] ss:$8 sps:$4 sm:$0xff]  }
  0x1a   : > { %3168 = vmatprep.subr.bf16.mxu1 %v4314_v6  ;;  %v4324_v13 = vld [vmem:[%s5060_s24 + $0x44] ss:$8 sps:$4 sm:$0xff]   ;;  %v4328_v15 = vld [vmem:[%s5060_s24 + $0x40] ss:$8 sps:$4 sm:$0xff]   ;;  %v4330_v17 = vld [vmem:[%s5060_s24 + $0x34] ss:$8 sps:$4 sm:$0xff]  }
  0x1b   : > { %v4326_v14 = vld [vmem:[%s5060_s24 + $0x144] ss:$8 sps:$4 sm:$0xff]   ;;  %v4329_v16 = vld [vmem:[%s5060_s24 + $0x140] ss:$8 sps:$4 sm:$0xff]   ;;  %v4332_v18 = vld [vmem:[%s5060_s24 + $0x134] ss:$8 sps:$4 sm:$0xff]  }
  0x1c   : > { %3128 = vmatpush1.bf16.msra.mxu0 %v4316_v7  ;;  %v4334_v19 = vld [vmem:[%s5060_s24 + $0x30] ss:$8 sps:$4 sm:$0xff]   ;;  %v4336_v21 = vld [vmem:[%s5060_s24 + $0x24] ss:$8 sps:$4 sm:$0xff]   ;;  %v4340_v23 = vld [vmem:[%s5060_s24 + $0x20] ss:$8 sps:$4 sm:$0xff]  }
  0x1d   : > { %3169 = vmatpush1.bf16.msra.mxu1 %v4317_v8  ;;  %3129 = vmatprep.subr.bf16.mxu0 %v4318_v9  ;;  %v4335_v20 = vld [vmem:[%s5060_s24 + $0x130] ss:$8 sps:$4 sm:$0xff]   ;;  %v4338_v22 = vld [vmem:[%s5060_s24 + $0x124] ss:$8 sps:$4 sm:$0xff]   ;;  %v4341_v24 = vld [vmem:[%s5060_s24 + $0x120] ss:$8 sps:$4 sm:$0xff]  }
  0x1e   : > { %3170 = vmatprep.subr.bf16.mxu1 %v4320_v10  ;;  %v4342_v25 = vld [vmem:[%s5060_s24 + $0x14] ss:$8 sps:$4 sm:$0xff]   ;;  %v4346_v27 = vld [vmem:[%s5060_s24 + $0x10] ss:$8 sps:$4 sm:$0xff]   ;;  %v4348_v29 = vld [vmem:[%s5060_s24 + $0x4] ss:$8 sps:$4 sm:$0xff]  }
  0x1f   : > { %v4344_v26 = vld [vmem:[%s5060_s24 + $0x114] ss:$8 sps:$4 sm:$0xff]   ;;  %v4347_v28 = vld [vmem:[%s5060_s24 + $0x110] ss:$8 sps:$4 sm:$0xff]   ;;  %v4350_v30 = vld [vmem:[%s5060_s24 + $0x104] ss:$8 sps:$4 sm:$0xff]  }
  0x20   : > { %3130 = vmatpush1.bf16.msra.mxu0 %v4322_v11  ;;  %v4352_v31 = vld [vmem:[%s5060_s24] ss:$8 sps:$4 sm:$0xff]   ;;  %v4354_v33 = vld [vmem:[%s5060_s24 + $0xf4] ss:$8 sps:$4 sm:$0xff]   ;;  %v4358_v35 = vld [vmem:[%s5060_s24 + $0xf0] ss:$8 sps:$4 sm:$0xff]  }
  0x21   : > { %3171 = vmatpush1.bf16.msra.mxu1 %v4323_v12  ;;  %3131 = vmatprep.subr.bf16.mxu0 %v4324_v13  ;;  %v4353_v32 = vld [vmem:[%s5060_s24 + $0x100] ss:$8 sps:$4 sm:$0xff]   ;;  %v4356_v34 = vld [vmem:[%s5060_s24 + $0x1f4] ss:$8 sps:$4 sm:$0xff]   ;;  %v4359_v36 = vld [vmem:[%s5060_s24 + $0x1f0] ss:$8 sps:$4 sm:$0xff]  }
  0x22   : > { %3172 = vmatprep.subr.bf16.mxu1 %v4326_v14  ;;  %v5008_v37 = vmov 1966171168   ;;  %v4360_v40 = vld [vmem:[%s5060_s24 + $0xe4] ss:$8 sps:$4 sm:$0xff]   ;;  %v4364_v42 = vld [vmem:[%s5060_s24 + $0xe0] ss:$8 sps:$4 sm:$0xff]  }
  0x23   : > { %v688_v38 = vunpack.c.l.s4 %v5008_v37  ;;  %v4362_v41 = vld [vmem:[%s5060_s24 + $0x1e4] ss:$8 sps:$4 sm:$0xff]   ;;  %v5102_v44 = vshrl.u32 %v690_v39, 7  ;;  %v4365_v45 = vld [vmem:[%s5060_s24 + $0x1e0] ss:$8 sps:$4 sm:$0xff]   ;;  %vm3711_vm3 = vcmask 1041408  }
  0x24   : > { %3132 = vmatpush1.bf16.msra.mxu0 %v4328_v15  ;;  %v4366_v46 = vld [vmem:[%s5060_s24 + $0xd4] ss:$8 sps:$4 sm:$0xff]   ;;  %v4370_v48 = vld [vmem:[%s5060_s24 + $0xd0] ss:$8 sps:$4 sm:$0xff]   ;;  %v4372_v51 = vld [vmem:[%s5060_s24 + $0xc4] ss:$8 sps:$4 sm:$0xff]  }
  0x25   : > { %3173 = vmatpush1.bf16.msra.mxu1 %v4329_v16  ;;  %3133 = vmatprep.subr.bf16.mxu0 %v4330_v17  ;;  %v689_v43 = vunpack.c.0.s8 %v688_v38  ;;  %v4368_v47 = vld [vmem:[%s5060_s24 + $0x1d4] ss:$8 sps:$4 sm:$0xff]   ;;  %v4371_v49 = vld [vmem:[%s5060_s24 + $0x1d0] ss:$8 sps:$4 sm:$0xff]   ;;  %v4374_v52 = vld [vmem:[%s5060_s24 + $0x1c4] ss:$8 sps:$4 sm:$0xff]  }
  0x26   : > { %3174 = vmatprep.subr.bf16.mxu1 %v4332_v18  ;;  %v230_v53 = vld [vmem:[%s5055_s20] sm:$0xff]  ;;  %v4378_v57 = vld [vmem:[%s5060_s24 + $0xb4] ss:$8 sps:$4 sm:$0xff]   ;;  %v4382_v60 = vld [vmem:[%s5060_s24 + $0xb0] ss:$8 sps:$4 sm:$0xff]   ;;  %vm3712_vm4 = vcmask 257026  }
  0x27   : > { %v5110_v50 = vsub.s32 %v689_v43, %v5102_v44  ;;  %v4376_v54 = vld [vmem:[%s5060_s24 + $0xc0] ss:$8 sps:$4 sm:$0xff]   ;;  %v4380_v58 = vld [vmem:[%s5060_s24 + $0x1b4] ss:$8 sps:$4 sm:$0xff]   ;;  %v4383_v62 = vld [vmem:[%s5060_s24 + $0x1b0] ss:$8 sps:$4 sm:$0xff]   ;;  %v686_v2 = vcombine.high %v230_v53, %v230_v53 }
  0x28   : > { %3134 = vmatpush1.bf16.msra.mxu0 %v4334_v19  ;;  %v4377_v56 = vld [vmem:[%s5060_s24 + $0x1c0] ss:$8 sps:$4 sm:$0xff]   ;;  %v4384_v63 = vld [vmem:[%s5060_s24 + $0xa4] ss:$8 sps:$4 sm:$0xff]   ;;  %v4390_v5 = vld [vmem:[%s5060_s24 + $0x94] ss:$8 sps:$4 sm:$0xff]  }
  0x29   : > { %3175 = vmatpush1.bf16.msra.mxu1 %v4335_v20  ;;  %3135 = vmatprep.subr.bf16.mxu0 %v4336_v21  ;;  %v693_v55 = vrot.slane %v230_v53, %v5110_v50  ;;  %v4386_v0 = vld [vmem:[%s5060_s24 + $0x1a4] ss:$8 sps:$4 sm:$0xff]   ;;  %v4388_v3 = vld [vmem:[%s5060_s24 + $0xa0] ss:$8 sps:$4 sm:$0xff]   ;;  %v4392_v6 = vld [vmem:[%s5060_s24 + $0x194] ss:$8 sps:$4 sm:$0xff]   ;;  %v5130_v7 = vrot.slane %v686_v2, %v5110_v50 }
  0x2a   : > { %3176 = vmatprep.subr.bf16.mxu1 %v4338_v22  ;;  %v4389_v4 = vld [vmem:[%s5060_s24 + $0x1a0] ss:$8 sps:$4 sm:$0xff]   ;;  %v4394_v8 = vld [vmem:[%s5060_s24 + $0x90] ss:$8 sps:$4 sm:$0xff]   ;;  %v4396_v10 = vld [vmem:[%s5060_s24 + $0x84] ss:$8 sps:$4 sm:$0xff]  }
  0x2b   : > { %v701_v59 = vcombine.high %v693_v55, %v693_v55  ;;  %v4395_v9 = vld [vmem:[%s5060_s24 + $0x190] ss:$8 sps:$4 sm:$0xff]   ;;  %v4398_v11 = vld [vmem:[%s5060_s24 + $0x184] ss:$8 sps:$4 sm:$0xff]   ;;  %v702_v12 = vcombine.high %v5130_v7, %v5130_v7  ;;  %v4400_v13 = vld [vmem:[%s5060_s24 + $0x80] ss:$8 sps:$4 sm:$0xff]   ;;  %v709_v14 = vrot.slane %v693_v55, %v5110_v50 }
  0x2c   : > { %3136 = vmatpush1.bf16.msra.mxu0 %v4340_v23  ;;  %v4401_v15 = vld [vmem:[%s5060_s24 + $0x180] ss:$8 sps:$4 sm:$0xff]   ;;  %v4405_v16 = vld [vmem:[%s5060_s24 + $0x274] ss:$8 sps:$4 sm:$0xff]   ;;  %v4403_v20 = vld [vmem:[%s5060_s24 + $0x270] ss:$8 sps:$4 sm:$0xff]  }
  0x2d   : > { %3177 = vmatpush1.bf16.msra.mxu1 %v4341_v24  ;;  %3137 = vmatprep.subr.bf16.mxu0 %v4342_v25  ;;  %v723_v61 = vrot.slane %v701_v59, %v5110_v50  ;;  %v4408_v17 = vld [vmem:[%s5060_s24 + $0x374] ss:$8 sps:$4 sm:$0xff]   ;;  %v730_v18 = vrot.slane %v702_v12, %v5110_v50  ;;  %v731_v19 = vcombine.high %v709_v14, %v709_v14  ;;  %v4406_v21 = vld [vmem:[%s5060_s24 + $0x370] ss:$8 sps:$4 sm:$0xff]   ;;  %v4411_v22 = vld [vmem:[%s5060_s24 + $0x264] ss:$8 sps:$4 sm:$0xff]  }
  0x2e   : > { %3178 = vmatprep.subr.bf16.mxu1 %v4344_v26  ;;  %v4414_v23 = vld [vmem:[%s5060_s24 + $0x364] ss:$8 sps:$4 sm:$0xff]   ;;  %v4409_v25 = vld [vmem:[%s5060_s24 + $0x260] ss:$8 sps:$4 sm:$0xff]   ;;  %v4427_v37 = vld [vmem:[%s5060_s24 + $0x230] ss:$8 sps:$4 sm:$0xff]  }
  0x2f   : > { %v733_v1 = vcombine.high %v723_v61, %v723_v61  ;;  %3157 = vmatprep.mubr.bf16.mxu0 %v723_v61  ;;  %v734_v24 = vcombine.high %v730_v18, %v730_v18  ;;  %v4412_v26 = vld [vmem:[%s5060_s24 + $0x360] ss:$8 sps:$4 sm:$0xff]   ;;  %v4430_v38 = vld [vmem:[%s5060_s24 + $0x330] ss:$8 sps:$4 sm:$0xff]   ;;  %v4435_v39 = vld [vmem:[%s5060_s24 + $0x224] ss:$8 sps:$4 sm:$0xff]  }
  0x30   : > { %3138 = vmatpush1.bf16.msra.mxu0 %v4346_v27  ;;  %v4417_v27 = vld [vmem:[%s5060_s24 + $0x254] ss:$8 sps:$4 sm:$0xff]   ;;  %v4451_v55 = vld [vmem:[%s5060_s24 + $0x2f0] ss:$8 sps:$4 sm:$0xff]   ;;  %v4457_v59 = vld [vmem:[%s5060_s24 + $0x2e0] ss:$8 sps:$4 sm:$0xff]  }
  0x31   : > { %3179 = vmatpush1.bf16.msra.mxu1 %v4347_v28  ;;  %3139 = vmatprep.subr.bf16.mxu0 %v4348_v29  ;;  %v4420_v28 = vld [vmem:[%s5060_s24 + $0x354] ss:$8 sps:$4 sm:$0xff]   ;;  %v4415_v29 = vld [vmem:[%s5060_s24 + $0x250] ss:$8 sps:$4 sm:$0xff]   ;;  %v4474_v2 = vld [vmem:[%s5060_s24 + $0x3c4] ss:$8 sps:$4 sm:$0xff]  }
  0x32   : > { %3180 = vmatprep.subr.bf16.mxu1 %v4350_v30  ;;  %3198 = vmatprep.mubr.bf16.mxu1 %v733_v1  ;;  %v4418_v30 = vld [vmem:[%s5060_s24 + $0x350] ss:$8 sps:$4 sm:$0xff]   ;;  %v4441_v43 = vld [vmem:[%s5060_s24 + $0x214] ss:$8 sps:$4 sm:$0xff]   ;;  %v4471_v1 = vld [vmem:[%s5060_s24 + $0x2c4] ss:$8 sps:$4 sm:$0xff]  }
  0x33   : > { %v4453_v53 = vld [vmem:[%s5060_s24 + $0x2f4] ss:$8 sps:$4 sm:$0xff]   ;;  %v4481_v12 = vld [vmem:[%s5060_s24 + $0x2a0] ss:$8 sps:$4 sm:$0xff]   ;;  %vm5599_vm5 = vmor %vm3712_vm4, %vm3711_vm3  ;;  %p4274_p7 = scmp.ne.s32.totalorder %s4997_s12, 6 }
  0x34   : > { %3140 = vmatpush1.bf16.msra.mxu0 %v4352_v31  ;;  %v4423_v31 = vld [vmem:[%s5060_s24 + $0x244] ss:$8 sps:$4 sm:$0xff]   ;;  %v4465_v61 = vld [vmem:[%s5060_s24 + $0x2d4] ss:$8 sps:$4 sm:$0xff]  }
  0x35   : > { %3181 = vmatpush1.bf16.msra.mxu1 %v4353_v32  ;;  %3141 = vmatprep.subr.bf16.mxu0 %v4354_v33  ;;  %v4426_v32 = vld [vmem:[%s5060_s24 + $0x344] ss:$8 sps:$4 sm:$0xff]   ;;  %v4421_v33 = vld [vmem:[%s5060_s24 + $0x240] ss:$8 sps:$4 sm:$0xff]  }
  0x36   : > { %3182 = vmatprep.subr.bf16.mxu1 %v4356_v34  ;;  %v4424_v34 = vld [vmem:[%s5060_s24 + $0x340] ss:$8 sps:$4 sm:$0xff]  }
  0x38   : > { %3142 = vmatpush2.bf16.msra.mxu0 %v4358_v35  ;;  %v4429_v35 = vld [vmem:[%s5060_s24 + $0x234] ss:$8 sps:$4 sm:$0xff]  }
  0x39   : > { %3183 = vmatpush2.bf16.msra.mxu1 %v4359_v36  ;;  %3143 = vmatprep.subr.bf16.mxu0 %v4360_v40  ;;  %v4432_v36 = vld [vmem:[%s5060_s24 + $0x334] ss:$8 sps:$4 sm:$0xff]   ;;  %v4438_v40 = vld [vmem:[%s5060_s24 + $0x324] ss:$8 sps:$4 sm:$0xff]  }
  0x3a   : > { %3184 = vmatprep.subr.bf16.mxu1 %v4362_v41  ;;  %v4433_v41 = vld [vmem:[%s5060_s24 + $0x220] ss:$8 sps:$4 sm:$0xff]  }
  0x3c   : > { %3144 = vmatpush2.bf16.msra.mxu0 %v4364_v42  ;;  %v4436_v42 = vld [vmem:[%s5060_s24 + $0x320] ss:$8 sps:$4 sm:$0xff]  }
  0x3d   : > { %3185 = vmatpush2.bf16.msra.mxu1 %v4365_v45  ;;  %3145 = vmatprep.subr.bf16.mxu0 %v4366_v46  ;;  %v4444_v45 = vld [vmem:[%s5060_s24 + $0x314] ss:$8 sps:$4 sm:$0xff]   ;;  %v4439_v46 = vld [vmem:[%s5060_s24 + $0x210] ss:$8 sps:$4 sm:$0xff]  }
  0x3e   : > { %3186 = vmatprep.subr.bf16.mxu1 %v4368_v47  ;;  %v4442_v47 = vld [vmem:[%s5060_s24 + $0x310] ss:$8 sps:$4 sm:$0xff]  }
  0x40   : > { %3146 = vmatpush2.bf16.msra.mxu0 %v4370_v48  ;;  %v4447_v48 = vld [vmem:[%s5060_s24 + $0x204] ss:$8 sps:$4 sm:$0xff]  }
  0x41   : > { %3187 = vmatpush2.bf16.msra.mxu1 %v4371_v49  ;;  %3147 = vmatprep.subr.bf16.mxu0 %v4372_v51  ;;  %v4450_v49 = vld [vmem:[%s5060_s24 + $0x304] ss:$8 sps:$4 sm:$0xff]   ;;  %v4445_v51 = vld [vmem:[%s5060_s24 + $0x200] ss:$8 sps:$4 sm:$0xff]  }
  0x42   : > { %3188 = vmatprep.subr.bf16.mxu1 %v4374_v52  ;;  %v4448_v52 = vld [vmem:[%s5060_s24 + $0x300] ss:$8 sps:$4 sm:$0xff]  }
  0x44   : > { %3148 = vmatpush2.bf16.msra.mxu0 %v4376_v54  ;;  %v4456_v54 = vld [vmem:[%s5060_s24 + $0x3f4] ss:$8 sps:$4 sm:$0xff]  }
  0x45   : > { %3189 = vmatpush2.bf16.msra.mxu1 %v4377_v56  ;;  %3149 = vmatprep.subr.bf16.mxu0 %v4378_v57  ;;  %v4454_v56 = vld [vmem:[%s5060_s24 + $0x3f0] ss:$8 sps:$4 sm:$0xff]   ;;  %v4459_v57 = vld [vmem:[%s5060_s24 + $0x2e4] ss:$8 sps:$4 sm:$0xff]  }
  0x46   : > { %3190 = vmatprep.subr.bf16.mxu1 %v4380_v58  ;;  %v4462_v58 = vld [vmem:[%s5060_s24 + $0x3e4] ss:$8 sps:$4 sm:$0xff]  }
  0x48   : > { %3150 = vmatpush2.bf16.msra.mxu0 %v4382_v60  ;;  %v4460_v60 = vld [vmem:[%s5060_s24 + $0x3e0] ss:$8 sps:$4 sm:$0xff]  }
  0x49   : > { %3191 = vmatpush2.bf16.msra.mxu1 %v4383_v62  ;;  %3151 = vmatprep.subr.bf16.mxu0 %v4384_v63  ;;  %v4468_v62 = vld [vmem:[%s5060_s24 + $0x3d4] ss:$8 sps:$4 sm:$0xff]   ;;  %v4463_v63 = vld [vmem:[%s5060_s24 + $0x2d0] ss:$8 sps:$4 sm:$0xff]  }
  0x4a   : > { %3192 = vmatprep.subr.bf16.mxu1 %v4386_v0  ;;  %v4466_v0 = vld [vmem:[%s5060_s24 + $0x3d0] ss:$8 sps:$4 sm:$0xff]  }
  0x4c   : > { %3152 = vmatpush2.bf16.msra.mxu0 %v4388_v3  ;;  %v4469_v3 = vld [vmem:[%s5060_s24 + $0x2c0] ss:$8 sps:$4 sm:$0xff]  }
  0x4d   : > { %3193 = vmatpush2.bf16.msra.mxu1 %v4389_v4  ;;  %3153 = vmatprep.subr.bf16.mxu0 %v4390_v5  ;;  %v4472_v4 = vld [vmem:[%s5060_s24 + $0x3c0] ss:$8 sps:$4 sm:$0xff]   ;;  %v4477_v5 = vld [vmem:[%s5060_s24 + $0x2b4] ss:$8 sps:$4 sm:$0xff]  }
  0x4e   : > { %3194 = vmatprep.subr.bf16.mxu1 %v4392_v6  ;;  %v4480_v6 = vld [vmem:[%s5060_s24 + $0x3b4] ss:$8 sps:$4 sm:$0xff]  }
  0x50   : > { %3154 = vmatpush2.bf16.msra.mxu0 %v4394_v8  ;;  %v4475_v8 = vld [vmem:[%s5060_s24 + $0x2b0] ss:$8 sps:$4 sm:$0xff]  }
  0x51   : > { %3195 = vmatpush2.bf16.msra.mxu1 %v4395_v9  ;;  %3155 = vmatprep.subr.bf16.mxu0 %v4396_v10  ;;  %v4478_v9 = vld [vmem:[%s5060_s24 + $0x3b0] ss:$8 sps:$4 sm:$0xff]   ;;  %v4483_v10 = vld [vmem:[%s5060_s24 + $0x2a4] ss:$8 sps:$4 sm:$0xff]  }
  0x52   : > { %3196 = vmatprep.subr.bf16.mxu1 %v4398_v11  ;;  %v4486_v11 = vld [vmem:[%s5060_s24 + $0x3a4] ss:$8 sps:$4 sm:$0xff]  }
  0x54   : > { %3156 = vmatpush2.bf16.msra.mxu0 %v4400_v13  ;;  %v4484_v13 = vld [vmem:[%s5060_s24 + $0x3a0] ss:$8 sps:$4 sm:$0xff]  }
  0x55   : > { %3197 = vmatpush2.bf16.msra.mxu1 %v4401_v15  ;;  %3207 = vmatprep.subr.bf16.mxu0 %v4405_v16  ;;  %v4492_v15 = vld [vmem:[%s5060_s24 + $0x394] ss:$8 sps:$4 sm:$0xff]   ;;  %v4487_v16 = vld [vmem:[%s5060_s24 + $0x290] ss:$8 sps:$4 sm:$0xff]  }
  0x56   : > { %3248 = vmatprep.subr.bf16.mxu1 %v4408_v17  ;;  %v4490_v17 = vld [vmem:[%s5060_s24 + $0x390] ss:$8 sps:$4 sm:$0xff]  }
  0x57   : > { %3158 = vmatmul.mubr.bf16.vlgmr.msra.gmra.mxu0 %v709_v14  ;;  %v4489_v14 = vld [vmem:[%s5060_s24 + $0x294] ss:$8 sps:$4 sm:$0xff]  }
  0x58   : > { %3199 = vmatmul.mubr.bf16.vlgmr.msra.gmra.mxu1 %v731_v19  ;;  %3208 = vmatpush1.bf16.msra.mxu0 %v4403_v20  ;;  %v4498_v19 = vld [vmem:[%s5060_s24 + $0x384] ss:$8 sps:$4 sm:$0xff]   ;;  %v4493_v20 = vld [vmem:[%s5060_s24 + $0x280] ss:$8 sps:$4 sm:$0xff]  }
  0x59   : > { %3249 = vmatpush1.bf16.msra.mxu1 %v4406_v21  ;;  %3209 = vmatprep.subr.bf16.mxu0 %v4411_v22  ;;  %v716_v21 = vrot.slane %v5130_v7, %v5110_v50  ;;  %v4496_v22 = vld [vmem:[%s5060_s24 + $0x380] ss:$8 sps:$4 sm:$0xff]   ;;  %v4507_v7 = vld [vmem:[%s5060_s24 + $0x464] ss:$8 sps:$4 sm:$0xff]  }
  0x5a   : > { %3250 = vmatprep.subr.bf16.mxu1 %v4414_v23  ;;  %3239 = vmatprep.mubr.bf16.mxu0 %v730_v18  ;;  %v4495_v18 = vld [vmem:[%s5060_s24 + $0x284] ss:$8 sps:$4 sm:$0xff]   ;;  %v4501_v23 = vld [vmem:[%s5060_s24 + $0x474] ss:$8 sps:$4 sm:$0xff]  }
  0x5b   : > { %3280 = vmatprep.mubr.bf16.mxu1 %v734_v24  ;;  %v4504_v24 = vld [vmem:[%s5060_s24 + $0x574] ss:$8 sps:$4 sm:$0xff]  }
  0x5c   : > { %3210 = vmatpush1.bf16.msra.mxu0 %v4409_v25  ;;  %v732_v25 = vcombine.high %v716_v21, %v716_v21 }
  0x5d   : > { %3251 = vmatpush1.bf16.msra.mxu1 %v4412_v26  ;;  %3211 = vmatprep.subr.bf16.mxu0 %v4417_v27  ;;  %v4499_v26 = vld [vmem:[%s5060_s24 + $0x470] ss:$8 sps:$4 sm:$0xff]  }
  0x5e   : > { %3252 = vmatprep.subr.bf16.mxu1 %v4420_v28  ;;  %v4502_v27 = vld [vmem:[%s5060_s24 + $0x570] ss:$8 sps:$4 sm:$0xff]   ;;  %v5213_v28 = vld [vmem:[%s5055_s20 + $0x8] sm:$0xff] }
  0x60   : > { %3212 = vmatpush1.bf16.msra.mxu0 %v4415_v29  ;;  %v4510_v29 = vld [vmem:[%s5060_s24 + $0x564] ss:$8 sps:$4 sm:$0xff]  }
  0x61   : > { %3253 = vmatpush1.bf16.msra.mxu1 %v4418_v30  ;;  %3213 = vmatprep.subr.bf16.mxu0 %v4423_v31  ;;  %v5219_v30 = vrot.slane %v5213_v28, %v5110_v50 }
  0x62   : > { %3254 = vmatprep.subr.bf16.mxu1 %v4426_v32  ;;  %v4505_v32 = vld [vmem:[%s5060_s24 + $0x460] ss:$8 sps:$4 sm:$0xff]  }
  0x63   : > { %v750_v31 = vcombine.high %v5219_v30, %v5219_v30 }
  0x64   : > { %3214 = vmatpush1.bf16.msra.mxu0 %v4421_v33  ;;  %v4508_v33 = vld [vmem:[%s5060_s24 + $0x560] ss:$8 sps:$4 sm:$0xff]  }
  0x65   : > { %3255 = vmatpush1.bf16.msra.mxu1 %v4424_v34  ;;  %3215 = vmatprep.subr.bf16.mxu0 %v4429_v35  ;;  %v4513_v34 = vld [vmem:[%s5060_s24 + $0x454] ss:$8 sps:$4 sm:$0xff]  }
  0x66   : > { %3256 = vmatprep.subr.bf16.mxu1 %v4432_v36  ;;  %v4516_v35 = vld [vmem:[%s5060_s24 + $0x554] ss:$8 sps:$4 sm:$0xff]   ;;  %v772_v36 = vrot.slane %v750_v31, %v5110_v50 }
  0x68   : > { %3216 = vmatpush1.bf16.msra.mxu0 %v4427_v37  ;;  %v782_v37 = vcombine.high %v772_v36, %v772_v36 }
  0x69   : > { %3257 = vmatpush1.bf16.msra.mxu1 %v4430_v38  ;;  %3217 = vmatprep.subr.bf16.mxu0 %v4435_v39  ;;  %v4511_v38 = vld [vmem:[%s5060_s24 + $0x450] ss:$8 sps:$4 sm:$0xff]  }
  0x6a   : > { %3258 = vmatprep.subr.bf16.mxu1 %v4438_v40  ;;  %v4514_v39 = vld [vmem:[%s5060_s24 + $0x550] ss:$8 sps:$4 sm:$0xff]   ;;  %v4519_v40 = vld [vmem:[%s5060_s24 + $0x444] ss:$8 sps:$4 sm:$0xff]  }
  0x6c   : > { %3218 = vmatpush1.bf16.msra.mxu0 %v4433_v41  ;;  %v4522_v41 = vld [vmem:[%s5060_s24 + $0x544] ss:$8 sps:$4 sm:$0xff]  }
  0x6d   : > { %3259 = vmatpush1.bf16.msra.mxu1 %v4436_v42  ;;  %3219 = vmatprep.subr.bf16.mxu0 %v4441_v43  ;;  %v4517_v42 = vld [vmem:[%s5060_s24 + $0x440] ss:$8 sps:$4 sm:$0xff]  }
  0x6e   : > { %3260 = vmatprep.subr.bf16.mxu1 %v4444_v45  ;;  %v4520_v43 = vld [vmem:[%s5060_s24 + $0x540] ss:$8 sps:$4 sm:$0xff]   ;;  %v4525_v45 = vld [vmem:[%s5060_s24 + $0x434] ss:$8 sps:$4 sm:$0xff]  }
  0x70   : > { %3220 = vmatpush1.bf16.msra.mxu0 %v4439_v46  ;;  %v4528_v46 = vld [vmem:[%s5060_s24 + $0x534] ss:$8 sps:$4 sm:$0xff]  }
  0x71   : > { %3261 = vmatpush1.bf16.msra.mxu1 %v4442_v47  ;;  %3221 = vmatprep.subr.bf16.mxu0 %v4447_v48  ;;  %v4523_v47 = vld [vmem:[%s5060_s24 + $0x430] ss:$8 sps:$4 sm:$0xff]  }
  0x72   : > { %3262 = vmatprep.subr.bf16.mxu1 %v4450_v49  ;;  %v4526_v48 = vld [vmem:[%s5060_s24 + $0x530] ss:$8 sps:$4 sm:$0xff]   ;;  %v4531_v49 = vld [vmem:[%s5060_s24 + $0x424] ss:$8 sps:$4 sm:$0xff]  }
  0x74   : > { %3222 = vmatpush1.bf16.msra.mxu0 %v4445_v51  ;;  %v4534_v51 = vld [vmem:[%s5060_s24 + $0x524] ss:$8 sps:$4 sm:$0xff]  }
  0x75   : > { %3263 = vmatpush1.bf16.msra.mxu1 %v4448_v52  ;;  %3223 = vmatprep.subr.bf16.mxu0 %v4453_v53  ;;  %v4529_v52 = vld [vmem:[%s5060_s24 + $0x420] ss:$8 sps:$4 sm:$0xff]  }
  0x76   : > { %3264 = vmatprep.subr.bf16.mxu1 %v4456_v54  ;;  %v4532_v53 = vld [vmem:[%s5060_s24 + $0x520] ss:$8 sps:$4 sm:$0xff]   ;;  %v4537_v54 = vld [vmem:[%s5060_s24 + $0x414] ss:$8 sps:$4 sm:$0xff]  }
  0x78   : > { %3224 = vmatpush2.bf16.msra.mxu0 %v4451_v55  ;;  %v4540_v55 = vld [vmem:[%s5060_s24 + $0x514] ss:$8 sps:$4 sm:$0xff]  }
  0x79   : > { %3265 = vmatpush2.bf16.msra.mxu1 %v4454_v56  ;;  %3225 = vmatprep.subr.bf16.mxu0 %v4459_v57  ;;  %v4535_v56 = vld [vmem:[%s5060_s24 + $0x410] ss:$8 sps:$4 sm:$0xff]  }
  0x7a   : > { %3266 = vmatprep.subr.bf16.mxu1 %v4462_v58  ;;  %v4538_v57 = vld [vmem:[%s5060_s24 + $0x510] ss:$8 sps:$4 sm:$0xff]   ;;  %v4543_v58 = vld [vmem:[%s5060_s24 + $0x404] ss:$8 sps:$4 sm:$0xff]  }
  0x7c   : > { %3226 = vmatpush2.bf16.msra.mxu0 %v4457_v59  ;;  %v4546_v59 = vld [vmem:[%s5060_s24 + $0x504] ss:$8 sps:$4 sm:$0xff]  }
  0x7d   : > { %3267 = vmatpush2.bf16.msra.mxu1 %v4460_v60  ;;  %3227 = vmatprep.subr.bf16.mxu0 %v4465_v61  ;;  %v4541_v60 = vld [vmem:[%s5060_s24 + $0x400] ss:$8 sps:$4 sm:$0xff]  }
  0x7e   : > { %3268 = vmatprep.subr.bf16.mxu1 %v4468_v62  ;;  %v4544_v61 = vld [vmem:[%s5060_s24 + $0x500] ss:$8 sps:$4 sm:$0xff]   ;;  %v4549_v62 = vld [vmem:[%s5060_s24 + $0x4f4] ss:$8 sps:$4 sm:$0xff]  }
  0x80   : > { %3228 = vmatpush2.bf16.msra.mxu0 %v4463_v63  ;;  %v4552_v63 = vld [vmem:[%s5060_s24 + $0x5f4] ss:$8 sps:$4 sm:$0xff]  }
  0x81   : > { %3269 = vmatpush2.bf16.msra.mxu1 %v4466_v0  ;;  %3229 = vmatprep.subr.bf16.mxu0 %v4471_v1  ;;  %v4547_v0 = vld [vmem:[%s5060_s24 + $0x4f0] ss:$8 sps:$4 sm:$0xff]  }
  0x82   : > { %3270 = vmatprep.subr.bf16.mxu1 %v4474_v2  ;;  %v4550_v1 = vld [vmem:[%s5060_s24 + $0x5f0] ss:$8 sps:$4 sm:$0xff]   ;;  %v4555_v2 = vld [vmem:[%s5060_s24 + $0x4e4] ss:$8 sps:$4 sm:$0xff]  }
  0x84   : > { %3230 = vmatpush2.bf16.msra.mxu0 %v4469_v3  ;;  %v4558_v3 = vld [vmem:[%s5060_s24 + $0x5e4] ss:$8 sps:$4 sm:$0xff]  }
  0x85   : > { %3271 = vmatpush2.bf16.msra.mxu1 %v4472_v4  ;;  %3231 = vmatprep.subr.bf16.mxu0 %v4477_v5  ;;  %v4553_v4 = vld [vmem:[%s5060_s24 + $0x4e0] ss:$8 sps:$4 sm:$0xff]  }
  0x86   : > { %3272 = vmatprep.subr.bf16.mxu1 %v4480_v6  ;;  %v4556_v5 = vld [vmem:[%s5060_s24 + $0x5e0] ss:$8 sps:$4 sm:$0xff]   ;;  %v4561_v6 = vld [vmem:[%s5060_s24 + $0x4d4] ss:$8 sps:$4 sm:$0xff]  }
  0x88   : > { %3232 = vmatpush2.bf16.msra.mxu0 %v4475_v8  ;;  %v4564_v8 = vld [vmem:[%s5060_s24 + $0x5d4] ss:$8 sps:$4 sm:$0xff]  }
  0x89   : > { %3273 = vmatpush2.bf16.msra.mxu1 %v4478_v9  ;;  %3233 = vmatprep.subr.bf16.mxu0 %v4483_v10  ;;  %v4559_v9 = vld [vmem:[%s5060_s24 + $0x4d0] ss:$8 sps:$4 sm:$0xff]  }
  0x8a   : > { %3274 = vmatprep.subr.bf16.mxu1 %v4486_v11  ;;  %v4562_v10 = vld [vmem:[%s5060_s24 + $0x5d0] ss:$8 sps:$4 sm:$0xff]   ;;  %v4567_v11 = vld [vmem:[%s5060_s24 + $0x4c4] ss:$8 sps:$4 sm:$0xff]  }
  0x8c   : > { %3234 = vmatpush2.bf16.msra.mxu0 %v4481_v12  ;;  %v4570_v12 = vld [vmem:[%s5060_s24 + $0x5c4] ss:$8 sps:$4 sm:$0xff]  }
  0x8d   : > { %3275 = vmatpush2.bf16.msra.mxu1 %v4484_v13  ;;  %3235 = vmatprep.subr.bf16.mxu0 %v4489_v14  ;;  %v4565_v13 = vld [vmem:[%s5060_s24 + $0x4c0] ss:$8 sps:$4 sm:$0xff]  }
  0x8e   : > { %3276 = vmatprep.subr.bf16.mxu1 %v4492_v15  ;;  %v4568_v14 = vld [vmem:[%s5060_s24 + $0x5c0] ss:$8 sps:$4 sm:$0xff]   ;;  %v4573_v15 = vld [vmem:[%s5060_s24 + $0x4b4] ss:$8 sps:$4 sm:$0xff]  }
  0x90   : > { %3236 = vmatpush2.bf16.msra.mxu0 %v4487_v16  ;;  %v4576_v16 = vld [vmem:[%s5060_s24 + $0x5b4] ss:$8 sps:$4 sm:$0xff]  }
  0x91   : > { %3277 = vmatpush2.bf16.msra.mxu1 %v4490_v17  ;;  %3237 = vmatprep.subr.bf16.mxu0 %v4495_v18  ;;  %v4571_v17 = vld [vmem:[%s5060_s24 + $0x4b0] ss:$8 sps:$4 sm:$0xff]  }
  0x92   : > { %3278 = vmatprep.subr.bf16.mxu1 %v4498_v19  ;;  %v4574_v18 = vld [vmem:[%s5060_s24 + $0x5b0] ss:$8 sps:$4 sm:$0xff]   ;;  %v4579_v19 = vld [vmem:[%s5060_s24 + $0x4a4] ss:$8 sps:$4 sm:$0xff]  }
  0x94   : > { %3238 = vmatpush2.bf16.msra.mxu0 %v4493_v20  ;;  %v4582_v20 = vld [vmem:[%s5060_s24 + $0x5a4] ss:$8 sps:$4 sm:$0xff]  }
  0x95   : > { %3279 = vmatpush2.bf16.msra.mxu1 %v4496_v22  ;;  %3289 = vmatprep.subr.bf16.mxu0 %v4501_v23  ;;  %v4577_v22 = vld [vmem:[%s5060_s24 + $0x4a0] ss:$8 sps:$4 sm:$0xff]  }
  0x96   : > { %3330 = vmatprep.subr.bf16.mxu1 %v4504_v24  ;;  %v4580_v23 = vld [vmem:[%s5060_s24 + $0x5a0] ss:$8 sps:$4 sm:$0xff]   ;;  %v4585_v24 = vld [vmem:[%s5060_s24 + $0x494] ss:$8 sps:$4 sm:$0xff]  }
  0x97   : > { %3240 = vmatmul.mubr.bf16.vlgmr.msra.gmra.mxu0 %v716_v21  ;;  %v735_v21 = vcombine.high %v5213_v28, %v5213_v28  ;;  %v4586_v28 = vld [vmem:[%s5060_s24 + $0x590] ss:$8 sps:$4 sm:$0xff]  }
  0x98   : > { %3281 = vmatmul.mubr.bf16.vlgmr.msra.gmra.mxu1 %v732_v25  ;;  %3290 = vmatpush1.bf16.msra.mxu0 %v4499_v26  ;;  %v4588_v25 = vld [vmem:[%s5060_s24 + $0x594] ss:$8 sps:$4 sm:$0xff]  }
  0x99   : > { %3331 = vmatpush1.bf16.msra.mxu1 %v4502_v27  ;;  %3291 = vmatprep.subr.bf16.mxu0 %v4507_v7  ;;  %v5279_v26 = vrot.slane %v735_v21, %v5110_v50  ;;  %v4583_v27 = vld [vmem:[%s5060_s24 + $0x490] ss:$8 sps:$4 sm:$0xff]   ;;  %v4591_v7 = vld [vmem:[%s5060_s24 + $0x484] ss:$8 sps:$4 sm:$0xff]  }
  0x9a   : > { %3332 = vmatprep.subr.bf16.mxu1 %v4510_v29  ;;  %3321 = vmatprep.mubr.bf16.mxu0 %v772_v36  ;;  %v4594_v29 = vld [vmem:[%s5060_s24 + $0x584] ss:$8 sps:$4 sm:$0xff]   ;;  %v4600_v36 = vld [vmem:[%s5060_s24 + $0x774] ss:$8 sps:$4 sm:$0xff]  }
  0x9b   : > { %3362 = vmatprep.mubr.bf16.mxu1 %v782_v37  ;;  %v751_v31 = vcombine.high %v5279_v26, %v5279_v26  ;;  %v4666_v21 = vld [vmem:[%s5060_s24 + $0x7c4] ss:$8 sps:$4 sm:$0xff]  }
  0x9c   : > { %3292 = vmatpush1.bf16.msra.mxu0 %v4505_v32  ;;  %v758_v32 = vrot.slane %v5219_v30, %v5110_v50  ;;  %v4598_v30 = vld [vmem:[%s5060_s24 + $0x770] ss:$8 sps:$4 sm:$0xff]  }
  0x9d   : > { %3333 = vmatpush1.bf16.msra.mxu1 %v4508_v33  ;;  %3293 = vmatprep.subr.bf16.mxu0 %v4513_v34  ;;  %v4589_v33 = vld [vmem:[%s5060_s24 + $0x480] ss:$8 sps:$4 sm:$0xff]   ;;  %v779_v37 = vrot.slane %v751_v31, %v5110_v50 }
  0x9e   : > { %3334 = vmatprep.subr.bf16.mxu1 %v4516_v35  ;;  %v4592_v34 = vld [vmem:[%s5060_s24 + $0x580] ss:$8 sps:$4 sm:$0xff]   ;;  %v4597_v35 = vld [vmem:[%s5060_s24 + $0x674] ss:$8 sps:$4 sm:$0xff]  }
  0x9f   : > { %v4673_v31 = vld [vmem:[%s5060_s24 + $0x6a0] ss:$8 sps:$4 sm:$0xff]  }
  0xa0   : > { %3294 = vmatpush1.bf16.msra.mxu0 %v4511_v38  ;;  %v780_v38 = vcombine.high %v758_v32, %v758_v32 }
  0xa1   : > { %3335 = vmatpush1.bf16.msra.mxu1 %v4514_v39  ;;  %3295 = vmatprep.subr.bf16.mxu0 %v4519_v40  ;;  %v4595_v39 = vld [vmem:[%s5060_s24 + $0x670] ss:$8 sps:$4 sm:$0xff]   ;;  %v4603_v40 = vld [vmem:[%s5060_s24 + $0x664] ss:$8 sps:$4 sm:$0xff]  }
  0xa2   : > { %3336 = vmatprep.subr.bf16.mxu1 %v4522_v41  ;;  %v4606_v41 = vld [vmem:[%s5060_s24 + $0x764] ss:$8 sps:$4 sm:$0xff]  }
  0xa4   : > { %3296 = vmatpush1.bf16.msra.mxu0 %v4517_v42  ;;  %v783_v42 = vcombine.high %v779_v37, %v779_v37 }
  0xa5   : > { %3337 = vmatpush1.bf16.msra.mxu1 %v4520_v43  ;;  %3297 = vmatprep.subr.bf16.mxu0 %v4525_v45  ;;  %v4601_v43 = vld [vmem:[%s5060_s24 + $0x660] ss:$8 sps:$4 sm:$0xff]  }
  0xa6   : > { %3338 = vmatprep.subr.bf16.mxu1 %v4528_v46  ;;  %v4604_v45 = vld [vmem:[%s5060_s24 + $0x760] ss:$8 sps:$4 sm:$0xff]   ;;  %v4609_v46 = vld [vmem:[%s5060_s24 + $0x654] ss:$8 sps:$4 sm:$0xff]  }
  0xa8   : > { %3298 = vmatpush1.bf16.msra.mxu0 %v4523_v47  ;;  %v4612_v47 = vld [vmem:[%s5060_s24 + $0x754] ss:$8 sps:$4 sm:$0xff]  }
  0xa9   : > { %3339 = vmatpush1.bf16.msra.mxu1 %v4526_v48  ;;  %3299 = vmatprep.subr.bf16.mxu0 %v4531_v49  ;;  %v4607_v48 = vld [vmem:[%s5060_s24 + $0x650] ss:$8 sps:$4 sm:$0xff]  }
  0xaa   : > { %3340 = vmatprep.subr.bf16.mxu1 %v4534_v51  ;;  %v4610_v49 = vld [vmem:[%s5060_s24 + $0x750] ss:$8 sps:$4 sm:$0xff]   ;;  %v4615_v51 = vld [vmem:[%s5060_s24 + $0x644] ss:$8 sps:$4 sm:$0xff]  }
  0xac   : > { %3300 = vmatpush1.bf16.msra.mxu0 %v4529_v52  ;;  %v4618_v52 = vld [vmem:[%s5060_s24 + $0x744] ss:$8 sps:$4 sm:$0xff]  }
  0xad   : > { %3341 = vmatpush1.bf16.msra.mxu1 %v4532_v53  ;;  %3301 = vmatprep.subr.bf16.mxu0 %v4537_v54  ;;  %v4613_v53 = vld [vmem:[%s5060_s24 + $0x640] ss:$8 sps:$4 sm:$0xff]  }
  0xae   : > { %3342 = vmatprep.subr.bf16.mxu1 %v4540_v55  ;;  %v4616_v54 = vld [vmem:[%s5060_s24 + $0x740] ss:$8 sps:$4 sm:$0xff]   ;;  %v4621_v55 = vld [vmem:[%s5060_s24 + $0x634] ss:$8 sps:$4 sm:$0xff]  }
  0xb0   : > { %3302 = vmatpush1.bf16.msra.mxu0 %v4535_v56  ;;  %v4624_v56 = vld [vmem:[%s5060_s24 + $0x734] ss:$8 sps:$4 sm:$0xff]  }
  0xb1   : > { %3343 = vmatpush1.bf16.msra.mxu1 %v4538_v57  ;;  %3303 = vmatprep.subr.bf16.mxu0 %v4543_v58  ;;  %v4619_v57 = vld [vmem:[%s5060_s24 + $0x630] ss:$8 sps:$4 sm:$0xff]  }
  0xb2   : > { %3344 = vmatprep.subr.bf16.mxu1 %v4546_v59  ;;  %v4622_v58 = vld [vmem:[%s5060_s24 + $0x730] ss:$8 sps:$4 sm:$0xff]   ;;  %v4627_v59 = vld [vmem:[%s5060_s24 + $0x624] ss:$8 sps:$4 sm:$0xff]  }
  0xb4   : > { %3304 = vmatpush1.bf16.msra.mxu0 %v4541_v60  ;;  %v4630_v60 = vld [vmem:[%s5060_s24 + $0x724] ss:$8 sps:$4 sm:$0xff]  }
  0xb5   : > { %3345 = vmatpush1.bf16.msra.mxu1 %v4544_v61  ;;  %3305 = vmatprep.subr.bf16.mxu0 %v4549_v62  ;;  %v4625_v61 = vld [vmem:[%s5060_s24 + $0x620] ss:$8 sps:$4 sm:$0xff]  }
  0xb6   : > { %3346 = vmatprep.subr.bf16.mxu1 %v4552_v63  ;;  %v4628_v62 = vld [vmem:[%s5060_s24 + $0x720] ss:$8 sps:$4 sm:$0xff]   ;;  %v4633_v63 = vld [vmem:[%s5060_s24 + $0x614] ss:$8 sps:$4 sm:$0xff]  }
  0xb8   : > { %3306 = vmatpush2.bf16.msra.mxu0 %v4547_v0  ;;  %v4636_v0 = vld [vmem:[%s5060_s24 + $0x714] ss:$8 sps:$4 sm:$0xff]  }
  0xb9   : > { %3347 = vmatpush2.bf16.msra.mxu1 %v4550_v1  ;;  %3307 = vmatprep.subr.bf16.mxu0 %v4555_v2  ;;  %v4631_v1 = vld [vmem:[%s5060_s24 + $0x610] ss:$8 sps:$4 sm:$0xff]  }
  0xba   : > { %3348 = vmatprep.subr.bf16.mxu1 %v4558_v3  ;;  %v4634_v2 = vld [vmem:[%s5060_s24 + $0x710] ss:$8 sps:$4 sm:$0xff]   ;;  %v4639_v3 = vld [vmem:[%s5060_s24 + $0x604] ss:$8 sps:$4 sm:$0xff]  }
  0xbc   : > { %3308 = vmatpush2.bf16.msra.mxu0 %v4553_v4  ;;  %v4642_v4 = vld [vmem:[%s5060_s24 + $0x704] ss:$8 sps:$4 sm:$0xff]  }
  0xbd   : > { %3349 = vmatpush2.bf16.msra.mxu1 %v4556_v5  ;;  %3309 = vmatprep.subr.bf16.mxu0 %v4561_v6  ;;  %v4637_v5 = vld [vmem:[%s5060_s24 + $0x600] ss:$8 sps:$4 sm:$0xff]  }
  0xbe   : > { %3350 = vmatprep.subr.bf16.mxu1 %v4564_v8  ;;  %v4640_v6 = vld [vmem:[%s5060_s24 + $0x700] ss:$8 sps:$4 sm:$0xff]   ;;  %v4645_v8 = vld [vmem:[%s5060_s24 + $0x6f4] ss:$8 sps:$4 sm:$0xff]  }
  0xc0   : > { %3310 = vmatpush2.bf16.msra.mxu0 %v4559_v9  ;;  %v4648_v9 = vld [vmem:[%s5060_s24 + $0x7f4] ss:$8 sps:$4 sm:$0xff]  }
  0xc1   : > { %3351 = vmatpush2.bf16.msra.mxu1 %v4562_v10  ;;  %3311 = vmatprep.subr.bf16.mxu0 %v4567_v11  ;;  %v4643_v10 = vld [vmem:[%s5060_s24 + $0x6f0] ss:$8 sps:$4 sm:$0xff]  }
  0xc2   : > { %3352 = vmatprep.subr.bf16.mxu1 %v4570_v12  ;;  %v4646_v11 = vld [vmem:[%s5060_s24 + $0x7f0] ss:$8 sps:$4 sm:$0xff]   ;;  %v4651_v12 = vld [vmem:[%s5060_s24 + $0x6e4] ss:$8 sps:$4 sm:$0xff]  }
  0xc4   : > { %3312 = vmatpush2.bf16.msra.mxu0 %v4565_v13  ;;  %v4654_v13 = vld [vmem:[%s5060_s24 + $0x7e4] ss:$8 sps:$4 sm:$0xff]  }
  0xc5   : > { %3353 = vmatpush2.bf16.msra.mxu1 %v4568_v14  ;;  %3313 = vmatprep.subr.bf16.mxu0 %v4573_v15  ;;  %v4649_v14 = vld [vmem:[%s5060_s24 + $0x6e0] ss:$8 sps:$4 sm:$0xff]  }
  0xc6   : > { %3354 = vmatprep.subr.bf16.mxu1 %v4576_v16  ;;  %v4652_v15 = vld [vmem:[%s5060_s24 + $0x7e0] ss:$8 sps:$4 sm:$0xff]   ;;  %v4657_v16 = vld [vmem:[%s5060_s24 + $0x6d4] ss:$8 sps:$4 sm:$0xff]  }
  0xc8   : > { %3314 = vmatpush2.bf16.msra.mxu0 %v4571_v17  ;;  %v4660_v17 = vld [vmem:[%s5060_s24 + $0x7d4] ss:$8 sps:$4 sm:$0xff]  }
  0xc9   : > { %3355 = vmatpush2.bf16.msra.mxu1 %v4574_v18  ;;  %3315 = vmatprep.subr.bf16.mxu0 %v4579_v19  ;;  %v4655_v18 = vld [vmem:[%s5060_s24 + $0x6d0] ss:$8 sps:$4 sm:$0xff]  }
  0xca   : > { %3356 = vmatprep.subr.bf16.mxu1 %v4582_v20  ;;  %v4658_v19 = vld [vmem:[%s5060_s24 + $0x7d0] ss:$8 sps:$4 sm:$0xff]   ;;  %v4663_v20 = vld [vmem:[%s5060_s24 + $0x6c4] ss:$8 sps:$4 sm:$0xff]  }
  0xcc   : > { %3316 = vmatpush2.bf16.msra.mxu0 %v4577_v22  ;;  %v4661_v22 = vld [vmem:[%s5060_s24 + $0x6c0] ss:$8 sps:$4 sm:$0xff]  }
  0xcd   : > { %3357 = vmatpush2.bf16.msra.mxu1 %v4580_v23  ;;  %3317 = vmatprep.subr.bf16.mxu0 %v4585_v24  ;;  %v4664_v23 = vld [vmem:[%s5060_s24 + $0x7c0] ss:$8 sps:$4 sm:$0xff]   ;;  %v4669_v24 = vld [vmem:[%s5060_s24 + $0x6b4] ss:$8 sps:$4 sm:$0xff]  }
  0xce   : > { %3358 = vmatprep.subr.bf16.mxu1 %v4588_v25  ;;  %v4672_v25 = vld [vmem:[%s5060_s24 + $0x7b4] ss:$8 sps:$4 sm:$0xff]  }
  0xd0   : > { %3318 = vmatpush2.bf16.msra.mxu0 %v4583_v27  ;;  %v4667_v27 = vld [vmem:[%s5060_s24 + $0x6b0] ss:$8 sps:$4 sm:$0xff]  }
  0xd1   : > { %3359 = vmatpush2.bf16.msra.mxu1 %v4586_v28  ;;  %3319 = vmatprep.subr.bf16.mxu0 %v4591_v7  ;;  %v4670_v28 = vld [vmem:[%s5060_s24 + $0x7b0] ss:$8 sps:$4 sm:$0xff]   ;;  %v4675_v7 = vld [vmem:[%s5060_s24 + $0x6a4] ss:$8 sps:$4 sm:$0xff]  }
  0xd2   : > { %3360 = vmatprep.subr.bf16.mxu1 %v4594_v29  ;;  %v4678_v29 = vld [vmem:[%s5060_s24 + $0x7a4] ss:$8 sps:$4 sm:$0xff]  }
  0xd4   : > { %3320 = vmatpush2.bf16.msra.mxu0 %v4589_v33  ;;  %v4676_v33 = vld [vmem:[%s5060_s24 + $0x7a0] ss:$8 sps:$4 sm:$0xff]  }
  0xd5   : > { %3361 = vmatpush2.bf16.msra.mxu1 %v4592_v34  ;;  %3371 = vmatprep.subr.bf16.mxu0 %v4597_v35  ;;  %v4681_v34 = vld [vmem:[%s5060_s24 + $0x694] ss:$8 sps:$4 sm:$0xff]  }
  0xd6   : > { %3412 = vmatprep.subr.bf16.mxu1 %v4600_v36  ;;  %v4684_v35 = vld [vmem:[%s5060_s24 + $0x794] ss:$8 sps:$4 sm:$0xff]  }
  0xd7   : > { %3322 = vmatmul.mubr.bf16.vlgmr.msra.gmra.mxu0 %v758_v32  ;;  %v5348_v32 = vld [vmem:[%s5055_s20 + $0x10] sm:$0xff] }
  0xd8   : > { %3363 = vmatmul.mubr.bf16.vlgmr.msra.gmra.mxu1 %v780_v38  ;;  %3372 = vmatpush1.bf16.msra.mxu0 %v4595_v39  ;;  %v5355_v36 = vrot.slane %v5348_v32, %v5110_v50  ;;  %v4682_v38 = vld [vmem:[%s5060_s24 + $0x790] ss:$8 sps:$4 sm:$0xff]   ;;  %v4687_v39 = vld [vmem:[%s5060_s24 + $0x684] ss:$8 sps:$4 sm:$0xff]  }
  0xd9   : > { %3413 = vmatpush1.bf16.msra.mxu1 %v4598_v30  ;;  %3373 = vmatprep.subr.bf16.mxu0 %v4603_v40  ;;  %v4690_v30 = vld [vmem:[%s5060_s24 + $0x784] ss:$8 sps:$4 sm:$0xff]  }
  0xda   : > { %3414 = vmatprep.subr.bf16.mxu1 %v4606_v41  ;;  %3403 = vmatprep.mubr.bf16.mxu0 %v779_v37  ;;  %v4679_v37 = vld [vmem:[%s5060_s24 + $0x690] ss:$8 sps:$4 sm:$0xff]   ;;  %v799_v40 = vcombine.high %v5355_v36, %v5355_v36  ;;  %v4685_v41 = vld [vmem:[%s5060_s24 + $0x680] ss:$8 sps:$4 sm:$0xff]  }
  0xdb   : > { %3444 = vmatprep.mubr.bf16.mxu1 %v783_v42  ;;  %v765_v42 = vrot.slane %v5279_v26, %v5110_v50  ;;  %v4703_v26 = vld [vmem:[%s5060_s24 + $0x964] ss:$8 sps:$4 sm:$0xff]  }
  0xdc   : > { %3374 = vmatpush1.bf16.msra.mxu0 %v4601_v43  ;;  %v4688_v43 = vld [vmem:[%s5060_s24 + $0x780] ss:$8 sps:$4 sm:$0xff]  }
  0xdd   : > { %3415 = vmatpush1.bf16.msra.mxu1 %v4604_v45  ;;  %3375 = vmatprep.subr.bf16.mxu0 %v4609_v46  ;;  %v4694_v45 = vld [vmem:[%s5060_s24 + $0x874] ss:$8 sps:$4 sm:$0xff]  }
  0xde   : > { %3416 = vmatprep.subr.bf16.mxu1 %v4612_v47  ;;  %v4697_v46 = vld [vmem:[%s5060_s24 + $0x974] ss:$8 sps:$4 sm:$0xff]   ;;  %v821_v47 = vrot.slane %v799_v40, %v5110_v50  ;;  %v4755_v40 = vld [vmem:[%s5060_s24 + $0x9d0] ss:$8 sps:$4 sm:$0xff]  }
  0xe0   : > { %3376 = vmatpush1.bf16.msra.mxu0 %v4607_v48  ;;  %v781_v48 = vcombine.high %v765_v42, %v765_v42 }
  0xe1   : > { %3417 = vmatpush1.bf16.msra.mxu1 %v4610_v49  ;;  %3377 = vmatprep.subr.bf16.mxu0 %v4615_v51  ;;  %v4692_v49 = vld [vmem:[%s5060_s24 + $0x870] ss:$8 sps:$4 sm:$0xff]  }
  0xe2   : > { %3418 = vmatprep.subr.bf16.mxu1 %v4618_v52  ;;  %v4695_v51 = vld [vmem:[%s5060_s24 + $0x970] ss:$8 sps:$4 sm:$0xff]   ;;  %v4700_v52 = vld [vmem:[%s5060_s24 + $0x864] ss:$8 sps:$4 sm:$0xff]  }
  0xe4   : > { %3378 = vmatpush1.bf16.msra.mxu0 %v4613_v53  ;;  %v831_v53 = vcombine.high %v821_v47, %v821_v47 }
  0xe5   : > { %3419 = vmatpush1.bf16.msra.mxu1 %v4616_v54  ;;  %3379 = vmatprep.subr.bf16.mxu0 %v4621_v55 }
  0xe6   : > { %3420 = vmatprep.subr.bf16.mxu1 %v4624_v56  ;;  %v4698_v56 = vld [vmem:[%s5060_s24 + $0x860] ss:$8 sps:$4 sm:$0xff]  }
  0xe8   : > { %3380 = vmatpush1.bf16.msra.mxu0 %v4619_v57  ;;  %v4701_v57 = vld [vmem:[%s5060_s24 + $0x960] ss:$8 sps:$4 sm:$0xff]  }
  0xe9   : > { %3421 = vmatpush1.bf16.msra.mxu1 %v4622_v58  ;;  %3381 = vmatprep.subr.bf16.mxu0 %v4627_v59 }
  0xea   : > { %3422 = vmatprep.subr.bf16.mxu1 %v4630_v60 }
  0xec   : > { %3382 = vmatpush1.bf16.msra.mxu0 %v4625_v61  ;;  %v4706_v61 = vld [vmem:[%s5060_s24 + $0x854] ss:$8 sps:$4 sm:$0xff]  }
  0xed   : > { %3423 = vmatpush1.bf16.msra.mxu1 %v4628_v62  ;;  %3383 = vmatprep.subr.bf16.mxu0 %v4633_v63  ;;  %v4709_v62 = vld [vmem:[%s5060_s24 + $0x954] ss:$8 sps:$4 sm:$0xff]  }
  0xee   : > { %3424 = vmatprep.subr.bf16.mxu1 %v4636_v0  ;;  %v4704_v0 = vld [vmem:[%s5060_s24 + $0x850] ss:$8 sps:$4 sm:$0xff]  }
  0xf0   : > { %3384 = vmatpush1.bf16.msra.mxu0 %v4631_v1  ;;  %v4707_v1 = vld [vmem:[%s5060_s24 + $0x950] ss:$8 sps:$4 sm:$0xff]  }
  0xf1   : > { %3425 = vmatpush1.bf16.msra.mxu1 %v4634_v2  ;;  %3385 = vmatprep.subr.bf16.mxu0 %v4639_v3 }
  0xf2   : > { %3426 = vmatprep.subr.bf16.mxu1 %v4642_v4 }
  0xf4   : > { %3386 = vmatpush1.bf16.msra.mxu0 %v4637_v5 }
  0xf5   : > { %3427 = vmatpush1.bf16.msra.mxu1 %v4640_v6  ;;  %3387 = vmatprep.subr.bf16.mxu0 %v4645_v8  ;;  %v4712_v6 = vld [vmem:[%s5060_s24 + $0x844] ss:$8 sps:$4 sm:$0xff]  }
  0xf6   : > { %3428 = vmatprep.subr.bf16.mxu1 %v4648_v9  ;;  %v4715_v8 = vld [vmem:[%s5060_s24 + $0x944] ss:$8 sps:$4 sm:$0xff]   ;;  %v4710_v9 = vld [vmem:[%s5060_s24 + $0x840] ss:$8 sps:$4 sm:$0xff]  }
  0xf8   : > { %3388 = vmatpush2.bf16.msra.mxu0 %v4643_v10  ;;  %v4713_v10 = vld [vmem:[%s5060_s24 + $0x940] ss:$8 sps:$4 sm:$0xff]  }
  0xf9   : > { %3429 = vmatpush2.bf16.msra.mxu1 %v4646_v11  ;;  %3389 = vmatprep.subr.bf16.mxu0 %v4651_v12  ;;  %v4718_v11 = vld [vmem:[%s5060_s24 + $0x834] ss:$8 sps:$4 sm:$0xff]  }
  0xfa   : > { %3430 = vmatprep.subr.bf16.mxu1 %v4654_v13  ;;  %v4721_v12 = vld [vmem:[%s5060_s24 + $0x934] ss:$8 sps:$4 sm:$0xff]   ;;  %v4716_v13 = vld [vmem:[%s5060_s24 + $0x830] ss:$8 sps:$4 sm:$0xff]  }
  0xfc   : > { %3390 = vmatpush2.bf16.msra.mxu0 %v4649_v14  ;;  %v4719_v14 = vld [vmem:[%s5060_s24 + $0x930] ss:$8 sps:$4 sm:$0xff]  }
  0xfd   : > { %3431 = vmatpush2.bf16.msra.mxu1 %v4652_v15  ;;  %3391 = vmatprep.subr.bf16.mxu0 %v4657_v16  ;;  %v4724_v15 = vld [vmem:[%s5060_s24 + $0x824] ss:$8 sps:$4 sm:$0xff]  }
  0xfe   : > { %3432 = vmatprep.subr.bf16.mxu1 %v4660_v17  ;;  %v4727_v16 = vld [vmem:[%s5060_s24 + $0x924] ss:$8 sps:$4 sm:$0xff]   ;;  %v4722_v17 = vld [vmem:[%s5060_s24 + $0x820] ss:$8 sps:$4 sm:$0xff]  }
 0x100   : > { %3392 = vmatpush2.bf16.msra.mxu0 %v4655_v18  ;;  %v4725_v18 = vld [vmem:[%s5060_s24 + $0x920] ss:$8 sps:$4 sm:$0xff]  }
 0x101   : > { %3433 = vmatpush2.bf16.msra.mxu1 %v4658_v19  ;;  %3393 = vmatprep.subr.bf16.mxu0 %v4663_v20  ;;  %v4730_v19 = vld [vmem:[%s5060_s24 + $0x814] ss:$8 sps:$4 sm:$0xff]  }
 0x102   : > { %3434 = vmatprep.subr.bf16.mxu1 %v4666_v21  ;;  %v4733_v20 = vld [vmem:[%s5060_s24 + $0x914] ss:$8 sps:$4 sm:$0xff]   ;;  %v4728_v21 = vld [vmem:[%s5060_s24 + $0x810] ss:$8 sps:$4 sm:$0xff]  }
 0x104   : > { %3394 = vmatpush2.bf16.msra.mxu0 %v4661_v22  ;;  %v4731_v22 = vld [vmem:[%s5060_s24 + $0x910] ss:$8 sps:$4 sm:$0xff]  }
 0x105   : > { %3435 = vmatpush2.bf16.msra.mxu1 %v4664_v23  ;;  %3395 = vmatprep.subr.bf16.mxu0 %v4669_v24  ;;  %v4736_v23 = vld [vmem:[%s5060_s24 + $0x804] ss:$8 sps:$4 sm:$0xff]  }
 0x106   : > { %3436 = vmatprep.subr.bf16.mxu1 %v4672_v25  ;;  %v4739_v24 = vld [vmem:[%s5060_s24 + $0x904] ss:$8 sps:$4 sm:$0xff]   ;;  %v4734_v25 = vld [vmem:[%s5060_s24 + $0x800] ss:$8 sps:$4 sm:$0xff]  }
 0x108   : > { %3396 = vmatpush2.bf16.msra.mxu0 %v4667_v27  ;;  %v4737_v27 = vld [vmem:[%s5060_s24 + $0x900] ss:$8 sps:$4 sm:$0xff]  }
 0x109   : > { %3437 = vmatpush2.bf16.msra.mxu1 %v4670_v28  ;;  %3397 = vmatprep.subr.bf16.mxu0 %v4675_v7  ;;  %v4742_v28 = vld [vmem:[%s5060_s24 + $0x8f4] ss:$8 sps:$4 sm:$0xff]  }
 0x10a   : > { %3438 = vmatprep.subr.bf16.mxu1 %v4678_v29  ;;  %v4745_v7 = vld [vmem:[%s5060_s24 + $0x9f4] ss:$8 sps:$4 sm:$0xff]   ;;  %v4740_v29 = vld [vmem:[%s5060_s24 + $0x8f0] ss:$8 sps:$4 sm:$0xff]  }
 0x10c   : > { %3398 = vmatpush2.bf16.msra.mxu0 %v4673_v31  ;;  %v4743_v31 = vld [vmem:[%s5060_s24 + $0x9f0] ss:$8 sps:$4 sm:$0xff]  }
 0x10d   : > { %3439 = vmatpush2.bf16.msra.mxu1 %v4676_v33  ;;  %3399 = vmatprep.subr.bf16.mxu0 %v4681_v34  ;;  %v4748_v33 = vld [vmem:[%s5060_s24 + $0x8e4] ss:$8 sps:$4 sm:$0xff]  }
 0x10e   : > { %3440 = vmatprep.subr.bf16.mxu1 %v4684_v35  ;;  %v4751_v34 = vld [vmem:[%s5060_s24 + $0x9e4] ss:$8 sps:$4 sm:$0xff]   ;;  %v4746_v35 = vld [vmem:[%s5060_s24 + $0x8e0] ss:$8 sps:$4 sm:$0xff]  }
 0x110   : > { %3400 = vmatpush2.bf16.msra.mxu0 %v4679_v37  ;;  %v4749_v37 = vld [vmem:[%s5060_s24 + $0x9e0] ss:$8 sps:$4 sm:$0xff]  }
 0x111   : > { %3441 = vmatpush2.bf16.msra.mxu1 %v4682_v38  ;;  %3401 = vmatprep.subr.bf16.mxu0 %v4687_v39  ;;  %v4754_v38 = vld [vmem:[%s5060_s24 + $0x8d4] ss:$8 sps:$4 sm:$0xff]  }
 0x112   : > { %3442 = vmatprep.subr.bf16.mxu1 %v4690_v30  ;;  %v4757_v39 = vld [vmem:[%s5060_s24 + $0x9d4] ss:$8 sps:$4 sm:$0xff]   ;;  %v4752_v30 = vld [vmem:[%s5060_s24 + $0x8d0] ss:$8 sps:$4 sm:$0xff]  }
 0x114   : > { %3402 = vmatpush2.bf16.msra.mxu0 %v4685_v41  ;;  %v4760_v41 = vld [vmem:[%s5060_s24 + $0x8c4] ss:$8 sps:$4 sm:$0xff]  }
 0x115   : > { %3443 = vmatpush2.bf16.msra.mxu1 %v4688_v43  ;;  %3453 = vmatprep.subr.bf16.mxu0 %v4694_v45  ;;  %v4758_v43 = vld [vmem:[%s5060_s24 + $0x8c0] ss:$8 sps:$4 sm:$0xff]  }
 0x116   : > { %3494 = vmatprep.subr.bf16.mxu1 %v4697_v46  ;;  %v4761_v45 = vld [vmem:[%s5060_s24 + $0x9c0] ss:$8 sps:$4 sm:$0xff]   ;;  %v4766_v46 = vld [vmem:[%s5060_s24 + $0x8b4] ss:$8 sps:$4 sm:$0xff]  }
 0x117   : > { %v3159_v54 = vpop.f32.mrf.mxu0  ;;  %3404 = vmatmul.mubr.bf16.vlgmr.msra.gmra.mxu0 %v765_v42  ;;  %v4763_v42 = vld [vmem:[%s5060_s24 + $0x9c4] ss:$8 sps:$4 sm:$0xff]  }
 0x118   : > { %v3200_v55 = vpop.f32.mrf.mxu1  ;;  %3445 = vmatmul.mubr.bf16.vlgmr.msra.gmra.mxu1 %v781_v48  ;;  %3454 = vmatpush1.bf16.msra.mxu0 %v4692_v49  ;;  %v4764_v48 = vld [vmem:[%s5060_s24 + $0x8b0] ss:$8 sps:$4 sm:$0xff]  }
 0x119   : > { %v5376_v58 = vadd.f32 %v3200_v55, %v3159_v54  ;;  %3495 = vmatpush1.bf16.msra.mxu1 %v4695_v51  ;;  %v3161_v59 = vpop.f32.mrf.mxu0  ;;  %3455 = vmatprep.subr.bf16.mxu0 %v4700_v52  ;;  %v4767_v49 = vld [vmem:[%s5060_s24 + $0x9b0] ss:$8 sps:$4 sm:$0xff]   ;;  %v4772_v51 = vld [vmem:[%s5060_s24 + $0x8a4] ss:$8 sps:$4 sm:$0xff]   ;;  %v4773_v54 = vld [vmem:[%s5060_s24 + $0x9a0] ss:$8 sps:$4 sm:$0xff]  }
 0x11a   : > { %v3202_v60 = vpop.f32.mrf.mxu1  ;;  %3496 = vmatprep.subr.bf16.mxu1 %v4703_v26  ;;  %3485 = vmatprep.mubr.bf16.mxu0 %v821_v47  ;;  %v4769_v47 = vld [vmem:[%s5060_s24 + $0x9b4] ss:$8 sps:$4 sm:$0xff]   ;;  %v4775_v52 = vld [vmem:[%s5060_s24 + $0x9a4] ss:$8 sps:$4 sm:$0xff]   ;;  %v784_v26 = vcombine.high %v5348_v32, %v5348_v32  ;;  %v4776_v32 = vld [vmem:[%s5060_s24 + $0x890] ss:$8 sps:$4 sm:$0xff]  }
 0x11b   : > { %v5380_v63 = vadd.f32 %v3202_v60, %v3161_v59  ;;  %3526 = vmatprep.mubr.bf16.mxu1 %v831_v53  ;;  %v3163_v2 = vpop.f32.mrf.mxu0  ;;  %v4770_v53 = vld [vmem:[%s5060_s24 + $0x8a0] ss:$8 sps:$4 sm:$0xff]   ;;  %v4778_v55 = vld [vmem:[%s5060_s24 + $0x894] ss:$8 sps:$4 sm:$0xff]   ;;  %v4779_v59 = vld [vmem:[%s5060_s24 + $0x990] ss:$8 sps:$4 sm:$0xff]  }
 0x11c   : > { %v3204_v3 = vpop.f32.mrf.mxu1  ;;  %3456 = vmatpush1.bf16.msra.mxu0 %v4698_v56  ;;  %v4781_v56 = vld [vmem:[%s5060_s24 + $0x994] ss:$8 sps:$4 sm:$0xff]   ;;  %v4784_v60 = vld [vmem:[%s5060_s24 + $0x884] ss:$8 sps:$4 sm:$0xff]   ;;  %v4785_v2 = vld [vmem:[%s5060_s24 + $0x980] ss:$8 sps:$4 sm:$0xff]  }
 0x11d   : > { %3497 = vmatpush1.bf16.msra.mxu1 %v4701_v57  ;;  %v3164_v4 = vpop.f32.mrf.mxu0  ;;  %3457 = vmatprep.subr.bf16.mxu0 %v4706_v61  ;;  %v5433_v57 = vrot.slane %v784_v26, %v5110_v50  ;;  %v4787_v61 = vld [vmem:[%s5060_s24 + $0x984] ss:$8 sps:$4 sm:$0xff]   ;;  %v4790_v3 = vld [vmem:[%s5060_s24 + $0xa74] ss:$8 sps:$4 sm:$0xff]  }
 0x11e   : > { %v3205_v5 = vpop.f32.mrf.mxu1  ;;  %3498 = vmatprep.subr.bf16.mxu1 %v4709_v62  ;;  %v4793_v4 = vld [vmem:[%s5060_s24 + $0xb74] ss:$8 sps:$4 sm:$0xff]  }
 0x11f   : > { %v800_v62 = vcombine.high %v5433_v57, %v5433_v57  ;;  %v4841_v26 = vld [vmem:[%s5060_s24 + $0xbf4] ss:$8 sps:$4 sm:$0xff]  }
 0x120   : > { %3458 = vmatpush1.bf16.msra.mxu0 %v4704_v0  ;;  %v807_v0 = vrot.slane %v5355_v36, %v5110_v50  ;;  %v4796_v36 = vld [vmem:[%s5060_s24 + $0xa64] ss:$8 sps:$4 sm:$0xff]  }
 0x121   : > { %3499 = vmatpush1.bf16.msra.mxu1 %v4707_v1  ;;  %3459 = vmatprep.subr.bf16.mxu0 %v4712_v6  ;;  %v4782_v1 = vld [vmem:[%s5060_s24 + $0x880] ss:$8 sps:$4 sm:$0xff]   ;;  %v828_v5 = vrot.slane %v800_v62, %v5110_v50  ;;  %v4848_v62 = vld [vmem:[%s5060_s24 + $0xad0] ss:$8 sps:$4 sm:$0xff]  }
 0x122   : > { %3500 = vmatprep.subr.bf16.mxu1 %v4715_v8  ;;  %v829_v6 = vcombine.high %v807_v0, %v807_v0  ;;  %v4788_v8 = vld [vmem:[%s5060_s24 + $0xa70] ss:$8 sps:$4 sm:$0xff]  }
 0x124   : > { %3460 = vmatpush1.bf16.msra.mxu0 %v4710_v9  ;;  %v4791_v9 = vld [vmem:[%s5060_s24 + $0xb70] ss:$8 sps:$4 sm:$0xff]  }
 0x125   : > { %3501 = vmatpush1.bf16.msra.mxu1 %v4713_v10  ;;  %3461 = vmatprep.subr.bf16.mxu0 %v4718_v11  ;;  %v4799_v10 = vld [vmem:[%s5060_s24 + $0xb64] ss:$8 sps:$4 sm:$0xff]   ;;  %v832_v11 = vcombine.high %v828_v5, %v828_v5 }
 0x126   : > { %3502 = vmatprep.subr.bf16.mxu1 %v4721_v12 }
 0x128   : > { %3462 = vmatpush1.bf16.msra.mxu0 %v4716_v13 }
 0x129   : > { %3503 = vmatpush1.bf16.msra.mxu1 %v4719_v14  ;;  %3463 = vmatprep.subr.bf16.mxu0 %v4724_v15  ;;  %v4794_v15 = vld [vmem:[%s5060_s24 + $0xa60] ss:$8 sps:$4 sm:$0xff]  }
 0x12a   : > { %3504 = vmatprep.subr.bf16.mxu1 %v4727_v16  ;;  %v4797_v16 = vld [vmem:[%s5060_s24 + $0xb60] ss:$8 sps:$4 sm:$0xff]  }
 0x12c   : > { %3464 = vmatpush1.bf16.msra.mxu0 %v4722_v17 }
 0x12d   : > { %3505 = vmatpush1.bf16.msra.mxu1 %v4725_v18  ;;  %3465 = vmatprep.subr.bf16.mxu0 %v4730_v19  ;;  %v4802_v19 = vld [vmem:[%s5060_s24 + $0xa54] ss:$8 sps:$4 sm:$0xff]  }
 0x12e   : > { %3506 = vmatprep.subr.bf16.mxu1 %v4733_v20  ;;  %v4805_v20 = vld [vmem:[%s5060_s24 + $0xb54] ss:$8 sps:$4 sm:$0xff]  }
 0x130   : > { %3466 = vmatpush1.bf16.msra.mxu0 %v4728_v21 }
 0x131   : > { %3507 = vmatpush1.bf16.msra.mxu1 %v4731_v22  ;;  %3467 = vmatprep.subr.bf16.mxu0 %v4736_v23 }
 0x132   : > { %3508 = vmatprep.subr.bf16.mxu1 %v4739_v24 }
 0x134   : > { %3468 = vmatpush1.bf16.msra.mxu0 %v4734_v25  ;;  %v4800_v25 = vld [vmem:[%s5060_s24 + $0xa50] ss:$8 sps:$4 sm:$0xff]  }
 0x135   : > { %3509 = vmatpush1.bf16.msra.mxu1 %v4737_v27  ;;  %3469 = vmatprep.subr.bf16.mxu0 %v4742_v28  ;;  %v4803_v27 = vld [vmem:[%s5060_s24 + $0xb50] ss:$8 sps:$4 sm:$0xff]  }
 0x136   : > { %3510 = vmatprep.subr.bf16.mxu1 %v4745_v7 }
 0x138   : > { %3470 = vmatpush2.bf16.msra.mxu0 %v4740_v29  ;;  %v4811_v29 = vld [vmem:[%s5060_s24 + $0xb44] ss:$8 sps:$4 sm:$0xff]  }
 0x139   : > { %3511 = vmatpush2.bf16.msra.mxu1 %v4743_v31  ;;  %3471 = vmatprep.subr.bf16.mxu0 %v4748_v33  ;;  %v4806_v31 = vld [vmem:[%s5060_s24 + $0xa40] ss:$8 sps:$4 sm:$0xff]  }
 0x13a   : > { %3512 = vmatprep.subr.bf16.mxu1 %v4751_v34  ;;  %v4809_v33 = vld [vmem:[%s5060_s24 + $0xb40] ss:$8 sps:$4 sm:$0xff]   ;;  %v4814_v34 = vld [vmem:[%s5060_s24 + $0xa34] ss:$8 sps:$4 sm:$0xff]  }
 0x13c   : > { %3472 = vmatpush2.bf16.msra.mxu0 %v4746_v35  ;;  %v4817_v35 = vld [vmem:[%s5060_s24 + $0xb34] ss:$8 sps:$4 sm:$0xff]  }
 0x13d   : > { %3513 = vmatpush2.bf16.msra.mxu1 %v4749_v37  ;;  %3473 = vmatprep.subr.bf16.mxu0 %v4754_v38  ;;  %v4812_v37 = vld [vmem:[%s5060_s24 + $0xa30] ss:$8 sps:$4 sm:$0xff]  }
 0x13e   : > { %3514 = vmatprep.subr.bf16.mxu1 %v4757_v39  ;;  %v4815_v38 = vld [vmem:[%s5060_s24 + $0xb30] ss:$8 sps:$4 sm:$0xff]   ;;  %v4820_v39 = vld [vmem:[%s5060_s24 + $0xa24] ss:$8 sps:$4 sm:$0xff]  }
 0x140   : > { %3474 = vmatpush2.bf16.msra.mxu0 %v4752_v30  ;;  %v4823_v30 = vld [vmem:[%s5060_s24 + $0xb24] ss:$8 sps:$4 sm:$0xff]  }
 0x141   : > { %3515 = vmatpush2.bf16.msra.mxu1 %v4755_v40  ;;  %3475 = vmatprep.subr.bf16.mxu0 %v4760_v41  ;;  %v4818_v40 = vld [vmem:[%s5060_s24 + $0xa20] ss:$8 sps:$4 sm:$0xff]  }
 0x142   : > { %3516 = vmatprep.subr.bf16.mxu1 %v4763_v42  ;;  %v4821_v41 = vld [vmem:[%s5060_s24 + $0xb20] ss:$8 sps:$4 sm:$0xff]   ;;  %v4826_v42 = vld [vmem:[%s5060_s24 + $0xa14] ss:$8 sps:$4 sm:$0xff]  }
 0x144   : > { %3476 = vmatpush2.bf16.msra.mxu0 %v4758_v43  ;;  %v4829_v43 = vld [vmem:[%s5060_s24 + $0xb14] ss:$8 sps:$4 sm:$0xff]  }
 0x145   : > { %3517 = vmatpush2.bf16.msra.mxu1 %v4761_v45  ;;  %3477 = vmatprep.subr.bf16.mxu0 %v4766_v46  ;;  %v4824_v45 = vld [vmem:[%s5060_s24 + $0xa10] ss:$8 sps:$4 sm:$0xff]  }
 0x146   : > { %3518 = vmatprep.subr.bf16.mxu1 %v4769_v47  ;;  %v4827_v46 = vld [vmem:[%s5060_s24 + $0xb10] ss:$8 sps:$4 sm:$0xff]   ;;  %v4832_v47 = vld [vmem:[%s5060_s24 + $0xa04] ss:$8 sps:$4 sm:$0xff]  }
 0x148   : > { %3478 = vmatpush2.bf16.msra.mxu0 %v4764_v48  ;;  %v4835_v48 = vld [vmem:[%s5060_s24 + $0xb04] ss:$8 sps:$4 sm:$0xff]  }
 0x149   : > { %3519 = vmatpush2.bf16.msra.mxu1 %v4767_v49  ;;  %3479 = vmatprep.subr.bf16.mxu0 %v4772_v51  ;;  %v4830_v49 = vld [vmem:[%s5060_s24 + $0xa00] ss:$8 sps:$4 sm:$0xff]  }
 0x14a   : > { %3520 = vmatprep.subr.bf16.mxu1 %v4775_v52  ;;  %v4833_v51 = vld [vmem:[%s5060_s24 + $0xb00] ss:$8 sps:$4 sm:$0xff]   ;;  %v4838_v52 = vld [vmem:[%s5060_s24 + $0xaf4] ss:$8 sps:$4 sm:$0xff]  }
 0x14c   : > { %3480 = vmatpush2.bf16.msra.mxu0 %v4770_v53  ;;  %v4836_v53 = vld [vmem:[%s5060_s24 + $0xaf0] ss:$8 sps:$4 sm:$0xff]  }
 0x14d   : > { %3521 = vmatpush2.bf16.msra.mxu1 %v4773_v54  ;;  %3481 = vmatprep.subr.bf16.mxu0 %v4778_v55  ;;  %v4839_v54 = vld [vmem:[%s5060_s24 + $0xbf0] ss:$8 sps:$4 sm:$0xff]   ;;  %v4844_v55 = vld [vmem:[%s5060_s24 + $0xae4] ss:$8 sps:$4 sm:$0xff]  }
 0x14e   : > { %3522 = vmatprep.subr.bf16.mxu1 %v4781_v56  ;;  %v4847_v56 = vld [vmem:[%s5060_s24 + $0xbe4] ss:$8 sps:$4 sm:$0xff]  }
 0x150   : > { %3482 = vmatpush2.bf16.msra.mxu0 %v4776_v32  ;;  %v4842_v32 = vld [vmem:[%s5060_s24 + $0xae0] ss:$8 sps:$4 sm:$0xff]  }
 0x151   : > { %3523 = vmatpush2.bf16.msra.mxu1 %v4779_v59  ;;  %3483 = vmatprep.subr.bf16.mxu0 %v4784_v60  ;;  %v4845_v59 = vld [vmem:[%s5060_s24 + $0xbe0] ss:$8 sps:$4 sm:$0xff]   ;;  %v4850_v60 = vld [vmem:[%s5060_s24 + $0xad4] ss:$8 sps:$4 sm:$0xff]  }
 0x152   : > { %3524 = vmatprep.subr.bf16.mxu1 %v4787_v61  ;;  %v4853_v61 = vld [vmem:[%s5060_s24 + $0xbd4] ss:$8 sps:$4 sm:$0xff]  }
 0x154   : > { %3484 = vmatpush2.bf16.msra.mxu0 %v4782_v1  ;;  %v4856_v1 = vld [vmem:[%s5060_s24 + $0xac4] ss:$8 sps:$4 sm:$0xff]  }
 0x155   : > { %3525 = vmatpush2.bf16.msra.mxu1 %v4785_v2  ;;  %3535 = vmatprep.subr.bf16.mxu0 %v4790_v3  ;;  %v4859_v2 = vld [vmem:[%s5060_s24 + $0xbc4] ss:$8 sps:$4 sm:$0xff]   ;;  %v4854_v3 = vld [vmem:[%s5060_s24 + $0xac0] ss:$8 sps:$4 sm:$0xff]  }
 0x156   : > { %3576 = vmatprep.subr.bf16.mxu1 %v4793_v4  ;;  %v4857_v4 = vld [vmem:[%s5060_s24 + $0xbc0] ss:$8 sps:$4 sm:$0xff]  }
 0x157   : > { %v3241_v12 = vpop.f32.mrf.mxu0  ;;  %3486 = vmatmul.mubr.bf16.vlgmr.msra.gmra.mxu0 %v807_v0  ;;  %v4851_v0 = vld [vmem:[%s5060_s24 + $0xbd0] ss:$8 sps:$4 sm:$0xff]  }
 0x158   : > { %v3282_v13 = vpop.f32.mrf.mxu1  ;;  %3527 = vmatmul.mubr.bf16.vlgmr.msra.gmra.mxu1 %v829_v6  ;;  %v3242_v14 = vadd.f32 %v3241_v12, %v5376_v58  ;;  %3536 = vmatpush1.bf16.msra.mxu0 %v4788_v8  ;;  %v4865_v6 = vld [vmem:[%s5060_s24 + $0xbb4] ss:$8 sps:$4 sm:$0xff]   ;;  %v4860_v8 = vld [vmem:[%s5060_s24 + $0xab0] ss:$8 sps:$4 sm:$0xff]   ;;  %v4869_v12 = vld [vmem:[%s5060_s24 + $0xba0] ss:$8 sps:$4 sm:$0xff]  }
 0x159   : > { %3577 = vmatpush1.bf16.msra.mxu1 %v4791_v9  ;;  %v3243_v17 = vpop.f32.mrf.mxu0  ;;  %3537 = vmatprep.subr.bf16.mxu0 %v4796_v36  ;;  %v4863_v9 = vld [vmem:[%s5060_s24 + $0xbb0] ss:$8 sps:$4 sm:$0xff]   ;;  %v4868_v36 = vld [vmem:[%s5060_s24 + $0xaa4] ss:$8 sps:$4 sm:$0xff]  }
 0x15a   : > { %v3284_v18 = vpop.f32.mrf.mxu1  ;;  %3578 = vmatprep.subr.bf16.mxu1 %v4799_v10  ;;  %v5457_v21 = vadd.f32 %v3282_v13, %v3242_v14  ;;  %v3244_v22 = vadd.f32 %v3243_v17, %v5380_v63  ;;  %3567 = vmatprep.mubr.bf16.mxu0 %v828_v5  ;;  %v4808_v63 = vld [vmem:[%s5060_s24 + $0xa44] ss:$8 sps:$4 sm:$0xff]   ;;  %v4862_v5 = vld [vmem:[%s5060_s24 + $0xab4] ss:$8 sps:$4 sm:$0xff]   ;;  %v4875_v17 = vld [vmem:[%s5060_s24 + $0xb90] ss:$8 sps:$4 sm:$0xff]  }
 0x15b   : > { %3608 = vmatprep.mubr.bf16.mxu1 %v832_v11  ;;  %v3245_v58 = vpop.f32.mrf.mxu0  ;;  %v4871_v10 = vld [vmem:[%s5060_s24 + $0xba4] ss:$8 sps:$4 sm:$0xff]   ;;  %v4866_v11 = vld [vmem:[%s5060_s24 + $0xaa0] ss:$8 sps:$4 sm:$0xff]   ;;  %v4874_v13 = vld [vmem:[%s5060_s24 + $0xa94] ss:$8 sps:$4 sm:$0xff]  }
 0x15c   : > { %v3286_v23 = vpop.f32.mrf.mxu1  ;;  %v5460_v24 = vadd.f32 %v3284_v18, %v3244_v22  ;;  %3538 = vmatpush1.bf16.msra.mxu0 %v4794_v15  ;;  %v4877_v14 = vld [vmem:[%s5060_s24 + $0xb94] ss:$8 sps:$4 sm:$0xff]   ;;  %v5511_v15 = vld.sshfl [vmem:[%s5055_s20 + $0x18] sm:$0x33 pattern:$0x75316420]  ;;  %v814_v22 = vrot.slane %v5433_v57, %v5110_v50 }
 0x15d   : > { %3579 = vmatpush1.bf16.msra.mxu1 %v4797_v16  ;;  %v3246_v28 = vpop.f32.mrf.mxu0  ;;  %3539 = vmatprep.subr.bf16.mxu0 %v4802_v19  ;;  %v4872_v16 = vld [vmem:[%s5060_s24 + $0xa90] ss:$8 sps:$4 sm:$0xff]   ;;  %v4880_v18 = vld [vmem:[%s5060_s24 + $0xa84] ss:$8 sps:$4 sm:$0xff]   ;;  %v4878_v58 = vld [vmem:[%s5060_s24 + $0xa80] ss:$8 sps:$4 sm:$0xff]  }
 0x15e   : > { %v3287_v7 = vpop.f32.mrf.mxu1  ;;  %3580 = vmatprep.subr.bf16.mxu1 %v4805_v20  ;;  %v4883_v19 = vld [vmem:[%s5060_s24 + $0xb84] ss:$8 sps:$4 sm:$0xff]   ;;  %v840_v20 = vcombine.high %v5511_v15, %v5511_v15  ;;  %v4881_v23 = vld [vmem:[%s5060_s24 + $0xb80] ss:$8 sps:$4 sm:$0xff]  }
 0x15f   : > { %v830_v7 = vcombine.high %v814_v22, %v814_v22  ;;  %v4893_v57 = vld [vmem:[%s5060_s24 + $0xc64] ss:$8 sps:$4 sm:$0xff]  }
 0x160   : > { %3540 = vmatpush1.bf16.msra.mxu0 %v4800_v25  ;;  %v4887_v25 = vld [vmem:[%s5060_s24 + $0xc74] ss:$8 sps:$4 sm:$0xff]   ;;  %v854_v28 = vrot.slane %v840_v20, %v5110_v50  ;;  %v4945_v20 = vld [vmem:[%s5060_s24 + $0xcd0] ss:$8 sps:$4 sm:$0xff]  }
 0x161   : > { %3581 = vmatpush1.bf16.msra.mxu1 %v4803_v27  ;;  %3541 = vmatprep.subr.bf16.mxu0 %v4808_v63  ;;  %v4890_v27 = vld [vmem:[%s5060_s24 + $0xd74] ss:$8 sps:$4 sm:$0xff]   ;;  %v4885_v63 = vld [vmem:[%s5060_s24 + $0xc70] ss:$8 sps:$4 sm:$0xff]  }
 0x162   : > { %3582 = vmatprep.subr.bf16.mxu1 %v4811_v29  ;;  %v4888_v29 = vld [vmem:[%s5060_s24 + $0xd70] ss:$8 sps:$4 sm:$0xff]  }
 0x164   : > { %3542 = vmatpush1.bf16.msra.mxu0 %v4806_v31  ;;  %v4896_v31 = vld [vmem:[%s5060_s24 + $0xd64] ss:$8 sps:$4 sm:$0xff]  }
 0x165   : > { %3583 = vmatpush1.bf16.msra.mxu1 %v4809_v33  ;;  %3543 = vmatprep.subr.bf16.mxu0 %v4814_v34  ;;  %v856_v33 = vcombine.high %v854_v28, %v854_v28 }
 0x166   : > { %3584 = vmatprep.subr.bf16.mxu1 %v4817_v35 }
 0x168   : > { %3544 = vmatpush1.bf16.msra.mxu0 %v4812_v37 }
 0x169   : > { %3585 = vmatpush1.bf16.msra.mxu1 %v4815_v38  ;;  %3545 = vmatprep.subr.bf16.mxu0 %v4820_v39  ;;  %v4891_v38 = vld [vmem:[%s5060_s24 + $0xc60] ss:$8 sps:$4 sm:$0xff]  }
 0x16a   : > { %3586 = vmatprep.subr.bf16.mxu1 %v4823_v30  ;;  %v4894_v39 = vld [vmem:[%s5060_s24 + $0xd60] ss:$8 sps:$4 sm:$0xff]  }
 0x16c   : > { %3546 = vmatpush1.bf16.msra.mxu0 %v4818_v40 }
 0x16d   : > { %3587 = vmatpush1.bf16.msra.mxu1 %v4821_v41  ;;  %3547 = vmatprep.subr.bf16.mxu0 %v4826_v42  ;;  %v4899_v41 = vld [vmem:[%s5060_s24 + $0xc54] ss:$8 sps:$4 sm:$0xff]  }
 0x16e   : > { %3588 = vmatprep.subr.bf16.mxu1 %v4829_v43  ;;  %v4902_v42 = vld [vmem:[%s5060_s24 + $0xd54] ss:$8 sps:$4 sm:$0xff]  }
 0x170   : > { %3548 = vmatpush1.bf16.msra.mxu0 %v4824_v45 }
 0x171   : > { %3589 = vmatpush1.bf16.msra.mxu1 %v4827_v46  ;;  %3549 = vmatprep.subr.bf16.mxu0 %v4832_v47 }
 0x172   : > { %3590 = vmatprep.subr.bf16.mxu1 %v4835_v48  ;;  %v4897_v48 = vld [vmem:[%s5060_s24 + $0xc50] ss:$8 sps:$4 sm:$0xff]  }
 0x174   : > { %3550 = vmatpush1.bf16.msra.mxu0 %v4830_v49  ;;  %v4900_v49 = vld [vmem:[%s5060_s24 + $0xd50] ss:$8 sps:$4 sm:$0xff]  }
 0x175   : > { %3591 = vmatpush1.bf16.msra.mxu1 %v4833_v51  ;;  %3551 = vmatprep.subr.bf16.mxu0 %v4838_v52 }
 0x176   : > { %3592 = vmatprep.subr.bf16.mxu1 %v4841_v26  ;;  %v4908_v26 = vld [vmem:[%s5060_s24 + $0xd44] ss:$8 sps:$4 sm:$0xff]  }
 0x178   : > { %3552 = vmatpush2.bf16.msra.mxu0 %v4836_v53  ;;  %v4903_v53 = vld [vmem:[%s5060_s24 + $0xc40] ss:$8 sps:$4 sm:$0xff]  }
 0x179   : > { %3593 = vmatpush2.bf16.msra.mxu1 %v4839_v54  ;;  %3553 = vmatprep.subr.bf16.mxu0 %v4844_v55  ;;  %v4906_v54 = vld [vmem:[%s5060_s24 + $0xd40] ss:$8 sps:$4 sm:$0xff]   ;;  %v4911_v55 = vld [vmem:[%s5060_s24 + $0xc34] ss:$8 sps:$4 sm:$0xff]  }
 0x17a   : > { %3594 = vmatprep.subr.bf16.mxu1 %v4847_v56  ;;  %v4914_v56 = vld [vmem:[%s5060_s24 + $0xd34] ss:$8 sps:$4 sm:$0xff]  }
 0x17c   : > { %3554 = vmatpush2.bf16.msra.mxu0 %v4842_v32  ;;  %v4909_v32 = vld [vmem:[%s5060_s24 + $0xc30] ss:$8 sps:$4 sm:$0xff]  }
 0x17d   : > { %3595 = vmatpush2.bf16.msra.mxu1 %v4845_v59  ;;  %3555 = vmatprep.subr.bf16.mxu0 %v4850_v60  ;;  %v4912_v59 = vld [vmem:[%s5060_s24 + $0xd30] ss:$8 sps:$4 sm:$0xff]   ;;  %v4917_v60 = vld [vmem:[%s5060_s24 + $0xc24] ss:$8 sps:$4 sm:$0xff]  }
 0x17e   : > { %3596 = vmatprep.subr.bf16.mxu1 %v4853_v61  ;;  %v4920_v61 = vld [vmem:[%s5060_s24 + $0xd24] ss:$8 sps:$4 sm:$0xff]  }
 0x180   : > { %3556 = vmatpush2.bf16.msra.mxu0 %v4848_v62  ;;  %v4915_v62 = vld [vmem:[%s5060_s24 + $0xc20] ss:$8 sps:$4 sm:$0xff]  }
 0x181   : > { %3597 = vmatpush2.bf16.msra.mxu1 %v4851_v0  ;;  %3557 = vmatprep.subr.bf16.mxu0 %v4856_v1  ;;  %v4918_v0 = vld [vmem:[%s5060_s24 + $0xd20] ss:$8 sps:$4 sm:$0xff]   ;;  %v4923_v1 = vld [vmem:[%s5060_s24 + $0xc14] ss:$8 sps:$4 sm:$0xff]  }
 0x182   : > { %3598 = vmatprep.subr.bf16.mxu1 %v4859_v2  ;;  %v4926_v2 = vld [vmem:[%s5060_s24 + $0xd14] ss:$8 sps:$4 sm:$0xff]  }
 0x184   : > { %3558 = vmatpush2.bf16.msra.mxu0 %v4854_v3  ;;  %v4921_v3 = vld [vmem:[%s5060_s24 + $0xc10] ss:$8 sps:$4 sm:$0xff]  }
 0x185   : > { %3599 = vmatpush2.bf16.msra.mxu1 %v4857_v4  ;;  %3559 = vmatprep.subr.bf16.mxu0 %v4862_v5  ;;  %v4924_v4 = vld [vmem:[%s5060_s24 + $0xd10] ss:$8 sps:$4 sm:$0xff]   ;;  %v4929_v5 = vld [vmem:[%s5060_s24 + $0xc04] ss:$8 sps:$4 sm:$0xff]  }
 0x186   : > { %3600 = vmatprep.subr.bf16.mxu1 %v4865_v6  ;;  %v4932_v6 = vld [vmem:[%s5060_s24 + $0xd04] ss:$8 sps:$4 sm:$0xff]  }
 0x188   : > { %3560 = vmatpush2.bf16.msra.mxu0 %v4860_v8  ;;  %v4927_v8 = vld [vmem:[%s5060_s24 + $0xc00] ss:$8 sps:$4 sm:$0xff]  }
 0x189   : > { %3601 = vmatpush2.bf16.msra.mxu1 %v4863_v9  ;;  %3561 = vmatprep.subr.bf16.mxu0 %v4868_v36  ;;  %v4930_v9 = vld [vmem:[%s5060_s24 + $0xd00] ss:$8 sps:$4 sm:$0xff]   ;;  %v4935_v36 = vld [vmem:[%s5060_s24 + $0xcf4] ss:$8 sps:$4 sm:$0xff]  }
 0x18a   : > { %3602 = vmatprep.subr.bf16.mxu1 %v4871_v10  ;;  %v4938_v10 = vld [vmem:[%s5060_s24 + $0xdf4] ss:$8 sps:$4 sm:$0xff]  }
 0x18c   : > { %3562 = vmatpush2.bf16.msra.mxu0 %v4866_v11  ;;  %v4933_v11 = vld [vmem:[%s5060_s24 + $0xcf0] ss:$8 sps:$4 sm:$0xff]  }
 0x18d   : > { %3603 = vmatpush2.bf16.msra.mxu1 %v4869_v12  ;;  %3563 = vmatprep.subr.bf16.mxu0 %v4874_v13  ;;  %v4936_v12 = vld [vmem:[%s5060_s24 + $0xdf0] ss:$8 sps:$4 sm:$0xff]   ;;  %v4941_v13 = vld [vmem:[%s5060_s24 + $0xce4] ss:$8 sps:$4 sm:$0xff]  }
 0x18e   : > { %3604 = vmatprep.subr.bf16.mxu1 %v4877_v14  ;;  %v4944_v14 = vld [vmem:[%s5060_s24 + $0xde4] ss:$8 sps:$4 sm:$0xff]  }
 0x190   : > { %3564 = vmatpush2.bf16.msra.mxu0 %v4872_v16  ;;  %v4939_v16 = vld [vmem:[%s5060_s24 + $0xce0] ss:$8 sps:$4 sm:$0xff]  }
 0x191   : > { %3605 = vmatpush2.bf16.msra.mxu1 %v4875_v17  ;;  %3565 = vmatprep.subr.bf16.mxu0 %v4880_v18  ;;  %v4942_v17 = vld [vmem:[%s5060_s24 + $0xde0] ss:$8 sps:$4 sm:$0xff]   ;;  %v4947_v18 = vld [vmem:[%s5060_s24 + $0xcd4] ss:$8 sps:$4 sm:$0xff]  }
 0x192   : > { %3606 = vmatprep.subr.bf16.mxu1 %v4883_v19  ;;  %v4950_v19 = vld [vmem:[%s5060_s24 + $0xdd4] ss:$8 sps:$4 sm:$0xff]  }
 0x194   : > { %3566 = vmatpush2.bf16.msra.mxu0 %v4878_v58  ;;  %v4953_v58 = vld [vmem:[%s5060_s24 + $0xcc4] ss:$8 sps:$4 sm:$0xff]  }
 0x195   : > { %3607 = vmatpush2.bf16.msra.mxu1 %v4881_v23  ;;  %3617 = vmatprep.subr.bf16.mxu0 %v4887_v25  ;;  %v4956_v23 = vld [vmem:[%s5060_s24 + $0xdc4] ss:$8 sps:$4 sm:$0xff]   ;;  %v4951_v25 = vld [vmem:[%s5060_s24 + $0xcc0] ss:$8 sps:$4 sm:$0xff]  }
 0x196   : > { %3658 = vmatprep.subr.bf16.mxu1 %v4890_v27  ;;  %v4954_v27 = vld [vmem:[%s5060_s24 + $0xdc0] ss:$8 sps:$4 sm:$0xff]  }
 0x197   : > { %v3323_v34 = vpop.f32.mrf.mxu0  ;;  %3568 = vmatmul.mubr.bf16.vlgmr.msra.gmra.mxu0 %v814_v22  ;;  %v4948_v22 = vld [vmem:[%s5060_s24 + $0xdd0] ss:$8 sps:$4 sm:$0xff]  }
 0x198   : > { %v3364_v35 = vpop.f32.mrf.mxu1  ;;  %3609 = vmatmul.mubr.bf16.vlgmr.msra.gmra.mxu1 %v830_v7  ;;  %v3324_v37 = vadd.f32 %v3323_v34, %v5457_v21  ;;  %3618 = vmatpush1.bf16.msra.mxu0 %v4885_v63  ;;  %v4962_v7 = vld [vmem:[%s5060_s24 + $0xdb4] ss:$8 sps:$4 sm:$0xff]   ;;  %v4957_v63 = vld [vmem:[%s5060_s24 + $0xcb0] ss:$8 sps:$4 sm:$0xff]   ;;  %v4966_v34 = vld [vmem:[%s5060_s24 + $0xda0] ss:$8 sps:$4 sm:$0xff]  }
 0x199   : > { %3659 = vmatpush1.bf16.msra.mxu1 %v4888_v29  ;;  %v3325_v30 = vpop.f32.mrf.mxu0  ;;  %3619 = vmatprep.subr.bf16.mxu0 %v4893_v57  ;;  %v4960_v29 = vld [vmem:[%s5060_s24 + $0xdb0] ss:$8 sps:$4 sm:$0xff]   ;;  %v4965_v57 = vld [vmem:[%s5060_s24 + $0xca4] ss:$8 sps:$4 sm:$0xff]  }
 0x19a   : > { %v3366_v40 = vpop.f32.mrf.mxu1  ;;  %3660 = vmatprep.subr.bf16.mxu1 %v4896_v31  ;;  %v5535_v43 = vadd.f32 %v3364_v35, %v3324_v37  ;;  %v3326_v45 = vadd.f32 %v3325_v30, %v5460_v24  ;;  %3649 = vmatprep.mubr.bf16.mxu0 %v854_v28  ;;  %v4905_v24 = vld [vmem:[%s5060_s24 + $0xc44] ss:$8 sps:$4 sm:$0xff]   ;;  %v4959_v28 = vld [vmem:[%s5060_s24 + $0xcb4] ss:$8 sps:$4 sm:$0xff]  }
 0x19b   : > { %3690 = vmatprep.mubr.bf16.mxu1 %v856_v33  ;;  %v3327_v21 = vpop.f32.mrf.mxu0  ;;  %v4968_v31 = vld [vmem:[%s5060_s24 + $0xda4] ss:$8 sps:$4 sm:$0xff]   ;;  %v4963_v33 = vld [vmem:[%s5060_s24 + $0xca0] ss:$8 sps:$4 sm:$0xff]   ;;  %v4971_v35 = vld [vmem:[%s5060_s24 + $0xc94] ss:$8 sps:$4 sm:$0xff]  }
 0x19c   : > { %v3368_v46 = vpop.f32.mrf.mxu1  ;;  %v5538_v47 = vadd.f32 %v3366_v40, %v3326_v45  ;;  %3620 = vmatpush1.bf16.msra.mxu0 %v4891_v38  ;;  %v4974_v37 = vld [vmem:[%s5060_s24 + $0xd94] ss:$8 sps:$4 sm:$0xff]   ;;  %v4969_v38 = vld [vmem:[%s5060_s24 + $0xc90] ss:$8 sps:$4 sm:$0xff]   ;;  %v4977_v30 = vld [vmem:[%s5060_s24 + $0xc84] ss:$8 sps:$4 sm:$0xff]  }
 0x19d   : > { %3661 = vmatpush1.bf16.msra.mxu1 %v4894_v39  ;;  %v3328_v51 = vpop.f32.mrf.mxu0  ;;  %3621 = vmatprep.subr.bf16.mxu0 %v4899_v41  ;;  %v4972_v39 = vld [vmem:[%s5060_s24 + $0xd90] ss:$8 sps:$4 sm:$0xff]   ;;  %v4980_v40 = vld [vmem:[%s5060_s24 + $0xd84] ss:$8 sps:$4 sm:$0xff]   ;;  %v847_v41 = vrot.slane %v5511_v15, %v5110_v50  ;;  %v4978_v45 = vld [vmem:[%s5060_s24 + $0xd80] ss:$8 sps:$4 sm:$0xff]  }
 0x19e   : > { %v3369_v52 = vpop.f32.mrf.mxu1  ;;  %3662 = vmatprep.subr.bf16.mxu1 %v4902_v42  ;;  %v4975_v42 = vld [vmem:[%s5060_s24 + $0xc80] ss:$8 sps:$4 sm:$0xff]  }
 0x19f   : > { %v855_v21 = vcombine.high %v847_v41, %v847_v41 }
 0x1a0   : > { %3622 = vmatpush1.bf16.msra.mxu0 %v4897_v48 }
 0x1a1   : > { %3663 = vmatpush1.bf16.msra.mxu1 %v4900_v49  ;;  %3623 = vmatprep.subr.bf16.mxu0 %v4905_v24 }
 0x1a2   : > { %3664 = vmatprep.subr.bf16.mxu1 %v4908_v26 }
 0x1a4   : > { %3624 = vmatpush1.bf16.msra.mxu0 %v4903_v53 }
 0x1a5   : > { %3665 = vmatpush1.bf16.msra.mxu1 %v4906_v54  ;;  %3625 = vmatprep.subr.bf16.mxu0 %v4911_v55 }
 0x1a6   : > { %3666 = vmatprep.subr.bf16.mxu1 %v4914_v56 }
 0x1a8   : > { %3626 = vmatpush1.bf16.msra.mxu0 %v4909_v32 }
 0x1a9   : > { %3667 = vmatpush1.bf16.msra.mxu1 %v4912_v59  ;;  %3627 = vmatprep.subr.bf16.mxu0 %v4917_v60 }
 0x1aa   : > { %3668 = vmatprep.subr.bf16.mxu1 %v4920_v61 }
 0x1ac   : > { %3628 = vmatpush1.bf16.msra.mxu0 %v4915_v62 }
 0x1ad   : > { %3669 = vmatpush1.bf16.msra.mxu1 %v4918_v0  ;;  %3629 = vmatprep.subr.bf16.mxu0 %v4923_v1 }
 0x1ae   : > { %3670 = vmatprep.subr.bf16.mxu1 %v4926_v2 }
 0x1b0   : > { %3630 = vmatpush1.bf16.msra.mxu0 %v4921_v3 }
 0x1b1   : > { %3671 = vmatpush1.bf16.msra.mxu1 %v4924_v4  ;;  %3631 = vmatprep.subr.bf16.mxu0 %v4929_v5 }
 0x1b2   : > { %3672 = vmatprep.subr.bf16.mxu1 %v4932_v6 }
 0x1b4   : > { %3632 = vmatpush1.bf16.msra.mxu0 %v4927_v8 }
 0x1b5   : > { %3673 = vmatpush1.bf16.msra.mxu1 %v4930_v9  ;;  %3633 = vmatprep.subr.bf16.mxu0 %v4935_v36 }
 0x1b6   : > { %3674 = vmatprep.subr.bf16.mxu1 %v4938_v10 }
 0x1b8   : > { %3634 = vmatpush2.bf16.msra.mxu0 %v4933_v11 }
 0x1b9   : > { %3675 = vmatpush2.bf16.msra.mxu1 %v4936_v12  ;;  %3635 = vmatprep.subr.bf16.mxu0 %v4941_v13 }
 0x1ba   : > { %3676 = vmatprep.subr.bf16.mxu1 %v4944_v14 }
 0x1bc   : > { %3636 = vmatpush2.bf16.msra.mxu0 %v4939_v16  ;;  %v5009_v16 = vmov 1983009808  }
 0x1bd   : > { %3677 = vmatpush2.bf16.msra.mxu1 %v4942_v17  ;;  %3637 = vmatprep.subr.bf16.mxu0 %v4947_v18  ;;  %v3703_v17 = vunpack.c.l.s4 %v5009_v16 }
 0x1be   : > { %3678 = vmatprep.subr.bf16.mxu1 %v4950_v19 }
 0x1c0   : > { %3638 = vmatpush2.bf16.msra.mxu0 %v4945_v20 }
 0x1c1   : > { %3679 = vmatpush2.bf16.msra.mxu1 %v4948_v22  ;;  %3639 = vmatprep.subr.bf16.mxu0 %v4953_v58  ;;  %v3704_v58 = vunpack.c.0.s8 %v3703_v17 }
 0x1c2   : > { %3680 = vmatprep.subr.bf16.mxu1 %v4956_v23 }
 0x1c4   : > { %3640 = vmatpush2.bf16.msra.mxu0 %v4951_v25 }
 0x1c5   : > { %3681 = vmatpush2.bf16.msra.mxu1 %v4954_v27  ;;  %3641 = vmatprep.subr.bf16.mxu0 %v4959_v28 }
 0x1c6   : > { %3682 = vmatprep.subr.bf16.mxu1 %v4962_v7 }
 0x1c8   : > { %3642 = vmatpush2.bf16.msra.mxu0 %v4957_v63 }
 0x1c9   : > { %3683 = vmatpush2.bf16.msra.mxu1 %v4960_v29  ;;  %3643 = vmatprep.subr.bf16.mxu0 %v4965_v57  ;;  %v3707_v57 = vsub.s32 %v3704_v58, %v5102_v44 }
 0x1ca   : > { %3684 = vmatprep.subr.bf16.mxu1 %v4968_v31 }
 0x1cc   : > { %3644 = vmatpush2.bf16.msra.mxu0 %v4963_v33 }
 0x1cd   : > { %3685 = vmatpush2.bf16.msra.mxu1 %v4966_v34  ;;  %3645 = vmatprep.subr.bf16.mxu0 %v4971_v35  ;;  %v229_v35 = vld [vmem:[#allocation2] sm:$0xf] }
 0x1ce   : > { %3686 = vmatprep.subr.bf16.mxu1 %v4974_v37 }
 0x1d0   : > { %3646 = vmatpush2.bf16.msra.mxu0 %v4969_v38 }
 0x1d1   : > { %3687 = vmatpush2.bf16.msra.mxu1 %v4972_v39  ;;  %3647 = vmatprep.subr.bf16.mxu0 %v4977_v30 }
 0x1d2   : > { %3688 = vmatprep.subr.bf16.mxu1 %v4980_v40 }
 0x1d4   : > { %3648 = vmatpush2.bf16.msra.mxu0 %v4975_v42 }
 0x1d5   : > { %3689 = vmatpush2.bf16.msra.mxu1 %v4978_v45 }
 0x1d7   : > { %v3405_v46 = vpop.f32.mrf.mxu0  ;;  %3650 = vmatmul.mubr.bf16.vlgmr.msra.gmra.mxu0 %v847_v41 }
 0x1d8   : > { %v3446_v48 = vpop.f32.mrf.mxu1  ;;  %3691 = vmatmul.mubr.bf16.vlgmr.msra.gmra.mxu1 %v855_v21  ;;  %v3406_v49 = vadd.f32 %v3405_v46, %v5535_v43 }
 0x1d9   : > { %v3407_v51 = vpop.f32.mrf.mxu0 }
 0x1da   : > { %v3448_v52 = vpop.f32.mrf.mxu1  ;;  %v3447_v24 = vadd.f32 %v3446_v48, %v3406_v49  ;;  %v3408_v50 = vadd.f32 %v3407_v51, %v5538_v47 }
 0x1db   : > { %v3409_v15 = vpop.f32.mrf.mxu0 }
 0x1dc   : > { %v3450_v26 = vpop.f32.mrf.mxu1  ;;  %v3449_v53 = vadd.f32 %v3448_v52, %v3408_v50 }
 0x1dd   : > { %v3410_v54 = vpop.f32.mrf.mxu0 }
 0x1de   : > { %v3451_v55 = vpop.f32.mrf.mxu1 }
 0x217   : > { %v3487_v56 = vpop.f32.mrf.mxu0 }
 0x218   : > { %v3528_v32 = vpop.f32.mrf.mxu1  ;;  %v3488_v59 = vadd.f32 %v3487_v56, %v3447_v24 }
 0x219   : > { %v3489_v60 = vpop.f32.mrf.mxu0 }
 0x21a   : > { %v3530_v61 = vpop.f32.mrf.mxu1  ;;  %v3529_v62 = vadd.f32 %v3528_v32, %v3488_v59  ;;  %v3490_v0 = vadd.f32 %v3489_v60, %v3449_v53 }
 0x21b   : > { %v3491_v1 = vpop.f32.mrf.mxu0 }
 0x21c   : > { %v3532_v2 = vpop.f32.mrf.mxu1  ;;  %v3531_v43 = vadd.f32 %v3530_v61, %v3490_v0 }
 0x21d   : > { %v3492_v3 = vpop.f32.mrf.mxu0 }
 0x21e   : > { %v3533_v4 = vpop.f32.mrf.mxu1 }
 0x257   : > { %v3569_v5 = vpop.f32.mrf.mxu0 }
 0x258   : > { %v3610_v6 = vpop.f32.mrf.mxu1  ;;  %v3570_v47 = vadd.f32 %v3569_v5, %v3529_v62 }
 0x259   : > { %v3571_v8 = vpop.f32.mrf.mxu0 }
 0x25a   : > { %v3612_v9 = vpop.f32.mrf.mxu1  ;;  %v3611_v36 = vadd.f32 %v3610_v6, %v3570_v47  ;;  %v3572_v14 = vadd.f32 %v3571_v8, %v3531_v43 }
 0x25b   : > { %v3573_v10 = vpop.f32.mrf.mxu0 }
 0x25c   : > { %v3614_v11 = vpop.f32.mrf.mxu1  ;;  %v3613_v20 = vadd.f32 %v3612_v9, %v3572_v14 }
 0x25d   : > { %v3574_v12 = vpop.f32.mrf.mxu0 }
 0x25e   : > { %v3615_v13 = vpop.f32.mrf.mxu1 }
 0x297   : > { %v3651_v18 = vpop.f32.mrf.mxu0 }
 0x298   : > { %v3692_v19 = vpop.f32.mrf.mxu1  ;;  %v3652_v22 = vadd.f32 %v3651_v18, %v3611_v36 }
 0x299   : > { %v3653_v23 = vpop.f32.mrf.mxu0 }
 0x29a   : > { %v3694_v25 = vpop.f32.mrf.mxu1  ;;  %v3654_v27 = vadd.f32 %v3653_v23, %v3613_v20  ;;  %v3693_v63 = vadd.f32 %v3692_v19, %v3652_v22 }
 0x29b   : > { %v3655_v28 = vpop.f32.mrf.mxu0 }
 0x29c   : > { %v3696_v7 = vpop.f32.mrf.mxu1  ;;  %v3695_v29 = vadd.f32 %v3694_v25, %v3654_v27 }
 0x29d   : > { %v3656_v31 = vpop.f32.mrf.mxu0 }
 0x29e   : > { %v3697_v33 = vpop.f32.mrf.mxu1  ;;  %v3701_v34 = vcombine.low %v3693_v63, %v3695_v29 }
 0x2a0   : > { %v3708_v37 = vrot.slane %v3701_v34, %v3707_v57  ;;  %3718 = sbr.rel (%p4274_p7) target bundleno = 702 (0x2be), region = 40 }
 0x2a2   : > { %v3710_v39 = vadd.f32 %v3708_v37, %v229_v35 }
 0x2a4   : > { %3714 = vst.msk [vmem:[#allocation2] sm:$0xf] %vm5599_vm5, %v3710_v39 }
 0x2a5   : > { %v3720_v30 = vld [vmem:[%s5627_s2] sm:$0x3]  ;;  %v3724_v40 = vsub.s32 0, %v5102_v44  ;;  %v3728_v41 = vsub.s32 1, %v5102_v44 }
 0x2a7   : > { %v3725_v42 = vrot.slane %v3720_v30, %v3724_v40  ;;  %v3729_v45 = vrot.slane %v3720_v30, %v3728_v41 }
 0x2a9   : > { %v3730_v21 = vcombine.low %v3725_v42, %v3729_v45 }
 0x2ab   : > { %v3719_v46 = vld [vmem:[#allocation2] sm:$0xf]  ;;  %v3737_v48 = vrot.slane %v3730_v21, %v3707_v57 }
 0x2ad   : > { %v3739_v49 = vadd.f32 %v3737_v48, %v3719_v46 }
 0x2af   : > { %4981 = vtanh.f32 %v3739_v49 }
 0x2bc   : > { %v4982_v51 = vpop.eup %4981 }
 0x2bd   : > { %3741 = vst.msk [vmem:[%s5628_s3] sm:$0xf] %vm5599_vm5, %v4982_v51 }
 0x2be PF: > { %s13_s14 = sadd.s32 1, %s5005_s14   ;;  %s5631_s12 = smov %s5001_s13 }
 0x2bf   : > { %p10_p8 = scmp.ge.s32.totalorder %s13_s14, 9   ;;  %s5632_s13 = smov %s5634_s15 }
 0x2c1   :  { %12 = sbr.rel (!%p10_p8) target bundleno = 2 (0x2), region = 73 }

</bundles_post_ra>
